<compile_context>
chip_gen: v5e
topology: v5e:2x2
jax: 0.10.0
libtpu: 0.0.40
codegen_flags: <defaults>
</compile_context>

<pallas_src>
import functools

import jax
import jax.numpy as jnp
from jax.experimental import pallas as pl
from jax.experimental.pallas import tpu as pltpu

COMPUTE_DTYPE = jnp.bfloat16        # activation storage / MXU operand dtype
BN_EPS = 1e-5


def _round_up(a, b):
    return (a + b - 1) // b * b


@functools.lru_cache(maxsize=None)
def _vmem_limit_bytes():
    """~70% of physical VMEM: ~89 MiB on v5e/v6e (128 MiB), ~44 MiB on v7x."""
    cap = 64 * 1024 * 1024
    try:
        info = pltpu.get_tpu_info()
        cap = int(getattr(info, "vmem_capacity_bytes", cap) or cap)
    except Exception:
        pass
    return int(min(96 * 1024 * 1024, max(32 * 1024 * 1024, cap * 7 // 10)))


def _tile_budget():
    return _vmem_limit_bytes() // 6


def _choose_row_tile(h_out, bytes_per_row, *, target_rows, budget, min_tiles=1):
    """Pick a row tile TH (multiple of 8) and padded height H_pad = k * TH."""
    th = max(8, min(64, _round_up(max(target_rows, 1), 8)))
    while th > 8 and th * bytes_per_row > budget:
        th -= 8

    def acceptable(t):
        hp = _round_up(h_out, t)
        if hp > max(_round_up(h_out, 8), int(h_out * 1.25)):
            return False                      # too much padded (wasted) compute
        return hp // t >= min_tiles           # keep >= 2 tiles for 2-TC chips

    while th > 8 and not acceptable(th):
        th -= 8
    th = min(th, _round_up(h_out, 8))
    return th, _round_up(h_out, th)


def _fuse_row_tile(h, w, c, fmax, budget):
    """Row tile for the fuse kernel: divides h, multiple of fmax, prefers x8."""
    divs = [d for d in range(fmax, h + 1, fmax) if h % d == 0] or [h]
    bytes_per_row = w * c * 16
    ok = [d for d in divs if d * bytes_per_row <= budget] or [divs[0]]
    pref = [d for d in ok if d % 8 == 0 or d == h] or ok
    target = max(8, -(-2048 // max(w, 1)))
    cand = [d for d in pref if d <= target] or [min(pref)]
    th = max(cand)
    if th % 8 and th != h:
        th = h
    return th


# ---------------------------------------------------------------------------
# Kernel 1: KxK conv (one im2col MXU matmul) + folded BN (+residual) (+ReLU)
# ---------------------------------------------------------------------------
def _conv_bn_kernel(x_ref, w_ref, scale_ref, shift_ref, *rest,
                    TH, WO, Cout, positions, DY, relu, has_res,
                    use_im2col, lane_dense):
    if has_res:
        res_ref, out_ref = rest
    else:
        (out_ref,) = rest
    Cv = x_ref.shape[-1]
    P = len(positions)

    row0 = pl.multiple_of(pl.program_id(1) * TH, TH)
    # TH output rows + halo.  Stride-2 was turned into stride-1 taps by the
    # wrapper-side space-to-depth, so all in-kernel slices are stride 1.
    xt = x_ref[pl.ds(row0, TH + DY), :, :]                    # (TH+DY, Wv, Cv)
    views = [xt[dy:dy + TH, dx:dx + WO, :] for dy, dx in positions]

    if use_im2col and P > 1:
        # single big contraction: K = P*Cv instead of P matmuls with K = Cv
        # TODO(synk): on v7x, if copy/VALU bound, concat only the dx taps and
        # accumulate over dy with KH matmuls.
        patches = jnp.concatenate(views, axis=-1).reshape(TH * WO, P * Cv)
        acc = jnp.dot(patches, w_ref[...], preferred_element_type=jnp.float32)
    else:
        acc = jnp.zeros((TH * WO, Cout), jnp.float32)
        for k, v in enumerate(views):
            acc = acc + jnp.dot(v.reshape(TH * WO, Cv),
                                w_ref[k * Cv:(k + 1) * Cv, :],
                                preferred_element_type=jnp.float32)

    y = acc * scale_ref[...] + shift_ref[...]                 # folded BN (f32)
    if lane_dense:
        y = y.reshape(TH, WO * Cout)                          # lane-dense tile
    else:
        y = y.reshape(TH, WO, Cout)
    if has_res:
        y = y + res_ref[...].astype(jnp.float32)
    if relu:
        y = jnp.maximum(y, 0.0)
    out_ref[...] = y.astype(out_ref.dtype)


def conv_bn(x, w, scale, shift, *, stride=1, relu=False, residual=None,
            _force_flags=None):
    """KxK conv ('same' padding) + folded BN (+residual) (+ReLU).

    x: (N,H,W,Cin) NHWC.  w: (KH,KW,Cin,Cout).  Returns bf16 NHWC output.
    stride=2 is computed at the strided resolution inside the kernel via a
    wrapper-side space-to-depth (valid only for odd K, 'same' pad, stride 2).
    """
    N, H, W, Cin = x.shape
    KH, KW, _, Cout = w.shape
    assert KH == KW and KH % 2 == 1, "odd 'same'-padded kernels only"
    assert stride in (1, 2)
    p = (KH - 1) // 2
    H_out = (H + 2 * p - KH) // stride + 1
    W_out = (W + 2 * p - KW) // stride + 1
    W_out_p = _round_up(W_out, 16)            # bf16: keep sublanes 16-aligned

    if _force_flags is None:
        use_im2col, lane_dense = _conv_flags()
    else:
        use_im2col, lane_dense = _force_flags

    if stride == 1:
        Cv, PH, PW = Cin, KH, KW
    else:
        Cv, PH, PW = stride * stride * Cin, (KH + 1) // 2, (KW + 1) // 2
    positions = tuple((dy, dx) for dy in range(PH) for dx in range(PW))
    DY, DX = PH - 1, PW - 1
    Ktot = len(positions) * Cv
    Wv_est = W_out_p + DX

    bytes_per_row = W_out_p * (8 * Cout + 2 * Ktot) + 2 * Wv_est * Cv
    TH, H_pad = _choose_row_tile(
        H_out, bytes_per_row,
        target_rows=-(-2048 // W_out_p),
        budget=_tile_budget(),
        min_tiles=2 if N == 1 else 1)

    # pad the input so every (TH + DY)-row window the kernel reads is in range
    H_need = (H_pad - 1) * stride + KH
    W_need = (W_out_p - 1) * stride + KW
    Hp = _round_up(H_need, stride)
    Wp = _round_up(W_need, stride)
    xp = jnp.pad(x.astype(COMPUTE_DTYPE),
                 ((0, 0), (p, Hp - H - p), (p, Wp - W - p), (0, 0)))

    if stride == 1:
        xv = xp
        w2 = w.reshape(KH * KW * Cin, Cout)
    else:                                     # stride == 2: space-to-depth
        s = stride
        xv = xp.reshape(N, Hp // s, s, Wp // s, s, Cin)
        xv = xv.transpose(0, 1, 3, 2, 4, 5).reshape(N, Hp // s, Wp // s, Cv)
        # TODO(synk): ~44% of these rows are structural zeros (unused
        # tap/phase combos); packing only the used row groups recovers MACs.
        w2 = jnp.zeros((Ktot, Cout), w.dtype)
        for dy in range(KH):
            for dx in range(KW):
                r0 = ((dy // s) * PW + dx // s) * Cv + ((dy % s) * s + dx % s) * Cin
                w2 = w2.at[r0:r0 + Cin, :].set(w[dy, dx])

    Hv, Wv = xv.shape[1], xv.shape[2]
    w2 = w2.astype(COMPUTE_DTYPE)
    scale2 = scale.reshape(1, Cout).astype(jnp.float32)
    shift2 = shift.reshape(1, Cout).astype(jnp.float32)

    args = [xv, w2, scale2, shift2]
    # TODO(synk): the whole padded image is double-buffered by the pipeline
    # although its block index only changes on the batch axis; pl.Buffered(1)
    # or a manual halo DMA would halve that footprint (matters most on v7x).
    in_specs = [
        pl.BlockSpec((None, Hv, Wv, Cv), lambda n, t: (n, 0, 0, 0)),
        pl.BlockSpec((Ktot, Cout), lambda n, t: (0, 0)),
        pl.BlockSpec((1, Cout), lambda n, t: (0, 0)),
        pl.BlockSpec((1, Cout), lambda n, t: (0, 0)),
    ]
    if residual is not None:
        res = residual.astype(COMPUTE_DTYPE)
        res = jnp.pad(res, ((0, 0), (0, H_pad - res.shape[1]),
                            (0, W_out_p - res.shape[2]), (0, 0)))
        if lane_dense:
            res = res.reshape(N, H_pad, W_out_p * Cout)
            in_specs.append(pl.BlockSpec((None, TH, W_out_p * Cout),
                                         lambda n, t: (n, t, 0)))
        else:
            in_specs.append(pl.BlockSpec((None, TH, W_out_p, Cout),
                                         lambda n, t: (n, t, 0, 0)))
        args.append(res)

    if lane_dense:
        out_shape = jax.ShapeDtypeStruct((N, H_pad, W_out_p * Cout), COMPUTE_DTYPE)
        out_spec = pl.BlockSpec((None, TH, W_out_p * Cout), lambda n, t: (n, t, 0))
    else:
        out_shape = jax.ShapeDtypeStruct((N, H_pad, W_out_p, Cout), COMPUTE_DTYPE)
        out_spec = pl.BlockSpec((None, TH, W_out_p, Cout), lambda n, t: (n, t, 0, 0))

    kernel = functools.partial(
        _conv_bn_kernel, TH=TH, WO=W_out_p, Cout=Cout, positions=positions,
        DY=DY, relu=relu, has_res=residual is not None,
        use_im2col=use_im2col, lane_dense=lane_dense)

    flops = 2 * N * H_pad * W_out_p * Ktot * Cout
    bytes_accessed = sum(a.size * a.dtype.itemsize for a in args)
    bytes_accessed += N * H_pad * W_out_p * Cout * 2

    out = pl.pallas_call(
        kernel,
        out_shape=out_shape,
        grid=(N, H_pad // TH),
        in_specs=in_specs,
        out_specs=out_spec,
        compiler_params=pltpu.CompilerParams(
            dimension_semantics=("parallel", "parallel"),
            vmem_limit_bytes=_vmem_limit_bytes()),
        cost_estimate=pl.CostEstimate(flops=int(flops), transcendentals=0,
                                      bytes_accessed=int(bytes_accessed)),
    )(*args)

    if lane_dense:
        out = out.reshape(N, H_pad, W_out_p, Cout)
    return out[:, :H_out, :W_out, :]


# ---------------------------------------------------------------------------
# Kernel 2: fuse-branch summation + final ReLU, with the 1x1-conv + BN +
#           nearest-neighbour upsample ("up") path folded in
# ---------------------------------------------------------------------------
def _fuse_sum_relu_kernel(*refs, TH, W, C, kinds, lane_dense):
    out_ref = refs[-1]
    acc = jnp.zeros((TH, W, C), jnp.float32)
    idx = 0
    for kind in kinds:
        if kind[0] == "plain":
            acc = acc + refs[idx][...].astype(jnp.float32)    # (TH, W, C)
            idx += 1
        else:                                                 # ("up", f, Cj)
            f, cj = kind[1], kind[2]
            x = refs[idx][...]                                # (TH/f, W/f, Cj)
            w = refs[idx + 1][...]
            sc = refs[idx + 2][...]
            sh = refs[idx + 3][...]
            idx += 4
            thl, wl = TH // f, W // f
            v = jnp.dot(x.reshape(thl * wl, cj), w,
                        preferred_element_type=jnp.float32)
            v = v * sc + sh                                   # folded BN
            v = v.reshape(thl, wl, C)
            # nearest-neighbour upsample, rows then columns, in-register
            v = jnp.broadcast_to(v[:, None], (thl, f, wl, C)).reshape(TH, wl, C)
            v = jnp.broadcast_to(v[:, :, None], (TH, wl, f, C)).reshape(TH, W, C)
            acc = acc + v
    acc = jnp.maximum(acc, 0.0)
    if lane_dense:
        out_ref[...] = acc.reshape(TH, W * C).astype(out_ref.dtype)
    else:
        out_ref[...] = acc.astype(out_ref.dtype)


def fuse_sum_relu(terms, out_dtype=COMPUTE_DTYPE, _force=None):
    """x_fused = relu(sum_j term_j).

    terms: list of ("plain", t[N,H,W,C]) or
           ("up", x_low[N,H/f,W/f,Cj], w1x1[1,1,Cj,C], scale[C], shift[C], f)
    """
    if _force is None:
        up_fold, lane_dense = _fuse_flags()
    else:
        up_fold, lane_dense = _force

    N, H, W, C = next(t[1].shape for t in terms if t[0] == "plain")

    if not up_fold:
        # fallback: materialize the 1x1 conv + nearest upsample in the wrapper
        mat = []
        for t in terms:
            if t[0] == "plain":
                mat.append(t)
            else:
                _, x, w, sc, sh, f = t
                y = conv_bn(x, w, sc, sh)
                y = jnp.repeat(jnp.repeat(y, f, axis=1), f, axis=2)
                mat.append(("plain", y))
        terms = mat

    fmax = max([t[5] for t in terms if t[0] == "up"] + [1])
    TH = _fuse_row_tile(H, W, C, fmax, _tile_budget())
    assert H % TH == 0 and TH % fmax == 0

    kinds, in_specs, args = [], [], []
    flops = 0
    for t in terms:
        if t[0] == "plain":
            kinds.append(("plain",))
            in_specs.append(pl.BlockSpec((None, TH, W, C),
                                         lambda n, tt: (n, tt, 0, 0)))
            args.append(t[1])
        else:
            _, x, w, sc, sh, f = t
            Cj = x.shape[-1]
            kinds.append(("up", f, Cj))
            in_specs += [
                pl.BlockSpec((None, TH // f, W // f, Cj),
                             lambda n, tt: (n, tt, 0, 0)),
                pl.BlockSpec((Cj, C), lambda n, tt: (0, 0)),
                pl.BlockSpec((1, C), lambda n, tt: (0, 0)),
                pl.BlockSpec((1, C), lambda n, tt: (0, 0)),
            ]
            args += [x,
                     w.reshape(Cj, C).astype(COMPUTE_DTYPE),
                     sc.reshape(1, C).astype(jnp.float32),
                     sh.reshape(1, C).astype(jnp.float32)]
            flops += 2 * N * (H // f) * (W // f) * Cj * C
    flops += N * H * W * C * len(terms)

    if lane_dense:
        out_shape = jax.ShapeDtypeStruct((N, H, W * C), out_dtype)
        out_spec = pl.BlockSpec((None, TH, W * C), lambda n, tt: (n, tt, 0))
    else:
        out_shape = jax.ShapeDtypeStruct((N, H, W, C), out_dtype)
        out_spec = pl.BlockSpec((None, TH, W, C), lambda n, tt: (n, tt, 0, 0))

    bytes_accessed = sum(a.size * a.dtype.itemsize for a in args)
    bytes_accessed += N * H * W * C * jnp.dtype(out_dtype).itemsize

    out = pl.pallas_call(
        functools.partial(_fuse_sum_relu_kernel, TH=TH, W=W, C=C,
                          kinds=tuple(kinds), lane_dense=lane_dense),
        out_shape=out_shape,
        grid=(N, H // TH),
        in_specs=in_specs,
        out_specs=out_spec,
        compiler_params=pltpu.CompilerParams(
            dimension_semantics=("parallel", "parallel"),
            vmem_limit_bytes=_vmem_limit_bytes()),
        cost_estimate=pl.CostEstimate(flops=int(flops), transcendentals=0,
                                      bytes_accessed=int(bytes_accessed)),
    )(*args)
    if lane_dense:
        out = out.reshape(N, H, W, C)
    return out


# ---------------------------------------------------------------------------
# One-time capability probes (run eagerly on tiny concrete inputs, so they are
# valid even if the surrounding forward pass is later jax.jit'ed).
# ---------------------------------------------------------------------------
_PROBES = {}


def _probe_ok(fn):
    try:
        jax.block_until_ready(fn())
        return True
    except Exception:
        return False


def _conv_flags():
    """(use_im2col, lane_dense_store) flags for the conv kernel."""
    if "conv" not in _PROBES:
        def run(flags):
            x = jnp.zeros((1, 8, 16, 8), COMPUTE_DTYPE)
            r = jnp.zeros((1, 8, 16, 4), COMPUTE_DTYPE)
            w = jnp.zeros((3, 3, 8, 4), jnp.float32)
            s = jnp.zeros((4,), jnp.float32)
            b = jnp.zeros((4,), jnp.float32)
            return conv_bn(x, w, s, b, relu=True, residual=r, _force_flags=flags)
        for flags in ((True, True), (True, False), (False, True), (False, False)):
            if _probe_ok(lambda f=flags: run(f)):
                _PROBES["conv"] = flags
                break
        else:
            _PROBES["conv"] = (False, False)
    return _PROBES["conv"]


def _fuse_flags():
    """(fold_upsample_in_kernel, lane_dense_store) flags for the fuse kernel."""
    if "fuse" not in _PROBES:
        lane = _conv_flags()[1]
        def run(flags):
            hi = jnp.zeros((1, 8, 16, 4), COMPUTE_DTYPE)
            lo = jnp.zeros((1, 4, 8, 8), COMPUTE_DTYPE)
            w = jnp.zeros((1, 1, 8, 4), jnp.float32)
            s = jnp.zeros((4,), jnp.float32)
            b = jnp.zeros((4,), jnp.float32)
            terms = [("plain", hi), ("up", lo, w, s, b, 2)]
            return fuse_sum_relu(terms, _force=flags)
        for flags in ((True, lane), (False, lane), (False, False)):
            if _probe_ok(lambda f=flags: run(f)):
                _PROBES["fuse"] = flags
                break
        else:
            _PROBES["fuse"] = (False, False)
    return _PROBES["fuse"]


# ---------------------------------------------------------------------------
# Module logic (parameter setup + composition) in plain JAX.
# ---------------------------------------------------------------------------
def init_conv(key, kh, kw, cin, cout):
    return jax.random.normal(key, (kh, kw, cin, cout), jnp.float32) / jnp.sqrt(
        float(kh * kw * cin))


def init_bn(key, c):
    k1, k2, k3, k4 = jax.random.split(key, 4)
    gamma = 1.0 + 0.1 * jax.random.normal(k1, (c,), jnp.float32)
    beta = 0.1 * jax.random.normal(k2, (c,), jnp.float32)
    mean = 0.1 * jax.random.normal(k3, (c,), jnp.float32)
    var = jax.random.uniform(k4, (c,), jnp.float32, minval=0.5, maxval=1.5)
    scale = gamma / jnp.sqrt(var + BN_EPS)
    shift = beta - mean * scale
    return scale, shift


def basic_block(x, p):
    # conv1 -> bn1 -> relu -> conv2 -> bn2 -> (+residual) -> relu
    # TODO(synk): fuse the two convs into one pallas_call (VMEM intermediate).
    out = conv_bn(x, p["w1"], p["s1"], p["b1"], relu=True)
    out = conv_bn(out, p["w2"], p["s2"], p["b2"], relu=True, residual=x)
    return out


def make_stage_params(key, stage, output_branches, c):
    kb, kf = jax.random.split(key)
    branches = []
    for i in range(stage):
        w = c * 2 ** i
        blocks = []
        for b in range(4):
            kblk = jax.random.fold_in(jax.random.fold_in(kb, i), b)
            k1, k2, k3, k4 = jax.random.split(kblk, 4)
            s1, b1 = init_bn(k2, w)
            s2, b2 = init_bn(k4, w)
            blocks.append(dict(w1=init_conv(k1, 3, 3, w, w), s1=s1, b1=b1,
                               w2=init_conv(k3, 3, 3, w, w), s2=s2, b2=b2))
        branches.append(blocks)

    fuse = []
    for i in range(output_branches):
        row = []
        for j in range(stage):
            kij = jax.random.fold_in(jax.random.fold_in(kf, i), j)
            if i == j:
                row.append(None)                                   # identity
            elif i < j:
                k1, k2 = jax.random.split(kij)
                sc, sh = init_bn(k2, c * 2 ** i)
                row.append(dict(kind="up",
                                w=init_conv(k1, 1, 1, c * 2 ** j, c * 2 ** i),
                                scale=sc, shift=sh, factor=2 ** (j - i)))
            else:
                ops = []
                cin = c * 2 ** j
                for k in range(i - j - 1):                         # intermediate downsamples
                    kk = jax.random.fold_in(kij, k)
                    k1, k2 = jax.random.split(kk)
                    sc, sh = init_bn(k2, cin)
                    ops.append(dict(w=init_conv(k1, 3, 3, cin, cin),
                                    scale=sc, shift=sh, relu=True))
                kk = jax.random.fold_in(kij, i - j - 1)
                k1, k2 = jax.random.split(kk)
                cout = c * 2 ** i
                sc, sh = init_bn(k2, cout)
                ops.append(dict(w=init_conv(k1, 3, 3, cin, cout),
                                scale=sc, shift=sh, relu=False))
                row.append(dict(kind="down", ops=ops))
        fuse.append(row)
    return dict(branches=branches, fuse=fuse)


def stage_module_forward(xs, params, stage, output_branches,
                         out_dtype=COMPUTE_DTYPE):
    xs = list(xs)
    # per-branch stack of 4 BasicBlocks
    for i in range(stage):
        h = xs[i]
        for blk in params["branches"][i]:
            h = basic_block(h, blk)
        xs[i] = h
    # fuse: x_fused[i] = relu( sum_j fuse_layers[i][j](x[j]) )
    x_fused = []
    for i in range(output_branches):
        terms = []
        for j in range(stage):
            p = params["fuse"][i][j]
            if i == j:
                terms.append(("plain", xs[j]))
            elif i < j:
                # 1x1 conv + BN + nearest 2^k upsample folded into the fuse kernel
                terms.append(("up", xs[j], p["w"], p["scale"], p["shift"],
                              p["factor"]))
            else:
                t = xs[j]
                for op in p["ops"]:
                    t = conv_bn(t, op["w"], op["scale"], op["shift"],
                                stride=2, relu=op["relu"])
                terms.append(("plain", t))
        x_fused.append(fuse_sum_relu(terms, out_dtype=out_dtype))
    return x_fused


if __name__ == "__main__":
    STAGE, OUT_BRANCHES, C = 2, 2, 4
    N, H0, W0 = 2, 16, 16

    key = jax.random.PRNGKey(0)
    kx, kp = jax.random.split(key)

    # PyTorch-convention NCHW inputs (one per branch), then -> NHWC bf16.
    x_nchw = [
        jax.random.normal(jax.random.fold_in(kx, i),
                          (N, C * 2 ** i, H0 // 2 ** i, W0 // 2 ** i), jnp.float32)
        for i in range(STAGE)
    ]
    xs = [jnp.transpose(x, (0, 2, 3, 1)).astype(COMPUTE_DTYPE) for x in x_nchw]

    params = make_stage_params(kp, STAGE, OUT_BRANCHES, C)
    outs = stage_module_forward(xs, params, STAGE, OUT_BRANCHES)
    outs = [jax.block_until_ready(o) for o in outs]

    assert outs[0].shape == (N, H0, W0, C)
    assert outs[1].shape == (N, H0 // 2, W0 // 2, 2 * C)
    assert all(bool(jnp.isfinite(o.astype(jnp.float32)).all()) for o in outs)
    print("KERNEL_OK")
</pallas_src>

<mosaic_0001>
module attributes {stable_mosaic.version = 11 : i64} {
  func.func @_conv_bn_kernel(%arg0: i32, %arg1: i32, %arg2: memref<1x10x18x8xbf16, #tpu.memory_space<vmem>>, %arg3: memref<72x4xbf16, #tpu.memory_space<vmem>>, %arg4: memref<1x4xf32, #tpu.memory_space<vmem>>, %arg5: memref<1x4xf32, #tpu.memory_space<vmem>>, %arg6: memref<1x8x64xbf16, #tpu.memory_space<vmem>>, %arg7: memref<1x8x64xbf16, #tpu.memory_space<vmem>>) attributes {dimension_semantics = [#tpu.dimension_semantics<parallel>, #tpu.dimension_semantics<parallel>], iteration_bounds = array<i64: 1, 1>, scalar_prefetch = 0 : i64, scratch_operands = 0 : i64, tpu.core_type = #tpu.core_type<tc>, window_params = [{transform_indices = @transform_0, window_bounds = array<i64: 1, 10, 18, 8>}, {pipeline_mode = #tpu.pipeline_mode<synchronous>, transform_indices = @transform_1, window_bounds = array<i64: 72, 4>}, {pipeline_mode = #tpu.pipeline_mode<synchronous>, transform_indices = @transform_2, window_bounds = array<i64: 1, 4>}, {pipeline_mode = #tpu.pipeline_mode<synchronous>, transform_indices = @transform_3, window_bounds = array<i64: 1, 4>}, {transform_indices = @transform_4, window_bounds = array<i64: 1, 8, 64>}, {transform_indices = @transform_5, window_bounds = array<i64: 1, 8, 64>}]} {
    %c8_i32 = arith.constant 8 : i32
    %0 = arith.muli %arg1, %c8_i32 : i32
    %1 = tpu.assume_multiple %0, 8 : i32
    %c0 = arith.constant 0 : index
    %2 = arith.index_cast %1 : i32 to index
    %c0_0 = arith.constant 0 : index
    %c0_1 = arith.constant 0 : index
    %3 = vector.load %arg2[%c0, %2, %c0_0, %c0_1] : memref<1x10x18x8xbf16, #tpu.memory_space<vmem>>, vector<1x10x18x8xbf16>
    %4 = vector.shape_cast %3 : vector<1x10x18x8xbf16> to vector<10x18x8xbf16>
    %5 = vector.extract_strided_slice %4 {offsets = [0, 0, 0], sizes = [8, 16, 8], strides = [1, 1, 1]} : vector<10x18x8xbf16> to vector<8x16x8xbf16>
    %6 = vector.extract_strided_slice %4 {offsets = [0, 1, 0], sizes = [8, 16, 8], strides = [1, 1, 1]} : vector<10x18x8xbf16> to vector<8x16x8xbf16>
    %7 = vector.extract_strided_slice %4 {offsets = [0, 2, 0], sizes = [8, 16, 8], strides = [1, 1, 1]} : vector<10x18x8xbf16> to vector<8x16x8xbf16>
    %8 = vector.extract_strided_slice %4 {offsets = [1, 0, 0], sizes = [8, 16, 8], strides = [1, 1, 1]} : vector<10x18x8xbf16> to vector<8x16x8xbf16>
    %9 = vector.extract_strided_slice %4 {offsets = [1, 1, 0], sizes = [8, 16, 8], strides = [1, 1, 1]} : vector<10x18x8xbf16> to vector<8x16x8xbf16>
    %10 = vector.extract_strided_slice %4 {offsets = [1, 2, 0], sizes = [8, 16, 8], strides = [1, 1, 1]} : vector<10x18x8xbf16> to vector<8x16x8xbf16>
    %11 = vector.extract_strided_slice %4 {offsets = [2, 0, 0], sizes = [8, 16, 8], strides = [1, 1, 1]} : vector<10x18x8xbf16> to vector<8x16x8xbf16>
    %12 = vector.extract_strided_slice %4 {offsets = [2, 1, 0], sizes = [8, 16, 8], strides = [1, 1, 1]} : vector<10x18x8xbf16> to vector<8x16x8xbf16>
    %13 = vector.extract_strided_slice %4 {offsets = [2, 2, 0], sizes = [8, 16, 8], strides = [1, 1, 1]} : vector<10x18x8xbf16> to vector<8x16x8xbf16>
    %14 = tpu.concatenate %5, %6, %7, %8, %9, %10, %11, %12, %13 in 2 : vector<8x16x8xbf16>, vector<8x16x8xbf16>, vector<8x16x8xbf16>, vector<8x16x8xbf16>, vector<8x16x8xbf16>, vector<8x16x8xbf16>, vector<8x16x8xbf16>, vector<8x16x8xbf16>, vector<8x16x8xbf16> -> vector<8x16x72xbf16>
    %15 = vector.shape_cast %14 : vector<8x16x72xbf16> to vector<128x72xbf16>
    %c0_2 = arith.constant 0 : index
    %c0_3 = arith.constant 0 : index
    %16 = vector.load %arg3[%c0_2, %c0_3] : memref<72x4xbf16, #tpu.memory_space<vmem>>, vector<72x4xbf16>
    %cst = arith.constant dense<0.000000e+00> : vector<128x4xf32>
    %17 = tpu.matmul %15, %16, %cst {dimension_numbers = #tpu.dot_dimension_numbers<[1], [0], [0], [1], [0, 0, 1, 1], [], []>} : vector<128x72xbf16>, vector<72x4xbf16>, vector<128x4xf32> -> vector<128x4xf32>
    %c0_4 = arith.constant 0 : index
    %c0_5 = arith.constant 0 : index
    %18 = vector.load %arg4[%c0_4, %c0_5] : memref<1x4xf32, #tpu.memory_space<vmem>>, vector<1x4xf32>
    %19 = vector.broadcast %18 : vector<1x4xf32> to vector<128x4xf32>
    %20 = arith.mulf %17, %19 : vector<128x4xf32>
    %c0_6 = arith.constant 0 : index
    %c0_7 = arith.constant 0 : index
    %21 = vector.load %arg5[%c0_6, %c0_7] : memref<1x4xf32, #tpu.memory_space<vmem>>, vector<1x4xf32>
    %22 = vector.broadcast %21 : vector<1x4xf32> to vector<128x4xf32>
    %23 = arith.addf %20, %22 : vector<128x4xf32>
    %24 = vector.shape_cast %23 : vector<128x4xf32> to vector<8x64xf32>
    %c0_8 = arith.constant 0 : index
    %c0_9 = arith.constant 0 : index
    %c0_10 = arith.constant 0 : index
    %25 = vector.load %arg6[%c0_8, %c0_9, %c0_10] : memref<1x8x64xbf16, #tpu.memory_space<vmem>>, vector<1x8x64xbf16>
    %26 = vector.shape_cast %25 : vector<1x8x64xbf16> to vector<8x64xbf16>
    %27 = arith.extf %26 : vector<8x64xbf16> to vector<8x64xf32>
    %28 = arith.addf %24, %27 : vector<8x64xf32>
    %cst_11 = arith.constant 0.000000e+00 : f32
    %29 = vector.broadcast %cst_11 : f32 to vector<8x64xf32>
    %30 = arith.maximumf %28, %29 : vector<8x64xf32>
    %31 = arith.truncf %30 : vector<8x64xf32> to vector<8x64xbf16>
    %c0_12 = arith.constant 0 : index
    %c0_13 = arith.constant 0 : index
    %c0_14 = arith.constant 0 : index
    %32 = vector.load %arg7[%c0_12, %c0_13, %c0_14] : memref<1x8x64xbf16, #tpu.memory_space<vmem>>, vector<1x8x64xbf16>
    %33 = vector.shape_cast %32 : vector<1x8x64xbf16> to vector<8x64xbf16>
    %34 = vector.shape_cast %31 : vector<8x64xbf16> to vector<1x8x64xbf16>
    tpu.vector_store %arg7[%c0_12, %c0_13, %c0_14], %34 {strides = array<i32>} : memref<1x8x64xbf16, #tpu.memory_space<vmem>>, vector<1x8x64xbf16>,
    return
  }
  func.func @transform_0(%arg0: i32, %arg1: i32) -> (i32, i32, i32, i32) {
    %c0_i32 = arith.constant 0 : i32
    %c0_i32_0 = arith.constant 0 : i32
    %c0_i32_1 = arith.constant 0 : i32
    %c0_i32_2 = arith.constant 0 : i32
    return %arg0, %c0_i32, %c0_i32_0, %c0_i32_1 : i32, i32, i32, i32
  }
  func.func @transform_1(%arg0: i32, %arg1: i32) -> (i32, i32) {
    %c0_i32 = arith.constant 0 : i32
    %c0_i32_0 = arith.constant 0 : i32
    %c0_i32_1 = arith.constant 0 : i32
    return %c0_i32, %c0_i32_0 : i32, i32
  }
  func.func @transform_2(%arg0: i32, %arg1: i32) -> (i32, i32) {
    %c0_i32 = arith.constant 0 : i32
    %c0_i32_0 = arith.constant 0 : i32
    %c0_i32_1 = arith.constant 0 : i32
    return %c0_i32, %c0_i32_0 : i32, i32
  }
  func.func @transform_3(%arg0: i32, %arg1: i32) -> (i32, i32) {
    %c0_i32 = arith.constant 0 : i32
    %c0_i32_0 = arith.constant 0 : i32
    %c0_i32_1 = arith.constant 0 : i32
    return %c0_i32, %c0_i32_0 : i32, i32
  }
  func.func @transform_4(%arg0: i32, %arg1: i32) -> (i32, i32, i32) {
    %c0_i32 = arith.constant 0 : i32
    %c0_i32_0 = arith.constant 0 : i32
    return %arg0, %arg1, %c0_i32 : i32, i32, i32
  }
  func.func @transform_5(%arg0: i32, %arg1: i32) -> (i32, i32, i32) {
    %c0_i32 = arith.constant 0 : i32
    %c0_i32_0 = arith.constant 0 : i32
    return %arg0, %arg1, %c0_i32 : i32, i32, i32
  }
}

module attributes {stable_mosaic.version = 11 : i64} {
  func.func @_conv_bn_kernel(%arg0: i32, %arg1: i32, %arg2: memref<1x10x18x8xbf16, #tpu.memory_space<vmem>>, %arg3: memref<72x4xbf16, #tpu.memory_space<vmem>>, %arg4: memref<1x4xf32, #tpu.memory_space<vmem>>, %arg5: memref<1x4xf32, #tpu.memory_space<vmem>>, %arg6: memref<1x8x16x4xbf16, #tpu.memory_space<vmem>>, %arg7: memref<1x8x16x4xbf16, #tpu.memory_space<vmem>>) attributes {dimension_semantics = [#tpu.dimension_semantics<parallel>, #tpu.dimension_semantics<parallel>], iteration_bounds = array<i64: 1, 1>, scalar_prefetch = 0 : i64, scratch_operands = 0 : i64, tpu.core_type = #tpu.core_type<tc>, window_params = [{transform_indices = @transform_0, window_bounds = array<i64: 1, 10, 18, 8>}, {pipeline_mode = #tpu.pipeline_mode<synchronous>, transform_indices = @transform_1, window_bounds = array<i64: 72, 4>}, {pipeline_mode = #tpu.pipeline_mode<synchronous>, transform_indices = @transform_2, window_bounds = array<i64: 1, 4>}, {pipeline_mode = #tpu.pipeline_mode<synchronous>, transform_indices = @transform_3, window_bounds = array<i64: 1, 4>}, {transform_indices = @transform_4, window_bounds = array<i64: 1, 8, 16, 4>}, {transform_indices = @transform_5, window_bounds = array<i64: 1, 8, 16, 4>}]} {
    %c8_i32 = arith.constant 8 : i32
    %0 = arith.muli %arg1, %c8_i32 : i32
    %1 = tpu.assume_multiple %0, 8 : i32
    %c0 = arith.constant 0 : index
    %2 = arith.index_cast %1 : i32 to index
    %c0_0 = arith.constant 0 : index
    %c0_1 = arith.constant 0 : index
    %3 = vector.load %arg2[%c0, %2, %c0_0, %c0_1] : memref<1x10x18x8xbf16, #tpu.memory_space<vmem>>, vector<1x10x18x8xbf16>
    %4 = vector.shape_cast %3 : vector<1x10x18x8xbf16> to vector<10x18x8xbf16>
    %5 = vector.extract_strided_slice %4 {offsets = [0, 0, 0], sizes = [8, 16, 8], strides = [1, 1, 1]} : vector<10x18x8xbf16> to vector<8x16x8xbf16>
    %6 = vector.extract_strided_slice %4 {offsets = [0, 1, 0], sizes = [8, 16, 8], strides = [1, 1, 1]} : vector<10x18x8xbf16> to vector<8x16x8xbf16>
    %7 = vector.extract_strided_slice %4 {offsets = [0, 2, 0], sizes = [8, 16, 8], strides = [1, 1, 1]} : vector<10x18x8xbf16> to vector<8x16x8xbf16>
    %8 = vector.extract_strided_slice %4 {offsets = [1, 0, 0], sizes = [8, 16, 8], strides = [1, 1, 1]} : vector<10x18x8xbf16> to vector<8x16x8xbf16>
    %9 = vector.extract_strided_slice %4 {offsets = [1, 1, 0], sizes = [8, 16, 8], strides = [1, 1, 1]} : vector<10x18x8xbf16> to vector<8x16x8xbf16>
    %10 = vector.extract_strided_slice %4 {offsets = [1, 2, 0], sizes = [8, 16, 8], strides = [1, 1, 1]} : vector<10x18x8xbf16> to vector<8x16x8xbf16>
    %11 = vector.extract_strided_slice %4 {offsets = [2, 0, 0], sizes = [8, 16, 8], strides = [1, 1, 1]} : vector<10x18x8xbf16> to vector<8x16x8xbf16>
    %12 = vector.extract_strided_slice %4 {offsets = [2, 1, 0], sizes = [8, 16, 8], strides = [1, 1, 1]} : vector<10x18x8xbf16> to vector<8x16x8xbf16>
    %13 = vector.extract_strided_slice %4 {offsets = [2, 2, 0], sizes = [8, 16, 8], strides = [1, 1, 1]} : vector<10x18x8xbf16> to vector<8x16x8xbf16>
    %14 = tpu.concatenate %5, %6, %7, %8, %9, %10, %11, %12, %13 in 2 : vector<8x16x8xbf16>, vector<8x16x8xbf16>, vector<8x16x8xbf16>, vector<8x16x8xbf16>, vector<8x16x8xbf16>, vector<8x16x8xbf16>, vector<8x16x8xbf16>, vector<8x16x8xbf16>, vector<8x16x8xbf16> -> vector<8x16x72xbf16>
    %15 = vector.shape_cast %14 : vector<8x16x72xbf16> to vector<128x72xbf16>
    %c0_2 = arith.constant 0 : index
    %c0_3 = arith.constant 0 : index
    %16 = vector.load %arg3[%c0_2, %c0_3] : memref<72x4xbf16, #tpu.memory_space<vmem>>, vector<72x4xbf16>
    %cst = arith.constant dense<0.000000e+00> : vector<128x4xf32>
    %17 = tpu.matmul %15, %16, %cst {dimension_numbers = #tpu.dot_dimension_numbers<[1], [0], [0], [1], [0, 0, 1, 1], [], []>} : vector<128x72xbf16>, vector<72x4xbf16>, vector<128x4xf32> -> vector<128x4xf32>
    %c0_4 = arith.constant 0 : index
    %c0_5 = arith.constant 0 : index
    %18 = vector.load %arg4[%c0_4, %c0_5] : memref<1x4xf32, #tpu.memory_space<vmem>>, vector<1x4xf32>
    %19 = vector.broadcast %18 : vector<1x4xf32> to vector<128x4xf32>
    %20 = arith.mulf %17, %19 : vector<128x4xf32>
    %c0_6 = arith.constant 0 : index
    %c0_7 = arith.constant 0 : index
    %21 = vector.load %arg5[%c0_6, %c0_7] : memref<1x4xf32, #tpu.memory_space<vmem>>, vector<1x4xf32>
    %22 = vector.broadcast %21 : vector<1x4xf32> to vector<128x4xf32>
    %23 = arith.addf %20, %22 : vector<128x4xf32>
    %24 = vector.shape_cast %23 : vector<128x4xf32> to vector<8x16x4xf32>
    %c0_8 = arith.constant 0 : index
    %c0_9 = arith.constant 0 : index
    %c0_10 = arith.constant 0 : index
    %c0_11 = arith.constant 0 : index
    %25 = vector.load %arg6[%c0_8, %c0_9, %c0_10, %c0_11] : memref<1x8x16x4xbf16, #tpu.memory_space<vmem>>, vector<1x8x16x4xbf16>
    %26 = vector.shape_cast %25 : vector<1x8x16x4xbf16> to vector<8x16x4xbf16>
    %27 = arith.extf %26 : vector<8x16x4xbf16> to vector<8x16x4xf32>
    %28 = arith.addf %24, %27 : vector<8x16x4xf32>
    %cst_12 = arith.constant 0.000000e+00 : f32
    %29 = vector.broadcast %cst_12 : f32 to vector<8x16x4xf32>
    %30 = arith.maximumf %28, %29 : vector<8x16x4xf32>
    %31 = arith.truncf %30 : vector<8x16x4xf32> to vector<8x16x4xbf16>
    %c0_13 = arith.constant 0 : index
    %c0_14 = arith.constant 0 : index
    %c0_15 = arith.constant 0 : index
    %c0_16 = arith.constant 0 : index
    %32 = vector.load %arg7[%c0_13, %c0_14, %c0_15, %c0_16] : memref<1x8x16x4xbf16, #tpu.memory_space<vmem>>, vector<1x8x16x4xbf16>
    %33 = vector.shape_cast %32 : vector<1x8x16x4xbf16> to vector<8x16x4xbf16>
    %34 = vector.shape_cast %31 : vector<8x16x4xbf16> to vector<1x8x16x4xbf16>
    tpu.vector_store %arg7[%c0_13, %c0_14, %c0_15, %c0_16], %34 {strides = array<i32>} : memref<1x8x16x4xbf16, #tpu.memory_space<vmem>>, vector<1x8x16x4xbf16>,
    return
  }
  func.func @transform_0(%arg0: i32, %arg1: i32) -> (i32, i32, i32, i32) {
    %c0_i32 = arith.constant 0 : i32
    %c0_i32_0 = arith.constant 0 : i32
    %c0_i32_1 = arith.constant 0 : i32
    %c0_i32_2 = arith.constant 0 : i32
    return %arg0, %c0_i32, %c0_i32_0, %c0_i32_1 : i32, i32, i32, i32
  }
  func.func @transform_1(%arg0: i32, %arg1: i32) -> (i32, i32) {
    %c0_i32 = arith.constant 0 : i32
    %c0_i32_0 = arith.constant 0 : i32
    %c0_i32_1 = arith.constant 0 : i32
    return %c0_i32, %c0_i32_0 : i32, i32
  }
  func.func @transform_2(%arg0: i32, %arg1: i32) -> (i32, i32) {
    %c0_i32 = arith.constant 0 : i32
    %c0_i32_0 = arith.constant 0 : i32
    %c0_i32_1 = arith.constant 0 : i32
    return %c0_i32, %c0_i32_0 : i32, i32
  }
  func.func @transform_3(%arg0: i32, %arg1: i32) -> (i32, i32) {
    %c0_i32 = arith.constant 0 : i32
    %c0_i32_0 = arith.constant 0 : i32
    %c0_i32_1 = arith.constant 0 : i32
    return %c0_i32, %c0_i32_0 : i32, i32
  }
  func.func @transform_4(%arg0: i32, %arg1: i32) -> (i32, i32, i32, i32) {
    %c0_i32 = arith.constant 0 : i32
    %c0_i32_0 = arith.constant 0 : i32
    %c0_i32_1 = arith.constant 0 : i32
    return %arg0, %arg1, %c0_i32, %c0_i32_0 : i32, i32, i32, i32
  }
  func.func @transform_5(%arg0: i32, %arg1: i32) -> (i32, i32, i32, i32) {
    %c0_i32 = arith.constant 0 : i32
    %c0_i32_0 = arith.constant 0 : i32
    %c0_i32_1 = arith.constant 0 : i32
    return %arg0, %arg1, %c0_i32, %c0_i32_0 : i32, i32, i32, i32
  }
}

module attributes {stable_mosaic.version = 11 : i64} {
  func.func @_conv_bn_kernel(%arg0: i32, %arg1: i32, %arg2: memref<1x10x18x8xbf16, #tpu.memory_space<vmem>>, %arg3: memref<72x4xbf16, #tpu.memory_space<vmem>>, %arg4: memref<1x4xf32, #tpu.memory_space<vmem>>, %arg5: memref<1x4xf32, #tpu.memory_space<vmem>>, %arg6: memref<1x8x64xbf16, #tpu.memory_space<vmem>>, %arg7: memref<1x8x64xbf16, #tpu.memory_space<vmem>>) attributes {dimension_semantics = [#tpu.dimension_semantics<parallel>, #tpu.dimension_semantics<parallel>], iteration_bounds = array<i64: 1, 1>, scalar_prefetch = 0 : i64, scratch_operands = 0 : i64, tpu.core_type = #tpu.core_type<tc>, window_params = [{transform_indices = @transform_0, window_bounds = array<i64: 1, 10, 18, 8>}, {pipeline_mode = #tpu.pipeline_mode<synchronous>, transform_indices = @transform_1, window_bounds = array<i64: 72, 4>}, {pipeline_mode = #tpu.pipeline_mode<synchronous>, transform_indices = @transform_2, window_bounds = array<i64: 1, 4>}, {pipeline_mode = #tpu.pipeline_mode<synchronous>, transform_indices = @transform_3, window_bounds = array<i64: 1, 4>}, {transform_indices = @transform_4, window_bounds = array<i64: 1, 8, 64>}, {transform_indices = @transform_5, window_bounds = array<i64: 1, 8, 64>}]} {
    %c8_i32 = arith.constant 8 : i32
    %0 = arith.muli %arg1, %c8_i32 : i32
    %1 = tpu.assume_multiple %0, 8 : i32
    %c0 = arith.constant 0 : index
    %2 = arith.index_cast %1 : i32 to index
    %c0_0 = arith.constant 0 : index
    %c0_1 = arith.constant 0 : index
    %3 = vector.load %arg2[%c0, %2, %c0_0, %c0_1] : memref<1x10x18x8xbf16, #tpu.memory_space<vmem>>, vector<1x10x18x8xbf16>
    %4 = vector.shape_cast %3 : vector<1x10x18x8xbf16> to vector<10x18x8xbf16>
    %5 = vector.extract_strided_slice %4 {offsets = [0, 0, 0], sizes = [8, 16, 8], strides = [1, 1, 1]} : vector<10x18x8xbf16> to vector<8x16x8xbf16>
    %6 = vector.extract_strided_slice %4 {offsets = [0, 1, 0], sizes = [8, 16, 8], strides = [1, 1, 1]} : vector<10x18x8xbf16> to vector<8x16x8xbf16>
    %7 = vector.extract_strided_slice %4 {offsets = [0, 2, 0], sizes = [8, 16, 8], strides = [1, 1, 1]} : vector<10x18x8xbf16> to vector<8x16x8xbf16>
    %8 = vector.extract_strided_slice %4 {offsets = [1, 0, 0], sizes = [8, 16, 8], strides = [1, 1, 1]} : vector<10x18x8xbf16> to vector<8x16x8xbf16>
    %9 = vector.extract_strided_slice %4 {offsets = [1, 1, 0], sizes = [8, 16, 8], strides = [1, 1, 1]} : vector<10x18x8xbf16> to vector<8x16x8xbf16>
    %10 = vector.extract_strided_slice %4 {offsets = [1, 2, 0], sizes = [8, 16, 8], strides = [1, 1, 1]} : vector<10x18x8xbf16> to vector<8x16x8xbf16>
    %11 = vector.extract_strided_slice %4 {offsets = [2, 0, 0], sizes = [8, 16, 8], strides = [1, 1, 1]} : vector<10x18x8xbf16> to vector<8x16x8xbf16>
    %12 = vector.extract_strided_slice %4 {offsets = [2, 1, 0], sizes = [8, 16, 8], strides = [1, 1, 1]} : vector<10x18x8xbf16> to vector<8x16x8xbf16>
    %13 = vector.extract_strided_slice %4 {offsets = [2, 2, 0], sizes = [8, 16, 8], strides = [1, 1, 1]} : vector<10x18x8xbf16> to vector<8x16x8xbf16>
    %cst = arith.constant 0.000000e+00 : f32
    %14 = vector.broadcast %cst : f32 to vector<128x4xf32>
    %15 = vector.shape_cast %5 : vector<8x16x8xbf16> to vector<128x8xbf16>
    %c0_2 = arith.constant 0 : index
    %c0_3 = arith.constant 0 : index
    %16 = vector.load %arg3[%c0_2, %c0_3] : memref<72x4xbf16, #tpu.memory_space<vmem>>, vector<8x4xbf16>
    %cst_4 = arith.constant dense<0.000000e+00> : vector<128x4xf32>
    %17 = tpu.matmul %15, %16, %cst_4 {dimension_numbers = #tpu.dot_dimension_numbers<[1], [0], [0], [1], [0, 0, 1, 1], [], []>} : vector<128x8xbf16>, vector<8x4xbf16>, vector<128x4xf32> -> vector<128x4xf32>
    %18 = arith.addf %14, %17 : vector<128x4xf32>
    %19 = vector.shape_cast %6 : vector<8x16x8xbf16> to vector<128x8xbf16>
    %c8 = arith.constant 8 : index
    %c0_5 = arith.constant 0 : index
    %20 = vector.load %arg3[%c8, %c0_5] : memref<72x4xbf16, #tpu.memory_space<vmem>>, vector<8x4xbf16>
    %cst_6 = arith.constant dense<0.000000e+00> : vector<128x4xf32>
    %21 = tpu.matmul %19, %20, %cst_6 {dimension_numbers = #tpu.dot_dimension_numbers<[1], [0], [0], [1], [0, 0, 1, 1], [], []>} : vector<128x8xbf16>, vector<8x4xbf16>, vector<128x4xf32> -> vector<128x4xf32>
    %22 = arith.addf %18, %21 : vector<128x4xf32>
    %23 = vector.shape_cast %7 : vector<8x16x8xbf16> to vector<128x8xbf16>
    %c16 = arith.constant 16 : index
    %c0_7 = arith.constant 0 : index
    %24 = vector.load %arg3[%c16, %c0_7] : memref<72x4xbf16, #tpu.memory_space<vmem>>, vector<8x4xbf16>
    %cst_8 = arith.constant dense<0.000000e+00> : vector<128x4xf32>
    %25 = tpu.matmul %23, %24, %cst_8 {dimension_numbers = #tpu.dot_dimension_numbers<[1], [0], [0], [1], [0, 0, 1, 1], [], []>} : vector<128x8xbf16>, vector<8x4xbf16>, vector<128x4xf32> -> vector<128x4xf32>
    %26 = arith.addf %22, %25 : vector<128x4xf32>
    %27 = vector.shape_cast %8 : vector<8x16x8xbf16> to vector<128x8xbf16>
    %c24 = arith.constant 24 : index
    %c0_9 = arith.constant 0 : index
    %28 = vector.load %arg3[%c24, %c0_9] : memref<72x4xbf16, #tpu.memory_space<vmem>>, vector<8x4xbf16>
    %cst_10 = arith.constant dense<0.000000e+00> : vector<128x4xf32>
    %29 = tpu.matmul %27, %28, %cst_10 {dimension_numbers = #tpu.dot_dimension_numbers<[1], [0], [0], [1], [0, 0, 1, 1], [], []>} : vector<128x8xbf16>, vector<8x4xbf16>, vector<128x4xf32> -> vector<128x4xf32>
    %30 = arith.addf %26, %29 : vector<128x4xf32>
    %31 = vector.shape_cast %9 : vector<8x16x8xbf16> to vector<128x8xbf16>
    %c32 = arith.constant 32 : index
    %c0_11 = arith.constant 0 : index
    %32 = vector.load %arg3[%c32, %c0_11] : memref<72x4xbf16, #tpu.memory_space<vmem>>, vector<8x4xbf16>
    %cst_12 = arith.constant dense<0.000000e+00> : vector<128x4xf32>
    %33 = tpu.matmul %31, %32, %cst_12 {dimension_numbers = #tpu.dot_dimension_numbers<[1], [0], [0], [1], [0, 0, 1, 1], [], []>} : vector<128x8xbf16>, vector<8x4xbf16>, vector<128x4xf32> -> vector<128x4xf32>
    %34 = arith.addf %30, %33 : vector<128x4xf32>
    %35 = vector.shape_cast %10 : vector<8x16x8xbf16> to vector<128x8xbf16>
    %c40 = arith.constant 40 : index
    %c0_13 = arith.constant 0 : index
    %36 = vector.load %arg3[%c40, %c0_13] : memref<72x4xbf16, #tpu.memory_space<vmem>>, vector<8x4xbf16>
    %cst_14 = arith.constant dense<0.000000e+00> : vector<128x4xf32>
    %37 = tpu.matmul %35, %36, %cst_14 {dimension_numbers = #tpu.dot_dimension_numbers<[1], [0], [0], [1], [0, 0, 1, 1], [], []>} : vector<128x8xbf16>, vector<8x4xbf16>, vector<128x4xf32> -> vector<128x4xf32>
    %38 = arith.addf %34, %37 : vector<128x4xf32>
    %39 = vector.shape_cast %11 : vector<8x16x8xbf16> to vector<128x8xbf16>
    %c48 = arith.constant 48 : index
    %c0_15 = arith.constant 0 : index
    %40 = vector.load %arg3[%c48, %c0_15] : memref<72x4xbf16, #tpu.memory_space<vmem>>, vector<8x4xbf16>
    %cst_16 = arith.constant dense<0.000000e+00> : vector<128x4xf32>
    %41 = tpu.matmul %39, %40, %cst_16 {dimension_numbers = #tpu.dot_dimension_numbers<[1], [0], [0], [1], [0, 0, 1, 1], [], []>} : vector<128x8xbf16>, vector<8x4xbf16>, vector<128x4xf32> -> vector<128x4xf32>
    %42 = arith.addf %38, %41 : vector<128x4xf32>
    %43 = vector.shape_cast %12 : vector<8x16x8xbf16> to vector<128x8xbf16>
    %c56 = arith.constant 56 : index
    %c0_17 = arith.constant 0 : index
    %44 = vector.load %arg3[%c56, %c0_17] : memref<72x4xbf16, #tpu.memory_space<vmem>>, vector<8x4xbf16>
    %cst_18 = arith.constant dense<0.000000e+00> : vector<128x4xf32>
    %45 = tpu.matmul %43, %44, %cst_18 {dimension_numbers = #tpu.dot_dimension_numbers<[1], [0], [0], [1], [0, 0, 1, 1], [], []>} : vector<128x8xbf16>, vector<8x4xbf16>, vector<128x4xf32> -> vector<128x4xf32>
    %46 = arith.addf %42, %45 : vector<128x4xf32>
    %47 = vector.shape_cast %13 : vector<8x16x8xbf16> to vector<128x8xbf16>
    %c64 = arith.constant 64 : index
    %c0_19 = arith.constant 0 : index
    %48 = vector.load %arg3[%c64, %c0_19] : memref<72x4xbf16, #tpu.memory_space<vmem>>, vector<8x4xbf16>
    %cst_20 = arith.constant dense<0.000000e+00> : vector<128x4xf32>
    %49 = tpu.matmul %47, %48, %cst_20 {dimension_numbers = #tpu.dot_dimension_numbers<[1], [0], [0], [1], [0, 0, 1, 1], [], []>} : vector<128x8xbf16>, vector<8x4xbf16>, vector<128x4xf32> -> vector<128x4xf32>
    %50 = arith.addf %46, %49 : vector<128x4xf32>
    %c0_21 = arith.constant 0 : index
    %c0_22 = arith.constant 0 : index
    %51 = vector.load %arg4[%c0_21, %c0_22] : memref<1x4xf32, #tpu.memory_space<vmem>>, vector<1x4xf32>
    %52 = vector.broadcast %51 : vector<1x4xf32> to vector<128x4xf32>
    %53 = arith.mulf %50, %52 : vector<128x4xf32>
    %c0_23 = arith.constant 0 : index
    %c0_24 = arith.constant 0 : index
    %54 = vector.load %arg5[%c0_23, %c0_24] : memref<1x4xf32, #tpu.memory_space<vmem>>, vector<1x4xf32>
    %55 = vector.broadcast %54 : vector<1x4xf32> to vector<128x4xf32>
    %56 = arith.addf %53, %55 : vector<128x4xf32>
    %57 = vector.shape_cast %56 : vector<128x4xf32> to vector<8x64xf32>
    %c0_25 = arith.constant 0 : index
    %c0_26 = arith.constant 0 : index
    %c0_27 = arith.constant 0 : index
    %58 = vector.load %arg6[%c0_25, %c0_26, %c0_27] : memref<1x8x64xbf16, #tpu.memory_space<vmem>>, vector<1x8x64xbf16>
    %59 = vector.shape_cast %58 : vector<1x8x64xbf16> to vector<8x64xbf16>
    %60 = arith.extf %59 : vector<8x64xbf16> to vector<8x64xf32>
    %61 = arith.addf %57, %60 : vector<8x64xf32>
    %cst_28 = arith.constant 0.000000e+00 : f32
    %62 = vector.broadcast %cst_28 : f32 to vector<8x64xf32>
    %63 = arith.maximumf %61, %62 : vector<8x64xf32>
    %64 = arith.truncf %63 : vector<8x64xf32> to vector<8x64xbf16>
    %c0_29 = arith.constant 0 : index
    %c0_30 = arith.constant 0 : index
    %c0_31 = arith.constant 0 : index
    %65 = vector.load %arg7[%c0_29, %c0_30, %c0_31] : memref<1x8x64xbf16, #tpu.memory_space<vmem>>, vector<1x8x64xbf16>
    %66 = vector.shape_cast %65 : vector<1x8x64xbf16> to vector<8x64xbf16>
    %67 = vector.shape_cast %64 : vector<8x64xbf16> to vector<1x8x64xbf16>
    tpu.vector_store %arg7[%c0_29, %c0_30, %c0_31], %67 {strides = array<i32>} : memref<1x8x64xbf16, #tpu.memory_space<vmem>>, vector<1x8x64xbf16>,
    return
  }
  func.func @transform_0(%arg0: i32, %arg1: i32) -> (i32, i32, i32, i32) {
    %c0_i32 = arith.constant 0 : i32
    %c0_i32_0 = arith.constant 0 : i32
    %c0_i32_1 = arith.constant 0 : i32
    %c0_i32_2 = arith.constant 0 : i32
    return %arg0, %c0_i32, %c0_i32_0, %c0_i32_1 : i32, i32, i32, i32
  }
  func.func @transform_1(%arg0: i32, %arg1: i32) -> (i32, i32) {
    %c0_i32 = arith.constant 0 : i32
    %c0_i32_0 = arith.constant 0 : i32
    %c0_i32_1 = arith.constant 0 : i32
    return %c0_i32, %c0_i32_0 : i32, i32
  }
  func.func @transform_2(%arg0: i32, %arg1: i32) -> (i32, i32) {
    %c0_i32 = arith.constant 0 : i32
    %c0_i32_0 = arith.constant 0 : i32
    %c0_i32_1 = arith.constant 0 : i32
    return %c0_i32, %c0_i32_0 : i32, i32
  }
  func.func @transform_3(%arg0: i32, %arg1: i32) -> (i32, i32) {
    %c0_i32 = arith.constant 0 : i32
    %c0_i32_0 = arith.constant 0 : i32
    %c0_i32_1 = arith.constant 0 : i32
    return %c0_i32, %c0_i32_0 : i32, i32
  }
  func.func @transform_4(%arg0: i32, %arg1: i32) -> (i32, i32, i32) {
    %c0_i32 = arith.constant 0 : i32
    %c0_i32_0 = arith.constant 0 : i32
    return %arg0, %arg1, %c0_i32 : i32, i32, i32
  }
  func.func @transform_5(%arg0: i32, %arg1: i32) -> (i32, i32, i32) {
    %c0_i32 = arith.constant 0 : i32
    %c0_i32_0 = arith.constant 0 : i32
    return %arg0, %arg1, %c0_i32 : i32, i32, i32
  }
}

module attributes {stable_mosaic.version = 11 : i64} {
  func.func @_conv_bn_kernel(%arg0: i32, %arg1: i32, %arg2: memref<1x10x18x8xbf16, #tpu.memory_space<vmem>>, %arg3: memref<72x4xbf16, #tpu.memory_space<vmem>>, %arg4: memref<1x4xf32, #tpu.memory_space<vmem>>, %arg5: memref<1x4xf32, #tpu.memory_space<vmem>>, %arg6: memref<1x8x16x4xbf16, #tpu.memory_space<vmem>>, %arg7: memref<1x8x16x4xbf16, #tpu.memory_space<vmem>>) attributes {dimension_semantics = [#tpu.dimension_semantics<parallel>, #tpu.dimension_semantics<parallel>], iteration_bounds = array<i64: 1, 1>, scalar_prefetch = 0 : i64, scratch_operands = 0 : i64, tpu.core_type = #tpu.core_type<tc>, window_params = [{transform_indices = @transform_0, window_bounds = array<i64: 1, 10, 18, 8>}, {pipeline_mode = #tpu.pipeline_mode<synchronous>, transform_indices = @transform_1, window_bounds = array<i64: 72, 4>}, {pipeline_mode = #tpu.pipeline_mode<synchronous>, transform_indices = @transform_2, window_bounds = array<i64: 1, 4>}, {pipeline_mode = #tpu.pipeline_mode<synchronous>, transform_indices = @transform_3, window_bounds = array<i64: 1, 4>}, {transform_indices = @transform_4, window_bounds = array<i64: 1, 8, 16, 4>}, {transform_indices = @transform_5, window_bounds = array<i64: 1, 8, 16, 4>}]} {
    %c8_i32 = arith.constant 8 : i32
    %0 = arith.muli %arg1, %c8_i32 : i32
    %1 = tpu.assume_multiple %0, 8 : i32
    %c0 = arith.constant 0 : index
    %2 = arith.index_cast %1 : i32 to index
    %c0_0 = arith.constant 0 : index
    %c0_1 = arith.constant 0 : index
    %3 = vector.load %arg2[%c0, %2, %c0_0, %c0_1] : memref<1x10x18x8xbf16, #tpu.memory_space<vmem>>, vector<1x10x18x8xbf16>
    %4 = vector.shape_cast %3 : vector<1x10x18x8xbf16> to vector<10x18x8xbf16>
    %5 = vector.extract_strided_slice %4 {offsets = [0, 0, 0], sizes = [8, 16, 8], strides = [1, 1, 1]} : vector<10x18x8xbf16> to vector<8x16x8xbf16>
    %6 = vector.extract_strided_slice %4 {offsets = [0, 1, 0], sizes = [8, 16, 8], strides = [1, 1, 1]} : vector<10x18x8xbf16> to vector<8x16x8xbf16>
    %7 = vector.extract_strided_slice %4 {offsets = [0, 2, 0], sizes = [8, 16, 8], strides = [1, 1, 1]} : vector<10x18x8xbf16> to vector<8x16x8xbf16>
    %8 = vector.extract_strided_slice %4 {offsets = [1, 0, 0], sizes = [8, 16, 8], strides = [1, 1, 1]} : vector<10x18x8xbf16> to vector<8x16x8xbf16>
    %9 = vector.extract_strided_slice %4 {offsets = [1, 1, 0], sizes = [8, 16, 8], strides = [1, 1, 1]} : vector<10x18x8xbf16> to vector<8x16x8xbf16>
    %10 = vector.extract_strided_slice %4 {offsets = [1, 2, 0], sizes = [8, 16, 8], strides = [1, 1, 1]} : vector<10x18x8xbf16> to vector<8x16x8xbf16>
    %11 = vector.extract_strided_slice %4 {offsets = [2, 0, 0], sizes = [8, 16, 8], strides = [1, 1, 1]} : vector<10x18x8xbf16> to vector<8x16x8xbf16>
    %12 = vector.extract_strided_slice %4 {offsets = [2, 1, 0], sizes = [8, 16, 8], strides = [1, 1, 1]} : vector<10x18x8xbf16> to vector<8x16x8xbf16>
    %13 = vector.extract_strided_slice %4 {offsets = [2, 2, 0], sizes = [8, 16, 8], strides = [1, 1, 1]} : vector<10x18x8xbf16> to vector<8x16x8xbf16>
    %cst = arith.constant 0.000000e+00 : f32
    %14 = vector.broadcast %cst : f32 to vector<128x4xf32>
    %15 = vector.shape_cast %5 : vector<8x16x8xbf16> to vector<128x8xbf16>
    %c0_2 = arith.constant 0 : index
    %c0_3 = arith.constant 0 : index
    %16 = vector.load %arg3[%c0_2, %c0_3] : memref<72x4xbf16, #tpu.memory_space<vmem>>, vector<8x4xbf16>
    %cst_4 = arith.constant dense<0.000000e+00> : vector<128x4xf32>
    %17 = tpu.matmul %15, %16, %cst_4 {dimension_numbers = #tpu.dot_dimension_numbers<[1], [0], [0], [1], [0, 0, 1, 1], [], []>} : vector<128x8xbf16>, vector<8x4xbf16>, vector<128x4xf32> -> vector<128x4xf32>
    %18 = arith.addf %14, %17 : vector<128x4xf32>
    %19 = vector.shape_cast %6 : vector<8x16x8xbf16> to vector<128x8xbf16>
    %c8 = arith.constant 8 : index
    %c0_5 = arith.constant 0 : index
    %20 = vector.load %arg3[%c8, %c0_5] : memref<72x4xbf16, #tpu.memory_space<vmem>>, vector<8x4xbf16>
    %cst_6 = arith.constant dense<0.000000e+00> : vector<128x4xf32>
    %21 = tpu.matmul %19, %20, %cst_6 {dimension_numbers = #tpu.dot_dimension_numbers<[1], [0], [0], [1], [0, 0, 1, 1], [], []>} : vector<128x8xbf16>, vector<8x4xbf16>, vector<128x4xf32> -> vector<128x4xf32>
    %22 = arith.addf %18, %21 : vector<128x4xf32>
    %23 = vector.shape_cast %7 : vector<8x16x8xbf16> to vector<128x8xbf16>
    %c16 = arith.constant 16 : index
    %c0_7 = arith.constant 0 : index
    %24 = vector.load %arg3[%c16, %c0_7] : memref<72x4xbf16, #tpu.memory_space<vmem>>, vector<8x4xbf16>
    %cst_8 = arith.constant dense<0.000000e+00> : vector<128x4xf32>
    %25 = tpu.matmul %23, %24, %cst_8 {dimension_numbers = #tpu.dot_dimension_numbers<[1], [0], [0], [1], [0, 0, 1, 1], [], []>} : vector<128x8xbf16>, vector<8x4xbf16>, vector<128x4xf32> -> vector<128x4xf32>
    %26 = arith.addf %22, %25 : vector<128x4xf32>
    %27 = vector.shape_cast %8 : vector<8x16x8xbf16> to vector<128x8xbf16>
    %c24 = arith.constant 24 : index
    %c0_9 = arith.constant 0 : index
    %28 = vector.load %arg3[%c24, %c0_9] : memref<72x4xbf16, #tpu.memory_space<vmem>>, vector<8x4xbf16>
    %cst_10 = arith.constant dense<0.000000e+00> : vector<128x4xf32>
    %29 = tpu.matmul %27, %28, %cst_10 {dimension_numbers = #tpu.dot_dimension_numbers<[1], [0], [0], [1], [0, 0, 1, 1], [], []>} : vector<128x8xbf16>, vector<8x4xbf16>, vector<128x4xf32> -> vector<128x4xf32>
    %30 = arith.addf %26, %29 : vector<128x4xf32>
    %31 = vector.shape_cast %9 : vector<8x16x8xbf16> to vector<128x8xbf16>
    %c32 = arith.constant 32 : index
    %c0_11 = arith.constant 0 : index
    %32 = vector.load %arg3[%c32, %c0_11] : memref<72x4xbf16, #tpu.memory_space<vmem>>, vector<8x4xbf16>
    %cst_12 = arith.constant dense<0.000000e+00> : vector<128x4xf32>
    %33 = tpu.matmul %31, %32, %cst_12 {dimension_numbers = #tpu.dot_dimension_numbers<[1], [0], [0], [1], [0, 0, 1, 1], [], []>} : vector<128x8xbf16>, vector<8x4xbf16>, vector<128x4xf32> -> vector<128x4xf32>
    %34 = arith.addf %30, %33 : vector<128x4xf32>
    %35 = vector.shape_cast %10 : vector<8x16x8xbf16> to vector<128x8xbf16>
    %c40 = arith.constant 40 : index
    %c0_13 = arith.constant 0 : index
    %36 = vector.load %arg3[%c40, %c0_13] : memref<72x4xbf16, #tpu.memory_space<vmem>>, vector<8x4xbf16>
    %cst_14 = arith.constant dense<0.000000e+00> : vector<128x4xf32>
    %37 = tpu.matmul %35, %36, %cst_14 {dimension_numbers = #tpu.dot_dimension_numbers<[1], [0], [0], [1], [0, 0, 1, 1], [], []>} : vector<128x8xbf16>, vector<8x4xbf16>, vector<128x4xf32> -> vector<128x4xf32>
    %38 = arith.addf %34, %37 : vector<128x4xf32>
    %39 = vector.shape_cast %11 : vector<8x16x8xbf16> to vector<128x8xbf16>
    %c48 = arith.constant 48 : index
    %c0_15 = arith.constant 0 : index
    %40 = vector.load %arg3[%c48, %c0_15] : memref<72x4xbf16, #tpu.memory_space<vmem>>, vector<8x4xbf16>
    %cst_16 = arith.constant dense<0.000000e+00> : vector<128x4xf32>
    %41 = tpu.matmul %39, %40, %cst_16 {dimension_numbers = #tpu.dot_dimension_numbers<[1], [0], [0], [1], [0, 0, 1, 1], [], []>} : vector<128x8xbf16>, vector<8x4xbf16>, vector<128x4xf32> -> vector<128x4xf32>
    %42 = arith.addf %38, %41 : vector<128x4xf32>
    %43 = vector.shape_cast %12 : vector<8x16x8xbf16> to vector<128x8xbf16>
    %c56 = arith.constant 56 : index
    %c0_17 = arith.constant 0 : index
    %44 = vector.load %arg3[%c56, %c0_17] : memref<72x4xbf16, #tpu.memory_space<vmem>>, vector<8x4xbf16>
    %cst_18 = arith.constant dense<0.000000e+00> : vector<128x4xf32>
    %45 = tpu.matmul %43, %44, %cst_18 {dimension_numbers = #tpu.dot_dimension_numbers<[1], [0], [0], [1], [0, 0, 1, 1], [], []>} : vector<128x8xbf16>, vector<8x4xbf16>, vector<128x4xf32> -> vector<128x4xf32>
    %46 = arith.addf %42, %45 : vector<128x4xf32>
    %47 = vector.shape_cast %13 : vector<8x16x8xbf16> to vector<128x8xbf16>
    %c64 = arith.constant 64 : index
    %c0_19 = arith.constant 0 : index
    %48 = vector.load %arg3[%c64, %c0_19] : memref<72x4xbf16, #tpu.memory_space<vmem>>, vector<8x4xbf16>
    %cst_20 = arith.constant dense<0.000000e+00> : vector<128x4xf32>
    %49 = tpu.matmul %47, %48, %cst_20 {dimension_numbers = #tpu.dot_dimension_numbers<[1], [0], [0], [1], [0, 0, 1, 1], [], []>} : vector<128x8xbf16>, vector<8x4xbf16>, vector<128x4xf32> -> vector<128x4xf32>
    %50 = arith.addf %46, %49 : vector<128x4xf32>
    %c0_21 = arith.constant 0 : index
    %c0_22 = arith.constant 0 : index
    %51 = vector.load %arg4[%c0_21, %c0_22] : memref<1x4xf32, #tpu.memory_space<vmem>>, vector<1x4xf32>
    %52 = vector.broadcast %51 : vector<1x4xf32> to vector<128x4xf32>
    %53 = arith.mulf %50, %52 : vector<128x4xf32>
    %c0_23 = arith.constant 0 : index
    %c0_24 = arith.constant 0 : index
    %54 = vector.load %arg5[%c0_23, %c0_24] : memref<1x4xf32, #tpu.memory_space<vmem>>, vector<1x4xf32>
    %55 = vector.broadcast %54 : vector<1x4xf32> to vector<128x4xf32>
    %56 = arith.addf %53, %55 : vector<128x4xf32>
    %57 = vector.shape_cast %56 : vector<128x4xf32> to vector<8x16x4xf32>
    %c0_25 = arith.constant 0 : index
    %c0_26 = arith.constant 0 : index
    %c0_27 = arith.constant 0 : index
    %c0_28 = arith.constant 0 : index
    %58 = vector.load %arg6[%c0_25, %c0_26, %c0_27, %c0_28] : memref<1x8x16x4xbf16, #tpu.memory_space<vmem>>, vector<1x8x16x4xbf16>
    %59 = vector.shape_cast %58 : vector<1x8x16x4xbf16> to vector<8x16x4xbf16>
    %60 = arith.extf %59 : vector<8x16x4xbf16> to vector<8x16x4xf32>
    %61 = arith.addf %57, %60 : vector<8x16x4xf32>
    %cst_29 = arith.constant 0.000000e+00 : f32
    %62 = vector.broadcast %cst_29 : f32 to vector<8x16x4xf32>
    %63 = arith.maximumf %61, %62 : vector<8x16x4xf32>
    %64 = arith.truncf %63 : vector<8x16x4xf32> to vector<8x16x4xbf16>
    %c0_30 = arith.constant 0 : index
    %c0_31 = arith.constant 0 : index
    %c0_32 = arith.constant 0 : index
    %c0_33 = arith.constant 0 : index
    %65 = vector.load %arg7[%c0_30, %c0_31, %c0_32, %c0_33] : memref<1x8x16x4xbf16, #tpu.memory_space<vmem>>, vector<1x8x16x4xbf16>
    %66 = vector.shape_cast %65 : vector<1x8x16x4xbf16> to vector<8x16x4xbf16>
    %67 = vector.shape_cast %64 : vector<8x16x4xbf16> to vector<1x8x16x4xbf16>
    tpu.vector_store %arg7[%c0_30, %c0_31, %c0_32, %c0_33], %67 {strides = array<i32>} : memref<1x8x16x4xbf16, #tpu.memory_space<vmem>>, vector<1x8x16x4xbf16>,
    return
  }
  func.func @transform_0(%arg0: i32, %arg1: i32) -> (i32, i32, i32, i32) {
    %c0_i32 = arith.constant 0 : i32
    %c0_i32_0 = arith.constant 0 : i32
    %c0_i32_1 = arith.constant 0 : i32
    %c0_i32_2 = arith.constant 0 : i32
    return %arg0, %c0_i32, %c0_i32_0, %c0_i32_1 : i32, i32, i32, i32
  }
  func.func @transform_1(%arg0: i32, %arg1: i32) -> (i32, i32) {
    %c0_i32 = arith.constant 0 : i32
    %c0_i32_0 = arith.constant 0 : i32
    %c0_i32_1 = arith.constant 0 : i32
    return %c0_i32, %c0_i32_0 : i32, i32
  }
  func.func @transform_2(%arg0: i32, %arg1: i32) -> (i32, i32) {
    %c0_i32 = arith.constant 0 : i32
    %c0_i32_0 = arith.constant 0 : i32
    %c0_i32_1 = arith.constant 0 : i32
    return %c0_i32, %c0_i32_0 : i32, i32
  }
  func.func @transform_3(%arg0: i32, %arg1: i32) -> (i32, i32) {
    %c0_i32 = arith.constant 0 : i32
    %c0_i32_0 = arith.constant 0 : i32
    %c0_i32_1 = arith.constant 0 : i32
    return %c0_i32, %c0_i32_0 : i32, i32
  }
  func.func @transform_4(%arg0: i32, %arg1: i32) -> (i32, i32, i32, i32) {
    %c0_i32 = arith.constant 0 : i32
    %c0_i32_0 = arith.constant 0 : i32
    %c0_i32_1 = arith.constant 0 : i32
    return %arg0, %arg1, %c0_i32, %c0_i32_0 : i32, i32, i32, i32
  }
  func.func @transform_5(%arg0: i32, %arg1: i32) -> (i32, i32, i32, i32) {
    %c0_i32 = arith.constant 0 : i32
    %c0_i32_0 = arith.constant 0 : i32
    %c0_i32_1 = arith.constant 0 : i32
    return %arg0, %arg1, %c0_i32, %c0_i32_0 : i32, i32, i32, i32
  }
}

module attributes {stable_mosaic.version = 11 : i64} {
  func.func @_conv_bn_kernel(%arg0: i32, %arg1: i32, %arg2: memref<1x18x18x4xbf16, #tpu.memory_space<vmem>>, %arg3: memref<36x4xbf16, #tpu.memory_space<vmem>>, %arg4: memref<1x4xf32, #tpu.memory_space<vmem>>, %arg5: memref<1x4xf32, #tpu.memory_space<vmem>>, %arg6: memref<1x16x16x4xbf16, #tpu.memory_space<vmem>>) attributes {dimension_semantics = [#tpu.dimension_semantics<parallel>, #tpu.dimension_semantics<parallel>], iteration_bounds = array<i64: 2, 1>, scalar_prefetch = 0 : i64, scratch_operands = 0 : i64, tpu.core_type = #tpu.core_type<tc>, window_params = [{transform_indices = @transform_0, window_bounds = array<i64: 1, 18, 18, 4>}, {pipeline_mode = #tpu.pipeline_mode<synchronous>, transform_indices = @transform_1, window_bounds = array<i64: 36, 4>}, {pipeline_mode = #tpu.pipeline_mode<synchronous>, transform_indices = @transform_2, window_bounds = array<i64: 1, 4>}, {pipeline_mode = #tpu.pipeline_mode<synchronous>, transform_indices = @transform_3, window_bounds = array<i64: 1, 4>}, {transform_indices = @transform_4, window_bounds = array<i64: 1, 16, 16, 4>}]} {
    %c16_i32 = arith.constant 16 : i32
    %0 = arith.muli %arg1, %c16_i32 : i32
    %1 = tpu.assume_multiple %0, 16 : i32
    %c0 = arith.constant 0 : index
    %2 = arith.index_cast %1 : i32 to index
    %c0_0 = arith.constant 0 : index
    %c0_1 = arith.constant 0 : index
    %3 = vector.load %arg2[%c0, %2, %c0_0, %c0_1] : memref<1x18x18x4xbf16, #tpu.memory_space<vmem>>, vector<1x18x18x4xbf16>
    %4 = vector.shape_cast %3 : vector<1x18x18x4xbf16> to vector<18x18x4xbf16>
    %5 = vector.extract_strided_slice %4 {offsets = [0, 0, 0], sizes = [16, 16, 4], strides = [1, 1, 1]} : vector<18x18x4xbf16> to vector<16x16x4xbf16>
    %6 = vector.extract_strided_slice %4 {offsets = [0, 1, 0], sizes = [16, 16, 4], strides = [1, 1, 1]} : vector<18x18x4xbf16> to vector<16x16x4xbf16>
    %7 = vector.extract_strided_slice %4 {offsets = [0, 2, 0], sizes = [16, 16, 4], strides = [1, 1, 1]} : vector<18x18x4xbf16> to vector<16x16x4xbf16>
    %8 = vector.extract_strided_slice %4 {offsets = [1, 0, 0], sizes = [16, 16, 4], strides = [1, 1, 1]} : vector<18x18x4xbf16> to vector<16x16x4xbf16>
    %9 = vector.extract_strided_slice %4 {offsets = [1, 1, 0], sizes = [16, 16, 4], strides = [1, 1, 1]} : vector<18x18x4xbf16> to vector<16x16x4xbf16>
    %10 = vector.extract_strided_slice %4 {offsets = [1, 2, 0], sizes = [16, 16, 4], strides = [1, 1, 1]} : vector<18x18x4xbf16> to vector<16x16x4xbf16>
    %11 = vector.extract_strided_slice %4 {offsets = [2, 0, 0], sizes = [16, 16, 4], strides = [1, 1, 1]} : vector<18x18x4xbf16> to vector<16x16x4xbf16>
    %12 = vector.extract_strided_slice %4 {offsets = [2, 1, 0], sizes = [16, 16, 4], strides = [1, 1, 1]} : vector<18x18x4xbf16> to vector<16x16x4xbf16>
    %13 = vector.extract_strided_slice %4 {offsets = [2, 2, 0], sizes = [16, 16, 4], strides = [1, 1, 1]} : vector<18x18x4xbf16> to vector<16x16x4xbf16>
    %cst = arith.constant 0.000000e+00 : f32
    %14 = vector.broadcast %cst : f32 to vector<256x4xf32>
    %15 = vector.shape_cast %5 : vector<16x16x4xbf16> to vector<256x4xbf16>
    %c0_2 = arith.constant 0 : index
    %c0_3 = arith.constant 0 : index
    %16 = vector.load %arg3[%c0_2, %c0_3] : memref<36x4xbf16, #tpu.memory_space<vmem>>, vector<4x4xbf16>
    %cst_4 = arith.constant dense<0.000000e+00> : vector<256x4xf32>
    %17 = tpu.matmul %15, %16, %cst_4 {dimension_numbers = #tpu.dot_dimension_numbers<[1], [0], [0], [1], [0, 0, 1, 1], [], []>} : vector<256x4xbf16>, vector<4x4xbf16>, vector<256x4xf32> -> vector<256x4xf32>
    %18 = arith.addf %14, %17 : vector<256x4xf32>
    %19 = vector.shape_cast %6 : vector<16x16x4xbf16> to vector<256x4xbf16>
    %c4 = arith.constant 4 : index
    %c0_5 = arith.constant 0 : index
    %20 = vector.load %arg3[%c4, %c0_5] : memref<36x4xbf16, #tpu.memory_space<vmem>>, vector<4x4xbf16>
    %cst_6 = arith.constant dense<0.000000e+00> : vector<256x4xf32>
    %21 = tpu.matmul %19, %20, %cst_6 {dimension_numbers = #tpu.dot_dimension_numbers<[1], [0], [0], [1], [0, 0, 1, 1], [], []>} : vector<256x4xbf16>, vector<4x4xbf16>, vector<256x4xf32> -> vector<256x4xf32>
    %22 = arith.addf %18, %21 : vector<256x4xf32>
    %23 = vector.shape_cast %7 : vector<16x16x4xbf16> to vector<256x4xbf16>
    %c8 = arith.constant 8 : index
    %c0_7 = arith.constant 0 : index
    %24 = vector.load %arg3[%c8, %c0_7] : memref<36x4xbf16, #tpu.memory_space<vmem>>, vector<4x4xbf16>
    %cst_8 = arith.constant dense<0.000000e+00> : vector<256x4xf32>
    %25 = tpu.matmul %23, %24, %cst_8 {dimension_numbers = #tpu.dot_dimension_numbers<[1], [0], [0], [1], [0, 0, 1, 1], [], []>} : vector<256x4xbf16>, vector<4x4xbf16>, vector<256x4xf32> -> vector<256x4xf32>
    %26 = arith.addf %22, %25 : vector<256x4xf32>
    %27 = vector.shape_cast %8 : vector<16x16x4xbf16> to vector<256x4xbf16>
    %c12 = arith.constant 12 : index
    %c0_9 = arith.constant 0 : index
    %28 = vector.load %arg3[%c12, %c0_9] : memref<36x4xbf16, #tpu.memory_space<vmem>>, vector<4x4xbf16>
    %cst_10 = arith.constant dense<0.000000e+00> : vector<256x4xf32>
    %29 = tpu.matmul %27, %28, %cst_10 {dimension_numbers = #tpu.dot_dimension_numbers<[1], [0], [0], [1], [0, 0, 1, 1], [], []>} : vector<256x4xbf16>, vector<4x4xbf16>, vector<256x4xf32> -> vector<256x4xf32>
    %30 = arith.addf %26, %29 : vector<256x4xf32>
    %31 = vector.shape_cast %9 : vector<16x16x4xbf16> to vector<256x4xbf16>
    %c16 = arith.constant 16 : index
    %c0_11 = arith.constant 0 : index
    %32 = vector.load %arg3[%c16, %c0_11] : memref<36x4xbf16, #tpu.memory_space<vmem>>, vector<4x4xbf16>
    %cst_12 = arith.constant dense<0.000000e+00> : vector<256x4xf32>
    %33 = tpu.matmul %31, %32, %cst_12 {dimension_numbers = #tpu.dot_dimension_numbers<[1], [0], [0], [1], [0, 0, 1, 1], [], []>} : vector<256x4xbf16>, vector<4x4xbf16>, vector<256x4xf32> -> vector<256x4xf32>
    %34 = arith.addf %30, %33 : vector<256x4xf32>
    %35 = vector.shape_cast %10 : vector<16x16x4xbf16> to vector<256x4xbf16>
    %c20 = arith.constant 20 : index
    %c0_13 = arith.constant 0 : index
    %36 = vector.load %arg3[%c20, %c0_13] : memref<36x4xbf16, #tpu.memory_space<vmem>>, vector<4x4xbf16>
    %cst_14 = arith.constant dense<0.000000e+00> : vector<256x4xf32>
    %37 = tpu.matmul %35, %36, %cst_14 {dimension_numbers = #tpu.dot_dimension_numbers<[1], [0], [0], [1], [0, 0, 1, 1], [], []>} : vector<256x4xbf16>, vector<4x4xbf16>, vector<256x4xf32> -> vector<256x4xf32>
    %38 = arith.addf %34, %37 : vector<256x4xf32>
    %39 = vector.shape_cast %11 : vector<16x16x4xbf16> to vector<256x4xbf16>
    %c24 = arith.constant 24 : index
    %c0_15 = arith.constant 0 : index
    %40 = vector.load %arg3[%c24, %c0_15] : memref<36x4xbf16, #tpu.memory_space<vmem>>, vector<4x4xbf16>
    %cst_16 = arith.constant dense<0.000000e+00> : vector<256x4xf32>
    %41 = tpu.matmul %39, %40, %cst_16 {dimension_numbers = #tpu.dot_dimension_numbers<[1], [0], [0], [1], [0, 0, 1, 1], [], []>} : vector<256x4xbf16>, vector<4x4xbf16>, vector<256x4xf32> -> vector<256x4xf32>
    %42 = arith.addf %38, %41 : vector<256x4xf32>
    %43 = vector.shape_cast %12 : vector<16x16x4xbf16> to vector<256x4xbf16>
    %c28 = arith.constant 28 : index
    %c0_17 = arith.constant 0 : index
    %44 = vector.load %arg3[%c28, %c0_17] : memref<36x4xbf16, #tpu.memory_space<vmem>>, vector<4x4xbf16>
    %cst_18 = arith.constant dense<0.000000e+00> : vector<256x4xf32>
    %45 = tpu.matmul %43, %44, %cst_18 {dimension_numbers = #tpu.dot_dimension_numbers<[1], [0], [0], [1], [0, 0, 1, 1], [], []>} : vector<256x4xbf16>, vector<4x4xbf16>, vector<256x4xf32> -> vector<256x4xf32>
    %46 = arith.addf %42, %45 : vector<256x4xf32>
    %47 = vector.shape_cast %13 : vector<16x16x4xbf16> to vector<256x4xbf16>
    %c32 = arith.constant 32 : index
    %c0_19 = arith.constant 0 : index
    %48 = vector.load %arg3[%c32, %c0_19] : memref<36x4xbf16, #tpu.memory_space<vmem>>, vector<4x4xbf16>
    %cst_20 = arith.constant dense<0.000000e+00> : vector<256x4xf32>
    %49 = tpu.matmul %47, %48, %cst_20 {dimension_numbers = #tpu.dot_dimension_numbers<[1], [0], [0], [1], [0, 0, 1, 1], [], []>} : vector<256x4xbf16>, vector<4x4xbf16>, vector<256x4xf32> -> vector<256x4xf32>
    %50 = arith.addf %46, %49 : vector<256x4xf32>
    %c0_21 = arith.constant 0 : index
    %c0_22 = arith.constant 0 : index
    %51 = vector.load %arg4[%c0_21, %c0_22] : memref<1x4xf32, #tpu.memory_space<vmem>>, vector<1x4xf32>
    %52 = vector.broadcast %51 : vector<1x4xf32> to vector<256x4xf32>
    %53 = arith.mulf %50, %52 : vector<256x4xf32>
    %c0_23 = arith.constant 0 : index
    %c0_24 = arith.constant 0 : index
    %54 = vector.load %arg5[%c0_23, %c0_24] : memref<1x4xf32, #tpu.memory_space<vmem>>, vector<1x4xf32>
    %55 = vector.broadcast %54 : vector<1x4xf32> to vector<256x4xf32>
    %56 = arith.addf %53, %55 : vector<256x4xf32>
    %57 = vector.shape_cast %56 : vector<256x4xf32> to vector<16x16x4xf32>
    %cst_25 = arith.constant 0.000000e+00 : f32
    %58 = vector.broadcast %cst_25 : f32 to vector<16x16x4xf32>
    %59 = arith.maximumf %57, %58 : vector<16x16x4xf32>
    %60 = arith.truncf %59 : vector<16x16x4xf32> to vector<16x16x4xbf16>
    %c0_26 = arith.constant 0 : index
    %c0_27 = arith.constant 0 : index
    %c0_28 = arith.constant 0 : index
    %c0_29 = arith.constant 0 : index
    %61 = vector.load %arg6[%c0_26, %c0_27, %c0_28, %c0_29] : memref<1x16x16x4xbf16, #tpu.memory_space<vmem>>, vector<1x16x16x4xbf16>
    %62 = vector.shape_cast %61 : vector<1x16x16x4xbf16> to vector<16x16x4xbf16>
    %63 = vector.shape_cast %60 : vector<16x16x4xbf16> to vector<1x16x16x4xbf16>
    tpu.vector_store %arg6[%c0_26, %c0_27, %c0_28, %c0_29], %63 {strides = array<i32>} : memref<1x16x16x4xbf16, #tpu.memory_space<vmem>>, vector<1x16x16x4xbf16>,
    return
  }
  func.func @transform_0(%arg0: i32, %arg1: i32) -> (i32, i32, i32, i32) {
    %c0_i32 = arith.constant 0 : i32
    %c0_i32_0 = arith.constant 0 : i32
    %c0_i32_1 = arith.constant 0 : i32
    %c0_i32_2 = arith.constant 0 : i32
    return %arg0, %c0_i32, %c0_i32_0, %c0_i32_1 : i32, i32, i32, i32
  }
  func.func @transform_1(%arg0: i32, %arg1: i32) -> (i32, i32) {
    %c0_i32 = arith.constant 0 : i32
    %c0_i32_0 = arith.constant 0 : i32
    %c0_i32_1 = arith.constant 0 : i32
    return %c0_i32, %c0_i32_0 : i32, i32
  }
  func.func @transform_2(%arg0: i32, %arg1: i32) -> (i32, i32) {
    %c0_i32 = arith.constant 0 : i32
    %c0_i32_0 = arith.constant 0 : i32
    %c0_i32_1 = arith.constant 0 : i32
    return %c0_i32, %c0_i32_0 : i32, i32
  }
  func.func @transform_3(%arg0: i32, %arg1: i32) -> (i32, i32) {
    %c0_i32 = arith.constant 0 : i32
    %c0_i32_0 = arith.constant 0 : i32
    %c0_i32_1 = arith.constant 0 : i32
    return %c0_i32, %c0_i32_0 : i32, i32
  }
  func.func @transform_4(%arg0: i32, %arg1: i32) -> (i32, i32, i32, i32) {
    %c0_i32 = arith.constant 0 : i32
    %c0_i32_0 = arith.constant 0 : i32
    %c0_i32_1 = arith.constant 0 : i32
    return %arg0, %arg1, %c0_i32, %c0_i32_0 : i32, i32, i32, i32
  }
}

</mosaic_0001>

<bundles_post_ra>
// kernel: tpu_custom_call.1
= control target key start
LH: loop header
LB: loop body
LE: loop exit
PB: predicated region body
PF: predicated region fallthrough
CT: control target
= control target key end

     0   :  { %vm232_vm0 = vcmask 1046528   ;;  %s940_s7 = smov 24   ;;  %vm119_vm1 = vsmask.f32 7424  ;;  %s941_s10 = smov 16   ;;  %vm604_vm2 = vcmask 1043456   ;;  %s1502_s0 = inlined_call_operand.vmem [shape: bf16[1,10,18,8], index: 0, kind: input, shape index: {}]   ;;  %s1503_s1 = inlined_call_operand.vmem [shape: bf16[72,4], index: 1, kind: input, shape index: {}]   ;;  %s1504_s2 = inlined_call_operand.vmem [shape: f32[1,4], index: 2, kind: input, shape index: {}]   ;;  %s1505_s3 = inlined_call_operand.vmem [shape: f32[1,4], index: 3, kind: input, shape index: {}]   ;;  %s1506_s4 = inlined_call_operand.vmem [shape: bf16[1,8,16,4], index: 4, kind: input, shape index: {}]   ;;  %s1507_s5 = inlined_call_operand.vmem [shape: bf16[1,8,16,4], index: 5, kind: output, shape index: {}]  }
   0x1   :  { %v981_v0 = vld [vmem:[%s1502_s0 + $0x30] sm:$0xff]  ;;  %v39_v1 = vld [vmem:[%s1502_s0 + $0x38] sm:$0x1]  ;;  %v989_v2 = vld [vmem:[%s1502_s0 + $0x48] sm:$0xff]  ;;  %s942_s11 = smov 8   ;;  %s943_s14 = smov 40  }
   0x2   :  { %v107_v3 = vunpack.c.l.b16 %v39_v1  ;;  %v45_v4 = vld [vmem:[%s1502_s0 + $0x50] sm:$0x1]  ;;  %v169_v5 = vshrl.u32 %v981_v0, 16  ;;  %v171_v6 = vshll.u32 %v981_v0, 16  ;;  %v48_v8 = vld [vmem:[%s1502_s0 + $0x5c] sm:$0x1] }
   0x3   :  { %v109_v7 = vunpack.c.l.b16 %v45_v4  ;;  %v1002_v9 = vld [vmem:[%s1502_s0 + $0x3c] sm:$0xff]  ;;  %v245_v11 = vrot.slane %v981_v0, 1  ;;  %v195_v12 = vshll.u32 %v989_v2, 16  ;;  %v1009_v15 = vld [vmem:[%s1502_s0 + $0x54] sm:$0xff]  ;;  %v110_v18 = vunpack.c.l.b16 %v48_v8  ;;  %v42_v19 = vld [vmem:[%s1502_s0 + $0x44] sm:$0x1] }
   0x4   :  { %v115_v10 = vpack.c.b16 %v107_v3, %v107_v3  ;;  %v173_v13 = vrot.slane %v171_v6, 1  ;;  %286 = vrot.lane.b32.xlu2 %v1002_v9, %s940_s7  ;;  %v193_v21 = vshrl.u32 %v989_v2, 16  ;;  %v207_v26 = vshll.u32 %v1009_v15, 16  ;;  %v33_v49 = vld [vmem:[%s1502_s0 + $0x20] sm:$0x1]  ;;  %v1062_v54 = vld [vmem:[%s1502_s0 + $0x18] sm:$0xff] }
   0x5   :  { %v117_v14 = vpack.c.b16 %v109_v7, %v109_v7  ;;  %v197_v24 = vrot.slane %v195_v12, 1  ;;  %v108_v27 = vunpack.c.l.b16 %v42_v19  ;;  %v251_v29 = vrot.slane %v989_v2, 1  ;;  %v27_v52 = vld [vmem:[%s1502_s0 + $0x8] sm:$0x1]  ;;  %v1070_v57 = vld [vmem:[%s1502_s0] sm:$0xff]  ;;  %s944_s21 = smov 32  }
   0x6   :  { %v246_v16 = vrot.slane %v115_v10, 1  ;;  %v176_v17 = vshll.u32 %v115_v10, 16  ;;  %v174_v20 = vor.u32 %v173_v13, %v169_v5  ;;  %v118_v31 = vpack.c.b16 %v110_v18, %v110_v18  ;;  %v1081_v63 = vld [vmem:[%s1502_s0 + $0x60] sm:$0xff]  ;;  %s945_s24 = smov 48   ;;  %v51_v4 = vld [vmem:[%s1502_s0 + $0x68] sm:$0x1] }
   0x7   :  { %v200_v25 = vshll.u32 %v117_v14, 16  ;;  %v252_v30 = vrot.slane %v117_v14, 1  ;;  %v198_v32 = vor.u32 %v197_v24, %v193_v21  ;;  %v116_v34 = vpack.c.b16 %v108_v27, %v108_v27  ;;  %s946_s27 = smov 56   ;;  %s947_s15 = smov 64  }
   0x8   :  { %v1018_v22 = vsel %vm232_vm0, %v245_v11, %v246_v16  ;;  %v178_v23 = vrot.slane %v176_v17, 1  ;;  %v183_v35 = vshll.u32 %v1002_v9, 16  ;;  %v205_v36 = vshrl.u32 %v1009_v15, 16 }
   0x9   :  { %265 = vrot.lane.b32.xlu1 %v1018_v22, %s941_s10  ;;  %v202_v33 = vrot.slane %v200_v25, 1  ;;  %v209_v37 = vrot.slane %v207_v26, 1  ;;  %v1034_v38 = vsel %vm232_vm0, %v251_v29, %v252_v30  ;;  %v212_v39 = vshll.u32 %v118_v31, 16  ;;  %v36_v30 = vld [vmem:[%s1502_s0 + $0x2c] sm:$0x1] }
   0xa   :  { %v1024_v28 = vsel %vm119_vm1, %v174_v20, %v178_v23  ;;  %v248_v40 = vrot.slane %v1002_v9, 1  ;;  %v249_v41 = vrot.slane %v116_v34, 1  ;;  %v181_v43 = vshrl.u32 %v1002_v9, 16 }
   0xb   :  { %224 = vrot.lane.b32.xlu0 %v1024_v28, %s942_s11  ;;  %v1038_v42 = vsel %vm119_vm1, %v198_v32, %v202_v33  ;;  %v185_v44 = vrot.slane %v183_v35, 1  ;;  %v188_v45 = vshll.u32 %v116_v34, 16  ;;  %v210_v46 = vor.u32 %v209_v37, %v205_v36  ;;  %v30_v33 = vld [vmem:[%s1502_s0 + $0x14] sm:$0x1]  ;;  %v1123_v37 = vld [vmem:[%s1502_s0 + $0x24] sm:$0xff] }
   0xc   :  { %290 = vrot.lane.b32.xlu2 %v1009_v15, %s940_s7  ;;  %v214_v47 = vrot.slane %v212_v39, 1  ;;  %v1044_v48 = vsel %vm232_vm0, %v248_v40, %v249_v41  ;;  %v105_v55 = vunpack.c.l.b16 %v33_v49  ;;  %v103_v58 = vunpack.c.l.b16 %v27_v52 }
   0xd   :  { %v186_v50 = vor.u32 %v185_v44, %v181_v43  ;;  %v190_v51 = vrot.slane %v188_v45, 1  ;;  %v147_v60 = vshll.u32 %v1062_v54, 16  ;;  %v254_v61 = vrot.slane %v1009_v15, 1  ;;  %v1131_v43 = vld [vmem:[%s1502_s0 + $0xc] sm:$0xff] }
   0xe   :  { %v1057_v53 = vsel %vm119_vm1, %v210_v46, %v214_v47  ;;  %v113_v59 = vpack.c.b16 %v105_v55, %v105_v55  ;;  %v255_v62 = vrot.slane %v118_v31, 1  ;;  %v111_v1 = vpack.c.b16 %v103_v58, %v103_v58 }
   0xf   :  { %v1065_v56 = vsel %vm119_vm1, %v186_v50, %v190_v51  ;;  %v123_v3 = vshll.u32 %v1070_v57, 16  ;;  %v145_v5 = vshrl.u32 %v1062_v54, 16  ;;  %v149_v6 = vrot.slane %v147_v60, 1 }
  0x10   :  { %v152_v7 = vshll.u32 %v113_v59, 16  ;;  %v1091_v8 = vsel %vm232_vm0, %v254_v61, %v255_v62  ;;  %v121_v10 = vshrl.u32 %v1070_v57, 16  ;;  %v128_v12 = vshll.u32 %v111_v1, 16 }
  0x11   :  { %269 = vrot.lane.b32.xlu1 %v1034_v38, %s941_s10  ;;  %v125_v11 = vrot.slane %v123_v3, 1  ;;  %v295_v13 = vunpack.c.l.b16 %v51_v4  ;;  %v150_v14 = vor.u32 %v149_v6, %v145_v5  ;;  %v300_v20 = vshll.u32 %v1081_v63, 16 }
  0x12   :  { %v154_v16 = vrot.slane %v152_v7, 1  ;;  %v130_v18 = vrot.slane %v128_v12, 1  ;;  %v239_v23 = vrot.slane %v1062_v54, 1  ;;  %v240_v24 = vrot.slane %v113_v59, 1 }
  0x13   :  { %228 = vrot.lane.b32.xlu0 %v1038_v42, %s942_s11  ;;  %v126_v17 = vor.u32 %v125_v11, %v121_v10  ;;  %v296_v19 = vpack.c.b16 %v295_v13, %v295_v13  ;;  %v298_v26 = vshrl.u32 %v1081_v63, 16  ;;  %v302_v27 = vrot.slane %v300_v20, 1 }
  0x14   :  { %336 = vrot.lane.b32.xlu2 %v1044_v48, %s943_s14  ;;  %v1102_v21 = vsel %vm119_vm1, %v150_v14, %v154_v16  ;;  %v233_v31 = vrot.slane %v1070_v57, 1  ;;  %v234_v32 = vrot.slane %v111_v1, 1  ;;  %v1117_v34 = vsel %vm232_vm0, %v239_v23, %v240_v24  ;;  %v1204_v23 = vld [vmem:[%s1502_s0 + $0x6c] sm:$0xff] }
  0x15   :  { %v131_v25 = vsel %vm119_vm1, %v126_v17, %v130_v18  ;;  %v305_v29 = vshll.u32 %v296_v19, 16  ;;  %v303_v35 = vor.u32 %v302_v27, %v298_v26  ;;  %v106_v39 = vunpack.c.l.b16 %v36_v30 }
  0x16   :  { %v104_v40 = vunpack.c.l.b16 %v30_v33  ;;  %v235_v41 = vsel %vm232_vm0, %v233_v31, %v234_v32  ;;  %v159_v44 = vshll.u32 %v1123_v37, 16  ;;  %v325_v47 = vrot.slane %v1081_v63, 1 }
  0x17   :  { %v307_v36 = vrot.slane %v305_v29, 1  ;;  %v114_v46 = vpack.c.b16 %v106_v39, %v106_v39  ;;  %v326_v49 = vrot.slane %v296_v19, 1  ;;  %v135_v51 = vshll.u32 %v1131_v43, 16  ;;  %v54_v19 = vld [vmem:[%s1502_s0 + $0x74] sm:$0x1] }
  0x18   :  { %v112_v50 = vpack.c.b16 %v104_v40, %v104_v40  ;;  %v157_v52 = vshrl.u32 %v1123_v37, 16  ;;  %v161_v55 = vrot.slane %v159_v44, 1  ;;  %v133_v60 = vshrl.u32 %v1131_v43, 16  ;;  %v559_v29 = vld [vmem:[%s1503_s1 + $0x20] sm:$0xf]  ;;  %v875_v40 = vld [vmem:[%s1503_s1 + $0x18] sm:$0xff] }
  0x19   :  { %321 = vrot.lane.b32.xlu1 %v1057_v53, %s944_s21  ;;  %v308_v45 = vsel %vm119_vm1, %v303_v35, %v307_v36  ;;  %v164_v58 = vshll.u32 %v114_v46, 16  ;;  %v327_v59 = vsel %vm232_vm0, %v325_v47, %v326_v49  ;;  %v137_v61 = vrot.slane %v135_v51, 1  ;;  %v873_v47 = vld [vmem:[%s1503_s1 + $0x8] sm:$0xff] }
  0x1a   :  { %v140_v62 = vshll.u32 %v112_v50, 16  ;;  %v162_v1 = vor.u32 %v161_v55, %v157_v52  ;;  %v242_v10 = vrot.slane %v1123_v37, 1  ;;  %v243_v11 = vrot.slane %v114_v46, 1 }
  0x1b   :  { %317 = vrot.lane.b32.xlu0 %v1065_v56, %s944_s21  ;;  %v166_v3 = vrot.slane %v164_v58, 1  ;;  %v138_v4 = vor.u32 %v137_v61, %v133_v60  ;;  %v236_v12 = vrot.slane %v1131_v43, 1  ;;  %v237_v13 = vrot.slane %v112_v50, 1 }
  0x1c   :  { %361 = vrot.lane.b32.xlu2 %v1081_v63, %s945_s24  ;;  %v142_v5 = vrot.slane %v140_v62, 1  ;;  %v1161_v14 = vsel %vm232_vm0, %v242_v10, %v243_v11  ;;  %v366_v20 = vunpack.c.l.b16 %v54_v19  ;;  %v371_v24 = vshll.u32 %v1204_v23, 16 }
  0x1d   :  { %v1146_v6 = vsel %vm119_vm1, %v162_v1, %v166_v3  ;;  %v1164_v16 = vsel %vm232_vm0, %v236_v12, %v237_v13  ;;  %v577_v30 = vunpack.c.l.b16 %v559_v29  ;;  %vm415_vm3 = vcmask 64512  }
  0x1e   :  { %v143_v7 = vsel %vm119_vm1, %v138_v4, %v142_v5  ;;  %v373_v26 = vrot.slane %v371_v24, 1  ;;  %vm432_vm4 = vcmask 130048   ;;  %vm449_vm5 = vcmask 195584  }
  0x1f   :  { %v582_v35 = vpack.c.b16 %v577_v30, %v577_v30  ;;  %vm466_vm6 = vcmask 261120   ;;  %vm483_vm7 = vcmask 326656   ;;  %vm500_vm8 = vcmask 392192  }
  0x20   :  { %vm534_vm9 = vcmask 523264   ;;  %vm517_vm10 = vcmask 457728   ;;  %vm587_vm11 = vcmask 588800   ;;  %vm777_vm12 = vcmask 27648  }
  0x21   :  { %357 = vrot.lane.b32.xlu1 %v989_v2, %s945_s24 }
  0x23   :  { %340 = vrot.lane.b32.xlu0 %v1091_v8, %s943_s14 }
  0x24   :  { %388 = vrot.lane.b32.xlu2 %v1038_v42, %s946_s27 }
  0x29   :  { %220 = vrot.lane.b32.xlu1 %v1102_v21, %s942_s11 }
  0x2b   :  { %216 = vrot.lane.b32.xlu0 %v131_v25, %s942_s11 }
  0x2c   :  { %261 = vrot.lane.b32.xlu2 %v1117_v34, %s941_s10 }
  0x31   :  { %257 = vrot.lane.b32.xlu1 %v235_v41, %s941_s10 }
  0x33   :  { %392 = vrot.lane.b32.xlu0 %v308_v45, %s946_s27 }
  0x34   :  { %278 = vrot.lane.b32.xlu2 %v1131_v43, %s940_s7 }
  0x39   :  { %411 = vrot.lane.b32.xlu1 %v327_v59, %s947_s15 }
  0x3b   :  { %407 = vrot.lane.b32.xlu0 %v1034_v38, %s947_s15 }
  0x3c   :  { %313 = vrot.lane.b32.xlu2 %v1146_v6, %s944_s21 }
  0x41   :  { %309 = vrot.lane.b32.xlu1 %v143_v7, %s944_s21 }
  0x43   :  { %282 = vrot.lane.b32.xlu0 %v1123_v37, %s940_s7 }
  0x44   :  { %349 = vrot.lane.b32.xlu2 %v1062_v54, %s945_s24 }
  0x49   :  { %332 = vrot.lane.b32.xlu1 %v1161_v14, %s943_s14 }
  0x4b   :  { %328 = vrot.lane.b32.xlu0 %v1164_v16, %s943_s14 }
  0x4c   :  { %384 = vrot.lane.b32.xlu2 %v1024_v28, %s946_s27 }
  0x51   :  { %380 = vrot.lane.b32.xlu1 %v1102_v21, %s946_s27 }
  0x53   :  { %353 = vrot.lane.b32.xlu0 %v981_v0, %s945_s24 }
  0x54   :  { %226 = vrot.lane.b32.xlu2 %v1065_v56, %s942_s11 }
  0x59   :  { %403 = vrot.lane.b32.xlu1 %v1018_v22, %s947_s15 }
  0x5b   :  { %399 = vrot.lane.b32.xlu0 %v1117_v34, %s947_s15 }
  0x5c   :  { %271 = vrot.lane.b32.xlu2 %v1091_v8, %s941_s10 }
  0x5e   :  { %v1184_v17 = vpop.permute.xlu2 %286 }
  0x61   :  { %267 = vrot.lane.b32.xlu1 %v1044_v48, %s941_s10 }
  0x63   :  { %230 = vrot.lane.b32.xlu0 %v1057_v53, %s942_s11 }
  0x64   :  { %319 = vrot.lane.b32.xlu2 %v1038_v42, %s944_s21  ;;  %v1207_v42 = vpack.c.b16 %v366_v20, %v366_v20 }
  0x66   :  { %v1192_v18 = vpop.permute.xlu2 %290  ;;  %v376_v27 = vshll.u32 %v1207_v42, 16  ;;  %v397_v52 = vrot.slane %v1207_v42, 1 }
  0x68   :  { %v378_v32 = vrot.slane %v376_v27, 1 }
  0x69   :  { %292 = vrot.lane.b32.xlu1 %v1081_v63, %s940_s7  ;;  %v369_v63 = vshrl.u32 %v1204_v23, 16 }
  0x6b   :  { %288 = vrot.lane.b32.xlu0 %v989_v2, %s940_s7  ;;  %v374_v31 = vor.u32 %v373_v26, %v369_v63 }
  0x6c   :  { %342 = vrot.lane.b32.xlu2 %v327_v59, %s943_s14 }
  0x6d   :  { %v379_v36 = vsel %vm119_vm1, %v374_v31, %v378_v32 }
  0x6e   :  { %v1210_v25 = vpop.permute.xlu2 %336 }
  0x71   :  { %338 = vrot.lane.b32.xlu1 %v1034_v38, %s943_s14  ;;  %v606_v38 = vsel %vm604_vm2, %v582_v35, 0 }
  0x72   :  { %917 = vmatpush.bf16.msra.mxu3 %v606_v38  ;;  %916 = vmatpush.bf16.msra.mxu2 %v606_v38 }
  0x73   :  { %323 = vrot.lane.b32.xlu0 %v308_v45, %s944_s21  ;;  %915 = vmatpush.bf16.msra.mxu1 %v606_v38  ;;  %v874_v45 = vld [vmem:[%s1503_s1 + $0x10] sm:$0xff] }
  0x74   :  { %218 = vrot.lane.b32.xlu2 %v143_v7, %s942_s11  ;;  %611 = vmatpush.bf16.msra.mxu0 %v606_v38 }
  0x76   :  { %v1221_v33 = vpop.permute.xlu2 %361  ;;  %920 = vmatpush.bf16.msra.mxu3 %v875_v40  ;;  %919 = vmatpush.bf16.msra.mxu2 %v875_v40 }
  0x77   :  { %918 = vmatpush.bf16.msra.mxu1 %v875_v40 }
  0x78   :  { %612 = vmatpush.bf16.msra.mxu0 %v875_v40 }
  0x79   :  { %363 = vrot.lane.b32.xlu1 %v1204_v23, %s945_s24 }
  0x7a   :  { %923 = vmatpush.bf16.msra.mxu3 %v874_v45  ;;  %922 = vmatpush.bf16.msra.mxu2 %v874_v45 }
  0x7b   :  { %v266_v39 = vpop.permute.xlu1 %265  ;;  %359 = vrot.lane.b32.xlu0 %v1009_v15, %s945_s24  ;;  %921 = vmatpush.bf16.msra.mxu1 %v874_v45 }
  0x7c   :  { %394 = vrot.lane.b32.xlu2 %v379_v36, %s946_s27  ;;  %613 = vmatpush.bf16.msra.mxu0 %v874_v45 }
  0x7d   :  { %v225_v41 = vpop.permute.xlu0 %224 }
  0x7e   :  { %v1232_v44 = vpop.permute.xlu2 %388  ;;  %926 = vmatpush.bf16.msra.mxu3 %v873_v47  ;;  %925 = vmatpush.bf16.msra.mxu2 %v873_v47  ;;  %v425_v4 = vsel %vm415_vm3, %v981_v0, %v225_v41 }
  0x7f   :  { %924 = vmatpush.bf16.msra.mxu1 %v873_v47 }
  0x80   :  { %614 = vmatpush.bf16.msra.mxu0 %v873_v47 }
  0x81   :  { %390 = vrot.lane.b32.xlu1 %v1057_v53, %s946_s27  ;;  %v872_v53 = vld [vmem:[%s1503_s1] sm:$0xff] }
  0x82   :  { %929 = vmatpush.bf16.msra.mxu3 %v872_v53  ;;  %928 = vmatpush.bf16.msra.mxu2 %v872_v53 }
  0x83   :  { %v270_v46 = vpop.permute.xlu1 %269  ;;  %222 = vrot.lane.b32.xlu0 %v1146_v6, %s942_s11  ;;  %927 = vmatpush.bf16.msra.mxu1 %v872_v53 }
  0x84   :  { %409 = vrot.lane.b32.xlu2 %v1091_v8, %s947_s15  ;;  %v396_v8 = vrot.slane %v1204_v23, 1  ;;  %615 = vmatpush.bf16.msra.mxu0 %v872_v53 }
  0x85   :  { %v229_v49 = vpop.permute.xlu0 %228 }
  0x86   :  { %v1246_v50 = vpop.permute.xlu2 %261  ;;  %v398_v59 = vsel %vm232_vm0, %v396_v8, %v397_v52 }
  0x89   :  { %263 = vrot.lane.b32.xlu1 %v1161_v14, %s941_s10 }
  0x8b   :  { %v322_v51 = vpop.permute.xlu1 %321  ;;  %259 = vrot.lane.b32.xlu0 %v1164_v16, %s941_s10 }
  0x8c   :  { %284 = vrot.lane.b32.xlu2 %v981_v0, %s940_s7 }
  0x8d   :  { %v318_v55 = vpop.permute.xlu0 %317 }
  0x8e   :  { %v1259_v58 = vpop.permute.xlu2 %278 }
  0x91   :  { %280 = vrot.lane.b32.xlu1 %v1062_v54, %s940_s7 }
  0x93   :  { %v358_v60 = vpop.permute.xlu1 %357  ;;  %413 = vrot.lane.b32.xlu0 %v398_v59, %s947_s15 }
  0x94   :  { %330 = vrot.lane.b32.xlu2 %v1117_v34, %s943_s14  ;;  %v429_v34 = vsel %vm415_vm3, %v989_v2, %v229_v49 }
  0x95   :  { %v341_v61 = vpop.permute.xlu0 %340  ;;  %v446_v5 = vsel %vm432_vm4, %v429_v34, %v270_v46 }
  0x96   :  { %v314_v62 = vpop.permute.xlu2 %313  ;;  %v463_v0 = vsel %vm449_vm5, %v446_v5, %v1192_v18 }
  0x97   :  { %v480_v11 = vsel %vm466_vm6, %v463_v0, %v322_v51 }
  0x98   :  { %v497_v13 = vsel %vm483_vm7, %v480_v11, %v341_v61 }
  0x99   :  { %315 = vrot.lane.b32.xlu1 %v1024_v28, %s944_s21  ;;  %v442_v28 = vsel %vm432_vm4, %v425_v4, %v266_v39 }
  0x9a   :  { %v459_v2 = vsel %vm449_vm5, %v442_v28, %v1184_v17 }
  0x9b   :  { %v221_v1 = vpop.permute.xlu1 %220  ;;  %311 = vrot.lane.b32.xlu0 %v1102_v21, %s944_s21  ;;  %v476_v12 = vsel %vm466_vm6, %v459_v2, %v318_v55 }
  0x9c   :  { %355 = vrot.lane.b32.xlu2 %v1002_v9, %s945_s24  ;;  %v421_v27 = vsel %vm415_vm3, %v1062_v54, %v221_v1 }
  0x9d   :  { %v217_v3 = vpop.permute.xlu0 %216  ;;  %v438_v30 = vsel %vm432_vm4, %v421_v27, %v1246_v50 }
  0x9e   :  { %v350_v21 = vpop.permute.xlu2 %349  ;;  %v417_v31 = vsel %vm415_vm3, %v1070_v57, %v217_v3 }
  0xa1   :  { %351 = vrot.lane.b32.xlu1 %v1123_v37, %s945_s24 }
  0xa3   :  { %v258_v7 = vpop.permute.xlu1 %257  ;;  %334 = vrot.lane.b32.xlu0 %v1018_v22, %s943_s14  ;;  %v493_v22 = vsel %vm483_vm7, %v476_v12, %v1210_v25 }
  0xa4   :  { %401 = vrot.lane.b32.xlu2 %v1161_v14, %s947_s15  ;;  %v510_v16 = vsel %vm500_vm8, %v493_v22, %v358_v60  ;;  %v514_v14 = vsel %vm500_vm8, %v497_v13, %v1221_v33  ;;  %v434_v35 = vsel %vm432_vm4, %v417_v31, %v258_v7 }
  0xa5   :  { %v393_v10 = vpop.permute.xlu0 %392  ;;  %v451_v36 = vsel %vm449_vm5, %v434_v35, %v1259_v58 }
  0xa6   :  { %v531_v17 = vsel %vm517_vm10, %v514_v14, %v393_v10  ;;  %v385_v20 = vpop.permute.xlu2 %384 }
  0xa9   :  { %386 = vrot.lane.b32.xlu1 %v1065_v56, %s946_s27  ;;  %v527_v56 = vsel %vm517_vm10, %v510_v16, %v1232_v44 }
  0xab   :  { %v412_v18 = vpop.permute.xlu1 %411  ;;  %382 = vrot.lane.b32.xlu0 %v1146_v6, %s946_s27 }
  0xac   :  { %v548_v19 = vsel %vm534_vm9, %v531_v17, %v412_v18 }
  0xad   :  { %860 = vmatmul.msk.bf16.vlgmr.msra.gmra.mxu3 %vm587_vm11, %v548_v19  ;;  %v408_v23 = vpop.permute.xlu0 %407 }
  0xae   :  { %v544_v42 = vsel %vm534_vm9, %v527_v56, %v408_v23  ;;  %v227_v63 = vpop.permute.xlu2 %226 }
  0xaf   :  { %858 = vmatmul.msk.bf16.vlgmr.msra.gmra.mxu2 %vm587_vm11, %v544_v42  ;;  %v427_v1 = vsel %vm415_vm3, %v1002_v9, %v227_v63 }
  0xb3   :  { %v310_v24 = vpop.permute.xlu1 %309  ;;  %405 = vrot.lane.b32.xlu0 %v1044_v48, %s947_s15 }
  0xb4   :  { %v468_v39 = vsel %vm466_vm6, %v451_v36, %v310_v24 }
  0xb5   :  { %v283_v25 = vpop.permute.xlu0 %282 }
  0xb6   :  { %v272_v29 = vpop.permute.xlu2 %271  ;;  %v455_v32 = vsel %vm449_vm5, %v438_v30, %v283_v25 }
  0xb7   :  { %v472_v38 = vsel %vm466_vm6, %v455_v32, %v314_v62 }
  0xbb   :  { %v333_v6 = vpop.permute.xlu1 %332 }
  0xbc   :  { %v489_v54 = vsel %vm483_vm7, %v472_v38, %v333_v6 }
  0xbd   :  { %v329_v26 = vpop.permute.xlu0 %328 }
  0xbe   :  { %v485_v41 = vsel %vm483_vm7, %v468_v39, %v329_v26  ;;  %v320_v57 = vpop.permute.xlu2 %319 }
  0xbf   :  { %v502_v46 = vsel %vm500_vm8, %v485_v41, %v350_v21 }
  0xc3   :  { %v381_v33 = vpop.permute.xlu1 %380 }
  0xc4   :  { %v519_v49 = vsel %vm517_vm10, %v502_v46, %v381_v33 }
  0xc5   :  { %v354_v48 = vpop.permute.xlu0 %353 }
  0xc6   :  { %v506_v40 = vsel %vm500_vm8, %v489_v54, %v354_v48  ;;  %v343_v8 = vpop.permute.xlu2 %342 }
  0xc7   :  { %v523_v45 = vsel %vm517_vm10, %v506_v40, %v385_v20 }
  0xcb   :  { %v404_v44 = vpop.permute.xlu1 %403 }
  0xcc   :  { %v540_v47 = vsel %vm534_vm9, %v523_v45, %v404_v44 }
  0xcd   :  { %856 = vmatmul.msk.bf16.vlgmr.msra.gmra.mxu1 %vm587_vm11, %v540_v47  ;;  %v400_v50 = vpop.permute.xlu0 %399 }
  0xce   :  { %v536_v53 = vsel %vm534_vm9, %v519_v49, %v400_v50  ;;  %v219_v59 = vpop.permute.xlu2 %218  ;;  %v1375_v49 = vld [vmem:[%s1504_s2] ss:$0 sm:$0xff]  ;;  %v913_v50 = vld [vmem:[%s1506_s4 + $0x30] sm:$0xff]  }
  0xcf   :  { %854 = vmatmul.msk.bf16.vlgmr.msra.gmra.mxu0 %vm587_vm11, %v536_v53  ;;  %v419_v27 = vsel %vm415_vm3, %v1131_v43, %v219_v59  ;;  %v1383_v53 = vld [vmem:[%s1505_s3] ss:$0 sm:$0xff] }
  0xd3   :  { %v268_v51 = vpop.permute.xlu1 %267 }
  0xd4   :  { %v444_v4 = vsel %vm432_vm4, %v427_v1, %v268_v51 }
  0xd5   :  { %v231_v52 = vpop.permute.xlu0 %230 }
  0xd6   :  { %v395_v62 = vpop.permute.xlu2 %394  ;;  %v431_v9 = vsel %vm415_vm3, %v1009_v15, %v231_v52 }
  0xd7   :  { %v448_v22 = vsel %vm432_vm4, %v431_v9, %v272_v29 }
  0xdb   :  { %v293_v55 = vpop.permute.xlu1 %292 }
  0xdc   :  { %v465_v16 = vsel %vm449_vm5, %v448_v22, %v293_v55  ;;  %v902_v55 = vunpack.c.l.bf16 %v913_v50 }
  0xdd   :  { %v289_v58 = vpop.permute.xlu0 %288 }
  0xde   :  { %v461_v28 = vsel %vm449_vm5, %v444_v4, %v289_v58  ;;  %v410_v7 = vpop.permute.xlu2 %409 }
  0xdf   :  { %v478_v5 = vsel %vm466_vm6, %v461_v28, %v320_v57 }
  0xe3   :  { %v339_v60 = vpop.permute.xlu1 %338 }
  0xe4   :  { %v495_v21 = vsel %vm483_vm7, %v478_v5, %v339_v60 }
  0xe5   :  { %v324_v61 = vpop.permute.xlu0 %323 }
  0xe6   :  { %v482_v17 = vsel %vm466_vm6, %v465_v16, %v324_v61  ;;  %v285_v18 = vpop.permute.xlu2 %284 }
  0xe7   :  { %v499_v19 = vsel %vm483_vm7, %v482_v17, %v343_v8  ;;  %v911_v8 = vld [vmem:[%s1506_s4 + $0x20] sm:$0xff]  }
  0xe8   :  { %v894_v61 = vunpack.c.l.bf16 %v911_v8 }
  0xeb   :  { %v364_v3 = vpop.permute.xlu1 %363 }
  0xec   :  { %v516_v20 = vsel %vm500_vm8, %v499_v19, %v364_v3  ;;  %v909_v19 = vld [vmem:[%s1506_s4 + $0x10] sm:$0xff]  }
  0xed   :  { %v360_v34 = vpop.permute.xlu0 %359  ;;  %v533_v23 = vsel %vm517_vm10, %v516_v20, %v395_v62 }
  0xee   :  { %v512_v0 = vsel %vm500_vm8, %v495_v21, %v360_v34  ;;  %v331_v15 = vpop.permute.xlu2 %330 }
  0xf3   :  { %v391_v2 = vpop.permute.xlu1 %390 }
  0xf4   :  { %v529_v10 = vsel %vm517_vm10, %v512_v0, %v391_v2 }
  0xf5   :  { %v223_v11 = vpop.permute.xlu0 %222  ;;  %v546_v12 = vsel %vm534_vm9, %v529_v10, %v410_v7  ;;  %v903_v7 = vunpack.c.h.bf16 %v913_v50 }
  0xf6   :  { %859 = vmatmul.msk.bf16.gmra.mxu2 %vm587_vm11, %v546_v12  ;;  %v356_v6 = vpop.permute.xlu2 %355  ;;  %v423_v33 = vsel %vm415_vm3, %v1123_v37, %v223_v11  ;;  %v895_v12 = vunpack.c.h.bf16 %v911_v8 }
  0xfb   :  { %v264_v13 = vpop.permute.xlu1 %263 }
  0xfc   :  { %v440_v35 = vsel %vm432_vm4, %v423_v33, %v264_v13 }
  0xfd   :  { %v260_v14 = vpop.permute.xlu0 %259  ;;  %v457_v39 = vsel %vm449_vm5, %v440_v35, %v285_v18  ;;  %v887_v35 = vunpack.c.h.bf16 %v909_v19 }
  0xfe   :  { %v436_v29 = vsel %vm432_vm4, %v419_v27, %v260_v14  ;;  %v402_v38 = vpop.permute.xlu2 %401 }
 0x103   :  { %v281_v56 = vpop.permute.xlu1 %280 }
 0x104   :  { %v453_v30 = vsel %vm449_vm5, %v436_v29, %v281_v56  ;;  %v877_v56 = vld [vmem:[%s1506_s4] sm:$0xff]  }
 0x105   :  { %v414_v42 = vpop.permute.xlu0 %413 }
 0x106   :  { %v550_v24 = vsel %vm534_vm9, %v533_v23, %v414_v42  ;;  %v886_v42 = vunpack.c.l.bf16 %v909_v19 }
 0x107   :  { %861 = vmatmul.msk.bf16.gmra.mxu3 %vm587_vm11, %v550_v24 }
 0x10b   :  { %v316_v63 = vpop.permute.xlu1 %315 }
 0x10c   :  { %v474_v41 = vsel %vm466_vm6, %v457_v39, %v316_v63  ;;  %v878_v63 = vunpack.c.l.bf16 %v877_v56 }
 0x10d   :  { %v312_v25 = vpop.permute.xlu0 %311 }
 0x10e   :  { %v470_v32 = vsel %vm466_vm6, %v453_v30, %v312_v25 }
 0x10f   :  { %v487_v48 = vsel %vm483_vm7, %v470_v32, %v331_v15 }
 0x113   :  { %v352_v31 = vpop.permute.xlu1 %351 }
 0x114   :  { %v504_v36 = vsel %vm500_vm8, %v487_v48, %v352_v31 }
 0x115   :  { %v335_v26 = vpop.permute.xlu0 %334 }
 0x116   :  { %v491_v37 = vsel %vm483_vm7, %v474_v41, %v335_v26 }
 0x117   :  { %v508_v44 = vsel %vm500_vm8, %v491_v37, %v356_v6 }
 0x11b   :  { %v387_v57 = vpop.permute.xlu1 %386 }
 0x11c   :  { %v525_v45 = vsel %vm517_vm10, %v508_v44, %v387_v57 }
 0x11d   :  { %v383_v54 = vpop.permute.xlu0 %382 }
 0x11e   :  { %v521_v43 = vsel %vm517_vm10, %v504_v36, %v383_v54 }
 0x11f   :  { %v538_v40 = vsel %vm534_vm9, %v521_v43, %v402_v38  ;;  %v879_v43 = vunpack.c.h.bf16 %v877_v56 }
 0x120   :  { %855 = vmatmul.msk.bf16.gmra.mxu0 %vm587_vm11, %v538_v40 }
 0x125   :  { %v406_v46 = vpop.permute.xlu0 %405 }
 0x126   :  { %v542_v47 = vsel %vm534_vm9, %v525_v45, %v406_v46  ;;  %v912_v46 = vld [vmem:[%s1506_s4 + $0x28] sm:$0xff]  }
 0x127   :  { %857 = vmatmul.msk.bf16.gmra.mxu1 %vm587_vm11, %v542_v47 }
 0x130   :  { %v647_v51 = vpop.f32.mrf.mxu3 }
 0x131   :  { %v673_v52 = vmul.f32 %v1375_v49, %v647_v51  ;;  %v898_v51 = vunpack.c.l.bf16 %v912_v46 }
 0x132   :  { %v637_v58 = vpop.f32.mrf.mxu2 }
 0x133   :  { %v693_v59 = vadd.f32 %v1383_v53, %v673_v52  ;;  %v669_v60 = vmul.f32 %v1375_v49, %v637_v58 }
 0x135   :  { %v741_v62 = vadd.f32 %v902_v55, %v693_v59  ;;  %v689_v1 = vadd.f32 %v1383_v53, %v669_v60 }
 0x137   :  { %v757_v3 = vmax.f32 %v741_v62, 0.0  ;;  %v737_v4 = vadd.f32 %v894_v61, %v689_v1  ;;  %v899_v61 = vunpack.c.h.bf16 %v912_v46 }
 0x138   :  { %v649_v34 = vpop.f32.mrf.mxu3 }
 0x139   :  { %v773_v28 = vpack.c.bf16 %v757_v3, %v757_v3  ;;  %v753_v5 = vmax.f32 %v737_v4, 0.0  ;;  %v674_v21 = vmul.f32 %v1375_v49, %v649_v34  ;;  %v914_v4 = vld [vmem:[%s1506_s4 + $0x38] sm:$0xff]  }
 0x13a   :  { %v639_v0 = vpop.f32.mrf.mxu2 }
 0x13b   :  { %790 = vst.msk [vmem:[%s1507_s5 + $0x30] sm:$0xf] %vm777_vm12, %v773_v28  ;;  %v769_v2 = vpack.c.bf16 %v753_v5, %v753_v5  ;;  %v694_v10 = vadd.f32 %v1383_v53, %v674_v21  ;;  %v670_v11 = vmul.f32 %v1375_v49, %v639_v0  ;;  %v906_v21 = vunpack.c.l.bf16 %v914_v4 }
 0x13d   :  { %786 = vst.msk [vmem:[%s1507_s5 + $0x20] sm:$0xf] %vm777_vm12, %v769_v2  ;;  %v742_v9 = vadd.f32 %v903_v7, %v694_v10  ;;  %v690_v13 = vadd.f32 %v1383_v53, %v670_v11 }
 0x13f   :  { %v758_v22 = vmax.f32 %v742_v9, 0.0  ;;  %v738_v16 = vadd.f32 %v895_v12, %v690_v13  ;;  %v907_v9 = vunpack.c.h.bf16 %v914_v4 }
 0x141   :  { %v774_v14 = vpack.c.bf16 %v758_v22, %v758_v22  ;;  %v754_v17 = vmax.f32 %v738_v16, 0.0 }
 0x143   :  { %791 = vst.msk [vmem:[%s1507_s5 + $0x34] sm:$0xf] %vm777_vm12, %v774_v14  ;;  %v770_v18 = vpack.c.bf16 %v754_v17, %v754_v17  ;;  %v908_v17 = vld [vmem:[%s1506_s4 + $0x8] sm:$0xff]  }
 0x145   :  { %787 = vst.msk [vmem:[%s1507_s5 + $0x24] sm:$0xf] %vm777_vm12, %v770_v18 }
 0x14a   :  { %v627_v20 = vpop.f32.mrf.mxu1 }
 0x14b   :  { %v665_v23 = vmul.f32 %v1375_v49, %v627_v20  ;;  %v882_v20 = vunpack.c.l.bf16 %v908_v17 }
 0x14c   :  { %v617_v24 = vpop.f32.mrf.mxu0 }
 0x14d   :  { %v685_v15 = vadd.f32 %v1383_v53, %v665_v23  ;;  %v661_v25 = vmul.f32 %v1375_v49, %v617_v24 }
 0x14f   :  { %v733_v6 = vadd.f32 %v886_v42, %v685_v15  ;;  %v681_v26 = vadd.f32 %v1383_v53, %v661_v25  ;;  %v910_v42 = vld [vmem:[%s1506_s4 + $0x18] sm:$0xff]  }
 0x151   :  { %v749_v27 = vmax.f32 %v733_v6, 0.0  ;;  %v729_v29 = vadd.f32 %v878_v63, %v681_v26  ;;  %v890_v63 = vunpack.c.l.bf16 %v910_v42 }
 0x152   :  { %v629_v30 = vpop.f32.mrf.mxu1 }
 0x153   :  { %v765_v31 = vpack.c.bf16 %v749_v27, %v749_v27  ;;  %v745_v32 = vmax.f32 %v729_v29, 0.0  ;;  %v666_v33 = vmul.f32 %v1375_v49, %v629_v30  ;;  %v883_v29 = vunpack.c.h.bf16 %v908_v17 }
 0x154   :  { %v619_v48 = vpop.f32.mrf.mxu0 }
 0x155   :  { %782 = vst.msk [vmem:[%s1507_s5 + $0x10] sm:$0xf] %vm777_vm12, %v765_v31  ;;  %v761_v38 = vpack.c.bf16 %v745_v32, %v745_v32  ;;  %v686_v36 = vadd.f32 %v1383_v53, %v666_v33  ;;  %v662_v54 = vmul.f32 %v1375_v49, %v619_v48 }
 0x157   :  { %778 = vst.msk [vmem:[%s1507_s5] sm:$0xf] %vm777_vm12, %v761_v38  ;;  %v734_v39 = vadd.f32 %v887_v35, %v686_v36  ;;  %v682_v40 = vadd.f32 %v1383_v53, %v662_v54 }
 0x159   :  { %v750_v41 = vmax.f32 %v734_v39, 0.0  ;;  %v730_v37 = vadd.f32 %v879_v43, %v682_v40  ;;  %v891_v43 = vunpack.c.h.bf16 %v910_v42 }
 0x15b   :  { %v766_v57 = vpack.c.bf16 %v750_v41, %v750_v41  ;;  %v746_v44 = vmax.f32 %v730_v37, 0.0 }
 0x15d   :  { %783 = vst.msk [vmem:[%s1507_s5 + $0x14] sm:$0xf] %vm777_vm12, %v766_v57  ;;  %v762_v45 = vpack.c.bf16 %v746_v44, %v746_v44 }
 0x15f   :  { %779 = vst.msk [vmem:[%s1507_s5 + $0x4] sm:$0xf] %vm777_vm12, %v762_v45 }
 0x179   :  { %v642_v47 = vpop.f32.mrf.mxu2 }
 0x17a   :  { %v671_v50 = vmul.f32 %v1375_v49, %v642_v47 }
 0x17c   :  { %v691_v8 = vadd.f32 %v1383_v53, %v671_v50 }
 0x17e   :  { %v739_v52 = vadd.f32 %v898_v51, %v691_v8 }
 0x180   :  { %v755_v55 = vmax.f32 %v739_v52, 0.0 }
 0x181   :  { %v644_v58 = vpop.f32.mrf.mxu2 }
 0x182   :  { %v771_v59 = vpack.c.bf16 %v755_v55, %v755_v55  ;;  %v672_v60 = vmul.f32 %v1375_v49, %v644_v58 }
 0x184   :  { %788 = vst.msk [vmem:[%s1507_s5 + $0x28] sm:$0xf] %vm777_vm12, %v771_v59  ;;  %v692_v62 = vadd.f32 %v1383_v53, %v672_v60 }
 0x186   :  { %v740_v1 = vadd.f32 %v899_v61, %v692_v62 }
 0x188   :  { %v756_v3 = vmax.f32 %v740_v1, 0.0 }
 0x18a   :  { %v772_v34 = vpack.c.bf16 %v756_v3, %v756_v3  ;;  %v652_v28 = vpop.f32.mrf.mxu3 }
 0x18b   :  { %v675_v5 = vmul.f32 %v1375_v49, %v652_v28 }
 0x18c   :  { %789 = vst.msk [vmem:[%s1507_s5 + $0x2c] sm:$0xf] %vm777_vm12, %v772_v34 }
 0x18d   :  { %v695_v7 = vadd.f32 %v1383_v53, %v675_v5 }
 0x18f   :  { %v743_v0 = vadd.f32 %v906_v21, %v695_v7 }
 0x191   :  { %v759_v2 = vmax.f32 %v743_v0, 0.0 }
 0x192   :  { %v654_v10 = vpop.f32.mrf.mxu3 }
 0x193   :  { %v775_v11 = vpack.c.bf16 %v759_v2, %v759_v2  ;;  %v676_v12 = vmul.f32 %v1375_v49, %v654_v10 }
 0x195   :  { %792 = vst.msk [vmem:[%s1507_s5 + $0x38] sm:$0xf] %vm777_vm12, %v775_v11  ;;  %v696_v13 = vadd.f32 %v1383_v53, %v676_v12 }
 0x197   :  { %v744_v22 = vadd.f32 %v907_v9, %v696_v13 }
 0x199   :  { %v760_v16 = vmax.f32 %v744_v22, 0.0 }
 0x19b   :  { %v776_v14 = vpack.c.bf16 %v760_v16, %v760_v16 }
 0x19d   :  { %793 = vst.msk [vmem:[%s1507_s5 + $0x3c] sm:$0xf] %vm777_vm12, %v776_v14  ;;  %v622_v18 = vpop.f32.mrf.mxu0 }
 0x19e   :  { %v663_v19 = vmul.f32 %v1375_v49, %v622_v18 }
 0x1a0   :  { %v683_v56 = vadd.f32 %v1383_v53, %v663_v19 }
 0x1a2   :  { %v731_v23 = vadd.f32 %v882_v20, %v683_v56 }
 0x1a4   :  { %v747_v24 = vmax.f32 %v731_v23, 0.0  ;;  %v632_v15 = vpop.f32.mrf.mxu1 }
 0x1a5   :  { %v667_v25 = vmul.f32 %v1375_v49, %v632_v15  ;;  %v624_v6 = vpop.f32.mrf.mxu0 }
 0x1a6   :  { %v763_v26 = vpack.c.bf16 %v747_v24, %v747_v24  ;;  %v664_v27 = vmul.f32 %v1375_v49, %v624_v6 }
 0x1a7   :  { %v687_v30 = vadd.f32 %v1383_v53, %v667_v25 }
 0x1a8   :  { %780 = vst.msk [vmem:[%s1507_s5 + $0x8] sm:$0xf] %vm777_vm12, %v763_v26  ;;  %v684_v31 = vadd.f32 %v1383_v53, %v664_v27 }
 0x1a9   :  { %v735_v32 = vadd.f32 %v890_v63, %v687_v30 }
 0x1aa   :  { %v732_v33 = vadd.f32 %v883_v29, %v684_v31 }
 0x1ab   :  { %v751_v35 = vmax.f32 %v735_v32, 0.0 }
 0x1ac   :  { %v748_v48 = vmax.f32 %v732_v33, 0.0  ;;  %v634_v38 = vpop.f32.mrf.mxu1 }
 0x1ad   :  { %v767_v36 = vpack.c.bf16 %v751_v35, %v751_v35  ;;  %v668_v54 = vmul.f32 %v1375_v49, %v634_v38 }
 0x1ae   :  { %v764_v39 = vpack.c.bf16 %v748_v48, %v748_v48 }
 0x1af   :  { %784 = vst.msk [vmem:[%s1507_s5 + $0x18] sm:$0xf] %vm777_vm12, %v767_v36  ;;  %v688_v40 = vadd.f32 %v1383_v53, %v668_v54 }
 0x1b0   :  { %781 = vst.msk [vmem:[%s1507_s5 + $0xc] sm:$0xf] %vm777_vm12, %v764_v39 }
 0x1b1   :  { %v736_v41 = vadd.f32 %v891_v43, %v688_v40 }
 0x1b3   :  { %v752_v37 = vmax.f32 %v736_v41, 0.0 }
 0x1b5   :  { %v768_v57 = vpack.c.bf16 %v752_v37, %v752_v37 }
 0x1b7   :  { %785 = vst.msk [vmem:[%s1507_s5 + $0x1c] sm:$0xf] %vm777_vm12, %v768_v57 }

// kernel: tpu_custom_call.1
= control target key start
LH: loop header
LB: loop body
LE: loop exit
PB: predicated region body
PF: predicated region fallthrough
CT: control target
= control target key end

     0   :  { %vm301_vm0 = vcmask 1043456   ;;  %vm56_vm1 = vsmask.f32 3328  ;;  %vm57_vm2 = vsmask.f32 7440  ;;  %vm276_vm3 = vcmask 64512   ;;  %s2291_s1 = inlined_call_operand.vmem [shape: bf16[72,4], index: 1, kind: input, shape index: {}]   ;;  %s2292_s0 = inlined_call_operand.vmem [shape: bf16[1,10,18,8], index: 0, kind: input, shape index: {}]   ;;  %s2293_s2 = inlined_call_operand.vmem [shape: f32[1,4], index: 2, kind: input, shape index: {}]   ;;  %s2294_s3 = inlined_call_operand.vmem [shape: f32[1,4], index: 3, kind: input, shape index: {}]   ;;  %s2295_s4 = inlined_call_operand.vmem [shape: bf16[1,8,16,4], index: 4, kind: input, shape index: {}]   ;;  %s2296_s5 = inlined_call_operand.vmem [shape: bf16[1,8,16,4], index: 5, kind: output, shape index: {}]  }
   0x1   :  { %v251_v0 = vld [vmem:[%s2291_s1 + $0x4] sm:$0xf]  ;;  %v1525_v1 = vld [vmem:[%s2292_s0 + $0x18] sm:$0xf]  ;;  %v1530_v2 = vld [vmem:[%s2292_s0 + $0x1c] sm:$0xf] }
   0x2   :  { %v303_v3 = vsel %vm301_vm0, %v251_v0, 0  ;;  %v1536_v4 = vld [vmem:[%s2292_s0 + $0x20] sm:$0x1]  ;;  %v108_v5 = vshrl.u32 %v1525_v1, 16  ;;  %v111_v6 = vshll.u32 %v1525_v1, 16  ;;  %v117_v7 = vshll.u32 %v1530_v2, 16  ;;  %vm1575_vm4 = vmor %vm56_vm1, %vm57_vm2 }
   0x3   :  { %1484 = vmatpush.bf16.msra.mxu1 %v303_v3  ;;  %1485 = vmatpush.bf16.msra.mxu2 %v303_v3  ;;  %v121_v8 = vshrl.u32 %v1530_v2, 16  ;;  %v127_v9 = vshll.u32 %v1536_v4, 16  ;;  %v1546_v10 = vld [vmem:[%s2292_s0 + $0x30] sm:$0xf]  ;;  %v1551_v11 = vld [vmem:[%s2292_s0 + $0x34] sm:$0xf] }
   0x4   :  { %1486 = vmatpush.bf16.msra.mxu3 %v303_v3  ;;  %312 = vmatpush.bf16.msra.mxu0 %v303_v3  ;;  %v110_v12 = vrot.slane %v108_v5, 4  ;;  %v113_v13 = vrot.slane %v111_v6, 5  ;;  %v119_v14 = vrot.slane %v117_v7, 5  ;;  %v1556_v15 = vld [vmem:[%s2292_s0 + $0x38] sm:$0x1]  ;;  %v156_v16 = vshrl.u32 %v1546_v10, 16 }
   0x5   :  { %v123_v17 = vrot.slane %v121_v8, 4  ;;  %v129_v18 = vrot.slane %v127_v9, 5  ;;  %v159_v19 = vshll.u32 %v1546_v10, 16  ;;  %v165_v20 = vshll.u32 %v1551_v11, 16  ;;  %v1564_v21 = vld [vmem:[%s2292_s0 + $0x48] sm:$0xf] }
   0x6   :  { %v114_v22 = vor.u32 %v113_v13, %v110_v12  ;;  %v158_v23 = vrot.slane %v156_v16, 4  ;;  %v169_v24 = vshrl.u32 %v1551_v11, 16  ;;  %v175_v25 = vshll.u32 %v1556_v15, 16  ;;  %v1571_v26 = vld [vmem:[%s2292_s0 + $0x4c] sm:$0xf] }
   0x7   :  { %v124_v28 = vor.u32 %v123_v17, %v119_v14  ;;  %v161_v29 = vrot.slane %v159_v19, 5  ;;  %v167_v30 = vrot.slane %v165_v20, 5  ;;  %v204_v31 = vshrl.u32 %v1564_v21, 16  ;;  %v1584_v38 = vld [vmem:[%s2292_s0 + $0x50] sm:$0x1] }
   0x8   :  { %v115_v32 = vrot.slane %v114_v22, 4  ;;  %v171_v33 = vrot.slane %v169_v24, 4  ;;  %v177_v34 = vrot.slane %v175_v25, 5  ;;  %v207_v35 = vshll.u32 %v1564_v21, 16  ;;  %v537_v45 = vld [vmem:[%s2291_s1 + $0x8] sm:$0xf] }
   0x9   :  { %v125_v36 = vrot.slane %v124_v28, 4  ;;  %v162_v37 = vor.u32 %v161_v29, %v158_v23  ;;  %v206_v39 = vrot.slane %v204_v31, 4  ;;  %v213_v40 = vshll.u32 %v1571_v26, 16  ;;  %v1596_v46 = vld [vmem:[%s2292_s0] sm:$0xf] }
   0xa   :  { %v120_v41 = vsel %vm1575_vm4, %v115_v32, %v119_v14  ;;  %v172_v42 = vor.u32 %v171_v33, %v167_v30  ;;  %v209_v43 = vrot.slane %v207_v35, 5  ;;  %v217_v44 = vshrl.u32 %v1571_v26, 16  ;;  %v1607_v58 = vld [vmem:[%s2292_s0 + $0x4] sm:$0xf]  ;;  %v1617_v0 = vld [vmem:[%s2292_s0 + $0x8] sm:$0x1] }
   0xb   :  { %v130_v47 = vsel %vm1575_vm4, %v125_v36, %v129_v18  ;;  %v256_v48 = vunpack.c.l.b16 %v120_v41  ;;  %v163_v49 = vrot.slane %v162_v37, 4  ;;  %v215_v50 = vrot.slane %v213_v40, 5  ;;  %v654_v8 = vld [vmem:[%s2291_s1 + $0xc] sm:$0xf]  ;;  %v55_v16 = vld [vmem:[%s2291_s1] sm:$0xf] }
   0xc   :  { %v257_v51 = vunpack.c.l.b16 %v130_v47  ;;  %v173_v52 = vrot.slane %v172_v42, 4  ;;  %v210_v53 = vor.u32 %v209_v43, %v206_v39  ;;  %v219_v54 = vrot.slane %v217_v44, 4  ;;  %v755_v22 = vld [vmem:[%s2291_s1 + $0x10] sm:$0xf]  ;;  %v1641_v23 = vld [vmem:[%s2292_s0 + $0x24] sm:$0xf] }
   0xd   :  { %v168_v55 = vsel %vm1575_vm4, %v163_v49, %v167_v30  ;;  %v223_v56 = vshll.u32 %v1584_v38, 16  ;;  %v587_v57 = vsel %vm301_vm0, %v537_v45, 0  ;;  %v60_v59 = vshrl.u32 %v1596_v46, 16  ;;  %v1647_v30 = vld [vmem:[%s2292_s0 + $0x28] sm:$0xf] }
   0xe   :  { %v1610_v60 = vpack.c.b16 %v257_v51, %v256_v48  ;;  %v178_v61 = vsel %vm1575_vm4, %v173_v52, %v177_v34  ;;  %v260_v62 = vunpack.c.l.b16 %v168_v55  ;;  %v211_v63 = vrot.slane %v210_v53, 4  ;;  %596 = vmatpush.bf16.msrb.mxu2 %v587_v57  ;;  %v1658_v35 = vld [vmem:[%s2292_s0 + $0x2c] sm:$0x1]  ;;  %v1668_v45 = vld [vmem:[%s2292_s0 + $0x3c] sm:$0xf] }
   0xf   :  { %v261_v3 = vunpack.c.l.b16 %v178_v61  ;;  %v220_v5 = vor.u32 %v219_v54, %v215_v50  ;;  %v225_v6 = vrot.slane %v223_v56, 5  ;;  %v62_v7 = vrot.slane %v60_v59, 4  ;;  %v1676_v55 = vld [vmem:[%s2292_s0 + $0x40] sm:$0xf]  ;;  %v1687_v61 = vld [vmem:[%s2292_s0 + $0x44] sm:$0x1] }
  0x10   :  { %1315 = vmatmul.msk.bf16.vlgmr.msra.gmra.mxu1 %vm276_vm3, %v1610_v60  ;;  %v216_v9 = vsel %vm1575_vm4, %v211_v63, %v215_v50  ;;  %v63_v12 = vshll.u32 %v1596_v46, 16  ;;  %v69_v13 = vshll.u32 %v1607_v58, 16  ;;  %v73_v14 = vshrl.u32 %v1607_v58, 16 }
  0x11   :  { %v1632_v17 = vpack.c.b16 %v261_v3, %v260_v62  ;;  %v221_v18 = vrot.slane %v220_v5, 4  ;;  %v264_v19 = vunpack.c.l.b16 %v216_v9  ;;  %v79_v20 = vshll.u32 %v1617_v0, 16 }
  0x12   :  { %v65_v24 = vrot.slane %v63_v12, 5  ;;  %v71_v25 = vrot.slane %v69_v13, 5  ;;  %v75_v28 = vrot.slane %v73_v14, 4  ;;  %v486_v29 = vrot.slane %v1617_v0, 5 }
  0x13   :  { %1317 = vmatmul.msk.bf16.vlgmr.msra.gmra.mxu2 %vm276_vm3, %v1632_v17  ;;  %v226_v31 = vsel %vm1575_vm4, %v221_v18, %v225_v6  ;;  %v81_v32 = vrot.slane %v79_v20, 5  ;;  %v664_v33 = vsel %vm301_vm0, %v654_v8, 0  ;;  %v419_v34 = vsel %vm301_vm0, %v55_v16, 0 }
  0x14   :  { %v265_v36 = vunpack.c.l.b16 %v226_v31  ;;  %v66_v37 = vor.u32 %v65_v24, %v62_v7  ;;  %v76_v39 = vor.u32 %v75_v28, %v71_v25  ;;  %673 = vmatpush.bf16.msrb.mxu3 %v664_v33  ;;  %428 = vmatpush.bf16.msrb.mxu1 %v419_v34  ;;  %v763_v40 = vsel %vm301_vm0, %v755_v22, 0  ;;  %v1693_v7 = vld [vmem:[%s2292_s0 + $0x54] sm:$0xf]  ;;  %v1713_v34 = vld [vmem:[%s2292_s0 + $0x5c] sm:$0x1] }
  0x15   :  { %772 = vmatpush.bf16.msrb.mxu0 %v763_v40  ;;  %v132_v41 = vshrl.u32 %v1641_v23, 16  ;;  %v135_v42 = vshll.u32 %v1641_v23, 16  ;;  %v141_v43 = vshll.u32 %v1647_v30, 16  ;;  %v145_v44 = vshrl.u32 %v1647_v30, 16 }
  0x16   :  { %v1670_v47 = vpack.c.b16 %v265_v36, %v264_v19  ;;  %v67_v48 = vrot.slane %v66_v37, 4  ;;  %v77_v49 = vrot.slane %v76_v39, 4  ;;  %v151_v50 = vshll.u32 %v1658_v35, 16 }
  0x17   :  { %v134_v51 = vrot.slane %v132_v41, 4  ;;  %v137_v52 = vrot.slane %v135_v42, 5  ;;  %v143_v53 = vrot.slane %v141_v43, 5  ;;  %v147_v54 = vrot.slane %v145_v44, 4  ;;  %v1719_v42 = vld [vmem:[%s2292_s0 + $0xc] sm:$0xf] }
  0x18   :  { %1319 = vmatmul.msk.bf16.vlgmr.msra.gmra.mxu3 %vm276_vm3, %v1670_v47  ;;  %v72_v56 = vsel %vm1575_vm4, %v67_v48, %v71_v25  ;;  %v82_v57 = vsel %vm1575_vm4, %v77_v49, %v81_v32  ;;  %v153_v59 = vrot.slane %v151_v50, 5  ;;  %v180_v62 = vshrl.u32 %v1668_v45, 16  ;;  %v1702_v25 = vld [vmem:[%s2292_s0 + $0x58] sm:$0xf] }
  0x19   :  { %v252_v63 = vunpack.c.l.b16 %v72_v56  ;;  %v253_v3 = vunpack.c.l.b16 %v82_v57  ;;  %v138_v5 = vor.u32 %v137_v52, %v134_v51  ;;  %v148_v6 = vor.u32 %v147_v54, %v143_v53 }
  0x1a   :  { %v182_v8 = vrot.slane %v180_v62, 4  ;;  %v183_v9 = vshll.u32 %v1668_v45, 16  ;;  %v189_v12 = vshll.u32 %v1676_v55, 16  ;;  %v193_v13 = vshrl.u32 %v1676_v55, 16 }
  0x1b   :  { %v268_v14 = vpack.c.b16 %v253_v3, %v252_v63  ;;  %v139_v16 = vrot.slane %v138_v5, 4  ;;  %v149_v18 = vrot.slane %v148_v6, 4  ;;  %v199_v19 = vshll.u32 %v1687_v61, 16  ;;  %v1741_v6 = vld [vmem:[%s2292_s0 + $0x14] sm:$0x1] }
  0x1c   :  { %v185_v20 = vrot.slane %v183_v9, 5  ;;  %v191_v22 = vrot.slane %v189_v12, 5  ;;  %v195_v24 = vrot.slane %v193_v13, 4  ;;  %v228_v28 = vshrl.u32 %v1693_v7, 16 }
  0x1d   :  { %1313 = vmatmul.msk.bf16.vlgmr.msra.gmra.mxu0 %vm276_vm3, %v268_v14  ;;  %v144_v31 = vsel %vm1575_vm4, %v139_v16, %v143_v53  ;;  %v154_v32 = vsel %vm1575_vm4, %v149_v18, %v153_v59  ;;  %v201_v33 = vrot.slane %v199_v19, 5  ;;  %v231_v36 = vshll.u32 %v1693_v7, 16  ;;  %v1729_v59 = vld [vmem:[%s2292_s0 + $0x10] sm:$0xf] }
  0x1e   :  { %v258_v37 = vunpack.c.l.b16 %v144_v31  ;;  %v259_v39 = vunpack.c.l.b16 %v154_v32  ;;  %v186_v40 = vor.u32 %v185_v20, %v182_v8  ;;  %v196_v41 = vor.u32 %v195_v24, %v191_v22  ;;  %v913_v32 = vld [vmem:[%s2291_s1 + $0x18] sm:$0xf] }
  0x1f   :  { %v230_v43 = vrot.slane %v228_v28, 4  ;;  %v233_v44 = vrot.slane %v231_v36, 5  ;;  %v237_v48 = vshll.u32 %v1702_v25, 16  ;;  %v241_v49 = vshrl.u32 %v1702_v25, 16 }
  0x20   :  { %v1723_v50 = vpack.c.b16 %v259_v39, %v258_v37  ;;  %v187_v51 = vrot.slane %v186_v40, 4  ;;  %v197_v52 = vrot.slane %v196_v41, 4  ;;  %v247_v53 = vshll.u32 %v1713_v34, 16  ;;  %v1014_v40 = vld [vmem:[%s2291_s1 + $0x1c] sm:$0xf] }
  0x21   :  { %v234_v54 = vor.u32 %v233_v44, %v230_v43  ;;  %v239_v56 = vrot.slane %v237_v48, 5  ;;  %v243_v57 = vrot.slane %v241_v49, 4  ;;  %v84_v62 = vshrl.u32 %v1719_v42, 16  ;;  %v838_v41 = vld [vmem:[%s2291_s1 + $0x14] sm:$0xf] }
  0x22   :  { %1316 = vmatmul.msk.bf16.gmra.mxu1 %vm276_vm3, %v1723_v50  ;;  %v192_v63 = vsel %vm1575_vm4, %v187_v51, %v191_v22  ;;  %v202_v3 = vsel %vm1575_vm4, %v197_v52, %v201_v33  ;;  %v249_v5 = vrot.slane %v247_v53, 5  ;;  %v87_v8 = vshll.u32 %v1719_v42, 16  ;;  %v1097_v48 = vld [vmem:[%s2291_s1 + $0x20] sm:$0xf] }
  0x23   :  { %v262_v9 = vunpack.c.l.b16 %v192_v63  ;;  %v263_v12 = vunpack.c.l.b16 %v202_v3  ;;  %v235_v13 = vrot.slane %v234_v54, 4  ;;  %v244_v14 = vor.u32 %v243_v57, %v239_v56 }
  0x24   :  { %v86_v16 = vrot.slane %v84_v62, 4  ;;  %v89_v18 = vrot.slane %v87_v8, 5  ;;  %v93_v19 = vshll.u32 %v1729_v59, 16  ;;  %v97_v20 = vshrl.u32 %v1729_v59, 16 }
  0x25   :  { %v1746_v22 = vpack.c.b16 %v263_v12, %v262_v9  ;;  %v240_v24 = vsel %vm1575_vm4, %v235_v13, %v239_v56  ;;  %v245_v28 = vrot.slane %v244_v14, 4  ;;  %v103_v31 = vshll.u32 %v1741_v6, 16 }
  0x26   :  { %v266_v33 = vunpack.c.l.b16 %v240_v24  ;;  %v90_v36 = vor.u32 %v89_v18, %v86_v16  ;;  %v95_v37 = vrot.slane %v93_v19, 5  ;;  %v99_v39 = vrot.slane %v97_v20, 4  ;;  %v1435_v18 = vld [vmem:[%s2292_s0] sm:$0xff] }
  0x27   :  { %1318 = vmatmul.msk.bf16.gmra.mxu2 %vm276_vm3, %v1746_v22  ;;  %v250_v43 = vsel %vm1575_vm4, %v245_v28, %v249_v5  ;;  %v105_v44 = vrot.slane %v103_v31, 5  ;;  %vm478_vm5 = vcmask 1042432   ;;  %vm479_vm6 = vcmask 1046532  }
  0x28   :  { %v267_v49 = vunpack.c.l.b16 %v250_v43  ;;  %v91_v51 = vrot.slane %v90_v36, 4  ;;  %v100_v52 = vor.u32 %v99_v39, %v95_v37  ;;  %v1361_v53 = vrot.slane %v1596_v46, 9  ;;  %vm1768_vm7 = vmor %vm478_vm5, %vm479_vm6 }
  0x29   :  { %v483_v56 = vrot.slane %v1607_v58, 5  ;;  %v923_v57 = vsel %vm301_vm0, %v913_v32, 0  ;;  %v1022_v62 = vsel %vm301_vm0, %v1014_v40, 0  ;;  %v846_v63 = vsel %vm301_vm0, %v838_v41, 0 }
  0x2a   :  { %v1776_v3 = vpack.c.b16 %v267_v49, %v266_v33  ;;  %v96_v5 = vsel %vm1575_vm4, %v91_v51, %v95_v37  ;;  %v101_v8 = vrot.slane %v100_v52, 4  ;;  %932 = vmatpush.bf16.msra.mxu2 %v923_v57  ;;  %1031 = vmatpush.bf16.msra.mxu3 %v1022_v62  ;;  %v1105_v46 = vsel %vm301_vm0, %v1097_v48, 0 }
  0x2b   :  { %v254_v9 = vunpack.c.l.b16 %v96_v5  ;;  %v485_v12 = vrot.slane %v483_v56, 4  ;;  %855 = vmatpush.bf16.msra.mxu1 %v846_v63  ;;  %1114 = vmatpush.bf16.msra.mxu0 %v1105_v46  ;;  %v484_v13 = vsel %vm1768_vm7, %v1361_v53, %v483_v56  ;;  %v1363_v28 = vrot.slane %v1525_v1, 9  ;;  %v1436_v1 = vld [vmem:[%s2292_s0 + $0xc] sm:$0xff] }
  0x2c   :  { %1320 = vmatmul.msk.bf16.gmra.mxu3 %vm276_vm3, %v1776_v3  ;;  %v106_v58 = vsel %vm1575_vm4, %v101_v8, %v105_v44  ;;  %v538_v20 = vunpack.c.l.b16 %v484_v13  ;;  %v497_v31 = vrot.slane %v1530_v2, 5  ;;  %v500_v0 = vrot.slane %v1536_v4, 5  ;;  %v1862_v8 = vld [vmem:[%s2292_s0 + $0x30] sm:$0xff] }
  0x2d   :  { %v255_v14 = vunpack.c.l.b16 %v106_v58  ;;  %v487_v16 = vsel %vm1768_vm7, %v485_v12, %v486_v29  ;;  %v490_v29 = vrot.slane %v1729_v59, 5  ;;  %v1362_v2 = vrot.slane %v1719_v42, 9 }
  0x2e   :  { %v539_v24 = vunpack.c.l.b16 %v487_v16  ;;  %v498_v33 = vsel %vm1768_vm7, %v1363_v28, %v497_v31  ;;  %v499_v36 = vrot.slane %v497_v31, 4  ;;  %v493_v59 = vrot.slane %v1741_v6, 5  ;;  %v1884_v16 = vld [vmem:[%s2292_s0 + $0x3c] sm:$0xff] }
  0x2f   :  { %v269_v19 = vpack.c.b16 %v255_v14, %v254_v9  ;;  %v542_v37 = vunpack.c.l.b16 %v498_v33  ;;  %v492_v4 = vrot.slane %v490_v29, 4  ;;  %v491_v43 = vsel %vm1768_vm7, %v1362_v2, %v490_v29 }
  0x30   :  { %v554_v32 = vpack.c.b16 %v539_v24, %v538_v20  ;;  %v501_v39 = vsel %vm1768_vm7, %v499_v36, %v500_v0  ;;  %v540_v48 = vunpack.c.l.b16 %v491_v43  ;;  %v1364_v42 = vrot.slane %v1641_v23, 9  ;;  %v1833_v23 = vld [vmem:[%s2292_s0 + $0x18] sm:$0xff]  ;;  %v1906_v0 = vld [vmem:[%s2292_s0 + $0x48] sm:$0xff] }
  0x31   :  { %1314 = vmatmul.msk.bf16.gmra.mxu0 %vm276_vm3, %v269_v19  ;;  %v543_v40 = vunpack.c.l.b16 %v501_v39  ;;  %v494_v44 = vsel %vm1768_vm7, %v492_v4, %v493_v59  ;;  %v504_v6 = vrot.slane %v1647_v30, 5  ;;  %v507_v51 = vrot.slane %v1658_v35, 5  ;;  %v1848_v35 = vld [vmem:[%s2292_s0 + $0x24] sm:$0xff] }
  0x32   :  { %1353 = vmatmul.msk.bf16.vlgmr.msrb.gmra.mxu1 %vm276_vm3, %v1435_v18  ;;  %v541_v49 = vunpack.c.l.b16 %v494_v44  ;;  %v511_v5 = vrot.slane %v1551_v11, 5  ;;  %v1365_v46 = vrot.slane %v1546_v10, 9  ;;  %v514_v12 = vrot.slane %v1556_v15, 5 }
  0x33   :  { %v1810_v41 = vpack.c.b16 %v543_v40, %v542_v37  ;;  %v505_v53 = vsel %vm1768_vm7, %v1364_v42, %v504_v6  ;;  %v506_v56 = vrot.slane %v504_v6, 4  ;;  %v518_v15 = vrot.slane %v1676_v55, 5  ;;  %v1948_v42 = vld [vmem:[%s2292_s0 + $0x54] sm:$0xff] }
  0x34   :  { %v1822_v52 = vpack.c.b16 %v541_v49, %v540_v48  ;;  %v544_v57 = vunpack.c.l.b16 %v505_v53  ;;  %v513_v9 = vrot.slane %v511_v5, 4  ;;  %v512_v58 = vsel %vm1768_vm7, %v1365_v46, %v511_v5  ;;  %v1957_v46 = vld [vmem:[%s2292_s0 + $0x68] sm:$0x1] }
  0x35   :  { %v508_v62 = vsel %vm1768_vm7, %v506_v56, %v507_v51  ;;  %v546_v13 = vunpack.c.l.b16 %v512_v58  ;;  %v1366_v18 = vrot.slane %v1668_v45, 9  ;;  %v521_v20 = vrot.slane %v1687_v61, 5 }
  0x36   :  { %v545_v63 = vunpack.c.l.b16 %v508_v62  ;;  %v515_v11 = vsel %vm1768_vm7, %v513_v9, %v514_v12  ;;  %v525_v61 = vrot.slane %v1571_v26, 5  ;;  %v528_v33 = vrot.slane %v1584_v38, 5  ;;  %v1927_v38 = vld [vmem:[%s2292_s0 + $0x60] sm:$0xf] }
  0x37   :  { %1369 = vmatmul.msk.bf16.vlgmr.msrb.gmra.mxu2 %vm276_vm3, %v554_v32  ;;  %v547_v14 = vunpack.c.l.b16 %v515_v11  ;;  %v519_v24 = vsel %vm1768_vm7, %v1366_v18, %v518_v15  ;;  %v1367_v32 = vrot.slane %v1564_v21, 9  ;;  %v532_v2 = vrot.slane %v1702_v25, 5 }
  0x38   :  { %v1835_v30 = vpack.c.b16 %v545_v63, %v544_v57  ;;  %v548_v28 = vunpack.c.l.b16 %v519_v24  ;;  %v527_v29 = vrot.slane %v525_v61, 4  ;;  %v732_v43 = vshrl.u32 %v1927_v38, 16 }
  0x39   :  { %v1876_v10 = vpack.c.b16 %v547_v14, %v546_v13  ;;  %v526_v36 = vsel %vm1768_vm7, %v1367_v32, %v525_v61  ;;  %v735_v44 = vshll.u32 %v1927_v38, 16  ;;  %v1368_v25 = vrot.slane %v1693_v7, 9 }
  0x3a   :  { %v529_v26 = vsel %vm1768_vm7, %v527_v29, %v528_v33  ;;  %v550_v39 = vunpack.c.l.b16 %v526_v36  ;;  %v534_v6 = vrot.slane %v532_v2, 4  ;;  %v535_v51 = vrot.slane %v1713_v34, 5  ;;  %v1989_v29 = vld [vmem:[%s2292_s0 + $0x60] sm:$0xff] }
  0x3b   :  { %v551_v40 = vunpack.c.l.b16 %v529_v26  ;;  %v734_v56 = vrot.slane %v732_v43, 4  ;;  %v737_v57 = vrot.slane %v735_v44, 5  ;;  %v533_v7 = vsel %vm1768_vm7, %v1368_v25, %v532_v2 }
  0x3c   :  { %1381 = vmatmul.msk.bf16.vlgmr.msrb.gmra.mxu3 %vm276_vm3, %v1436_v1  ;;  %v536_v34 = vsel %vm1768_vm7, %v534_v6, %v535_v51  ;;  %v751_v58 = vshll.u32 %v1957_v46, 16  ;;  %v552_v13 = vunpack.c.l.b16 %v533_v7  ;;  %vm1292_vm8 = vcmask 27648  }
  0x3d   :  { %v1922_v21 = vpack.c.b16 %v551_v40, %v550_v39  ;;  %v738_v9 = vor.u32 %v737_v57, %v734_v56  ;;  %v553_v14 = vunpack.c.l.b16 %v536_v34 }
  0x3f   :  { %v739_v18 = vrot.slane %v738_v9, 4  ;;  %v1974_v24 = vpack.c.b16 %v553_v14, %v552_v13 }
  0x41   :  { %1389 = vmatmul.msk.bf16.vlgmr.msrb.gmra.mxu0 %vm276_vm3, %v269_v19  ;;  %v520_v19 = vrot.slane %v518_v15, 4 }
  0x42   :  { %1354 = vmatmul.msk.bf16.gmra.mxu1 %vm276_vm3, %v1436_v1  ;;  %v1932_v1 = vld [vmem:[%s2292_s0 + $0x64] sm:$0xf] }
  0x43   :  { %v522_v55 = vsel %vm1768_vm7, %v520_v19, %v521_v20  ;;  %v741_v48 = vshll.u32 %v1932_v1, 16  ;;  %v745_v49 = vshrl.u32 %v1932_v1, 16  ;;  %v753_v20 = vrot.slane %v751_v58, 5 }
  0x44   :  { %v549_v31 = vunpack.c.l.b16 %v522_v55 }
  0x45   :  { %v743_v62 = vrot.slane %v741_v48, 5  ;;  %v747_v63 = vrot.slane %v745_v49, 4 }
  0x46   :  { %v1898_v45 = vpack.c.b16 %v549_v31, %v548_v28 }
  0x47   :  { %1370 = vmatmul.msk.bf16.gmra.mxu2 %vm276_vm3, %v1822_v52  ;;  %v748_v12 = vor.u32 %v747_v63, %v743_v62  ;;  %v744_v31 = vsel %vm1575_vm4, %v739_v18, %v743_v62 }
  0x48   :  { %v756_v33 = vunpack.c.l.b16 %v744_v31 }
  0x49   :  { %v749_v19 = vrot.slane %v748_v12, 4 }
  0x4b   :  { %v754_v61 = vsel %vm1575_vm4, %v749_v19, %v753_v20 }
  0x4c   :  { %1382 = vmatmul.msk.bf16.gmra.mxu3 %vm276_vm3, %v1833_v23  ;;  %v757_v36 = vunpack.c.l.b16 %v754_v61 }
  0x4e   :  { %v1995_v39 = vpack.c.b16 %v757_v36, %v756_v33 }
  0x51   :  { %1390 = vmatmul.msk.bf16.gmra.mxu0 %vm276_vm3, %v1610_v60 }
  0x52   :  { %1355 = vmatmul.msk.bf16.gmra.mxu1 %vm276_vm3, %v1833_v23 }
  0x57   :  { %1371 = vmatmul.msk.bf16.gmra.mxu2 %vm276_vm3, %v1810_v41 }
  0x5c   :  { %1383 = vmatmul.msk.bf16.gmra.mxu3 %vm276_vm3, %v1848_v35 }
  0x61   :  { %1391 = vmatmul.msk.bf16.gmra.mxu0 %vm276_vm3, %v1723_v50 }
  0x62   :  { %1356 = vmatmul.msk.bf16.gmra.mxu1 %vm276_vm3, %v1848_v35 }
  0x67   :  { %1372 = vmatmul.msk.bf16.gmra.mxu2 %vm276_vm3, %v1835_v30 }
  0x6c   :  { %1384 = vmatmul.msk.bf16.gmra.mxu3 %vm276_vm3, %v1862_v8 }
  0x71   :  { %1392 = vmatmul.msk.bf16.gmra.mxu0 %vm276_vm3, %v1632_v17 }
  0x72   :  { %1357 = vmatmul.msk.bf16.gmra.mxu1 %vm276_vm3, %v1862_v8 }
  0x77   :  { %1373 = vmatmul.msk.bf16.gmra.mxu2 %vm276_vm3, %v1876_v10 }
  0x7c   :  { %1385 = vmatmul.msk.bf16.gmra.mxu3 %vm276_vm3, %v1884_v16 }
  0x81   :  { %1393 = vmatmul.msk.bf16.gmra.mxu0 %vm276_vm3, %v1746_v22 }
  0x82   :  { %1358 = vmatmul.msk.bf16.gmra.mxu1 %vm276_vm3, %v1884_v16 }
  0x87   :  { %1374 = vmatmul.msk.bf16.gmra.mxu2 %vm276_vm3, %v1898_v45 }
  0x8c   :  { %1386 = vmatmul.msk.bf16.gmra.mxu3 %vm276_vm3, %v1906_v0 }
  0x8d   :  { %v1916_v37 = vpop.f32.mrf.mxu1 }
  0x91   :  { %1394 = vmatmul.msk.bf16.gmra.mxu0 %vm276_vm3, %v1670_v47 }
  0x92   :  { %1359 = vmatmul.msk.bf16.gmra.mxu1 %vm276_vm3, %v1906_v0 }
  0x95   :  { %v1935_v4 = vpop.f32.mrf.mxu1 }
  0x96   :  { %v1937_v59 = vpop.f32.mrf.mxu2 }
  0x97   :  { %1375 = vmatmul.msk.bf16.gmra.mxu2 %vm276_vm3, %v1922_v21 }
  0x9a   :  { %v314_v53 = vpop.f32.mrf.mxu0 }
  0x9b   :  { %v1952_v5 = vpop.f32.mrf.mxu3 }
  0x9c   :  { %1387 = vmatmul.msk.bf16.gmra.mxu3 %vm276_vm3, %v1948_v42 }
  0x9e   :  { %v1968_v15 = vpop.f32.mrf.mxu2 }
  0x9f   :  { %v1966_v11 = vpop.f32.mrf.mxu1 }
  0xa1   :  { %1395 = vmatmul.msk.bf16.gmra.mxu0 %vm276_vm3, %v1776_v3 }
  0xa2   :  { %1360 = vmatmul.msk.bf16.gmra.mxu1 %vm276_vm3, %v1948_v42  ;;  %v316_v55 = vpop.f32.mrf.mxu0 }
  0xa3   :  { %v1976_v28 = vpop.f32.mrf.mxu3 }
  0xa7   :  { %1376 = vmatmul.msk.bf16.gmra.mxu2 %vm276_vm3, %v1974_v24  ;;  %v1984_v32 = vpop.f32.mrf.mxu1 }
  0xaa   :  { %v1991_v26 = vpop.f32.mrf.mxu2 }
  0xac   :  { %1388 = vmatmul.msk.bf16.gmra.mxu3 %vm276_vm3, %v1989_v29 }
  0xae   :  { %v319_v40 = vpop.f32.mrf.mxu0 }
  0xaf   :  { %v1997_v2 = vpop.f32.mrf.mxu3  ;;  %v430_v43 = vpop.f32.mrf.mxu1 }
  0xb0   :  { %v431_v44 = vadd.f32 %v430_v43, %v314_v53 }
  0xb1   :  { %1396 = vmatmul.msk.bf16.gmra.mxu0 %vm276_vm3, %v1995_v39 }
  0xb2   :  { %v2001_v48 = vpop.f32.mrf.mxu2  ;;  %1398 = vmatmul.msk.bf16.vlgmr.msra.gmra.mxu1 %vm276_vm3, %v1822_v52 }
  0xb6   :  { %v321_v49 = vpop.f32.mrf.mxu0 }
  0xb7   :  { %v2005_v25 = vpop.f32.mrf.mxu3  ;;  %1410 = vmatmul.msk.bf16.vlgmr.msra.gmra.mxu2 %vm276_vm3, %v1833_v23  ;;  %v432_v6 = vpop.f32.mrf.mxu1 }
  0xb8   :  { %v433_v51 = vadd.f32 %v432_v6, %v316_v55 }
  0xba   :  { %v598_v56 = vpop.f32.mrf.mxu2 }
  0xbb   :  { %v638_v57 = vadd.f32 %v598_v56, %v431_v44 }
  0xbc   :  { %1418 = vmatmul.msk.bf16.vlgmr.msra.gmra.mxu3 %vm276_vm3, %v1610_v60 }
  0xbe   :  { %v774_v53 = vpop.f32.mrf.mxu0 }
  0xbf   :  { %v675_v62 = vpop.f32.mrf.mxu3  ;;  %v435_v63 = vpop.f32.mrf.mxu1 }
  0xc0   :  { %v715_v7 = vadd.f32 %v675_v62, %v638_v57  ;;  %v436_v34 = vadd.f32 %v435_v63, %v319_v40 }
  0xc1   :  { %1427 = vmatmul.msk.bf16.vlgmr.msra.gmra.mxu0 %vm276_vm3, %v1810_v41 }
  0xc2   :  { %v600_v52 = vpop.f32.mrf.mxu2  ;;  %1399 = vmatmul.msk.bf16.gmra.mxu1 %vm276_vm3, %v1810_v41  ;;  %v2015_v23 = vadd.f32 %v774_v53, %v715_v7 }
  0xc3   :  { %v639_v9 = vadd.f32 %v600_v52, %v433_v51 }
  0xc6   :  { %v776_v12 = vpop.f32.mrf.mxu0 }
  0xc7   :  { %v677_v58 = vpop.f32.mrf.mxu3  ;;  %1411 = vmatmul.msk.bf16.gmra.mxu2 %vm276_vm3, %v1848_v35  ;;  %v437_v60 = vpop.f32.mrf.mxu1 }
  0xc8   :  { %v716_v13 = vadd.f32 %v677_v58, %v639_v9  ;;  %v438_v14 = vadd.f32 %v437_v60, %v321_v49 }
  0xca   :  { %v603_v18 = vpop.f32.mrf.mxu2  ;;  %v2019_v19 = vadd.f32 %v776_v12, %v716_v13 }
  0xcb   :  { %v640_v20 = vadd.f32 %v603_v18, %v436_v34 }
  0xcc   :  { %1419 = vmatmul.msk.bf16.gmra.mxu3 %vm276_vm3, %v1723_v50 }
  0xce   :  { %v779_v55 = vpop.f32.mrf.mxu0 }
  0xcf   :  { %v680_v41 = vpop.f32.mrf.mxu3  ;;  %v440_v31 = vpop.f32.mrf.mxu1 }
  0xd0   :  { %v717_v61 = vadd.f32 %v680_v41, %v640_v20  ;;  %v441_v33 = vadd.f32 %v440_v31, %v1916_v37 }
  0xd1   :  { %1428 = vmatmul.msk.bf16.gmra.mxu0 %vm276_vm3, %v1835_v30 }
  0xd2   :  { %v605_v35 = vpop.f32.mrf.mxu2  ;;  %1400 = vmatmul.msk.bf16.gmra.mxu1 %vm276_vm3, %v1835_v30  ;;  %v2028_v36 = vadd.f32 %v779_v55, %v717_v61 }
  0xd3   :  { %v641_v40 = vadd.f32 %v605_v35, %v438_v14 }
  0xd6   :  { %v781_v43 = vpop.f32.mrf.mxu0 }
  0xd7   :  { %v682_v44 = vpop.f32.mrf.mxu3  ;;  %1412 = vmatmul.msk.bf16.gmra.mxu2 %vm276_vm3, %v1862_v8  ;;  %v442_v50 = vpop.f32.mrf.mxu1 }
  0xd8   :  { %v718_v49 = vadd.f32 %v682_v44, %v641_v40  ;;  %v443_v6 = vadd.f32 %v442_v50, %v1935_v4 }
  0xda   :  { %v608_v37 = vpop.f32.mrf.mxu2  ;;  %v2033_v51 = vadd.f32 %v781_v43, %v718_v49 }
  0xdb   :  { %v642_v56 = vadd.f32 %v608_v37, %v441_v33 }
  0xdc   :  { %1420 = vmatmul.msk.bf16.gmra.mxu3 %vm276_vm3, %v1632_v17 }
  0xde   :  { %v784_v30 = vpop.f32.mrf.mxu0 }
  0xdf   :  { %v685_v57 = vpop.f32.mrf.mxu3  ;;  %v445_v53 = vpop.f32.mrf.mxu1 }
  0xe0   :  { %v719_v62 = vadd.f32 %v685_v57, %v642_v56  ;;  %v446_v63 = vadd.f32 %v445_v53, %v1966_v11 }
  0xe1   :  { %1429 = vmatmul.msk.bf16.gmra.mxu0 %vm276_vm3, %v1876_v10 }
  0xe2   :  { %v610_v8 = vpop.f32.mrf.mxu2  ;;  %1401 = vmatmul.msk.bf16.gmra.mxu1 %vm276_vm3, %v1876_v10  ;;  %v2042_v4 = vadd.f32 %v784_v30, %v719_v62 }
  0xe3   :  { %v643_v7 = vadd.f32 %v610_v8, %v443_v6 }
  0xe6   :  { %v786_v34 = vpop.f32.mrf.mxu0 }
  0xe7   :  { %v687_v52 = vpop.f32.mrf.mxu3  ;;  %1413 = vmatmul.msk.bf16.gmra.mxu2 %vm276_vm3, %v1884_v16  ;;  %v447_v17 = vpop.f32.mrf.mxu1 }
  0xe8   :  { %v720_v9 = vadd.f32 %v687_v52, %v643_v7  ;;  %v448_v12 = vadd.f32 %v447_v17, %v1984_v32 }
  0xea   :  { %v613_v11 = vpop.f32.mrf.mxu2  ;;  %v2047_v58 = vadd.f32 %v786_v34, %v720_v9 }
  0xeb   :  { %v644_v60 = vadd.f32 %v613_v11, %v446_v63  ;;  %v2082_v63 = vld [vmem:[%s2292_s0 + $0x6c] sm:$0xf] }
  0xec   :  { %1421 = vmatmul.msk.bf16.gmra.mxu3 %vm276_vm3, %v1746_v22 }
  0xee   :  { %v789_v10 = vpop.f32.mrf.mxu0 }
  0xef   :  { %v690_v13 = vpop.f32.mrf.mxu3  ;;  %v450_v14 = vpop.f32.mrf.mxu1 }
  0xf0   :  { %v721_v18 = vadd.f32 %v690_v13, %v644_v60  ;;  %v451_v61 = vadd.f32 %v450_v14, %v1937_v59 }
  0xf1   :  { %1430 = vmatmul.msk.bf16.gmra.mxu0 %vm276_vm3, %v1898_v45 }
  0xf2   :  { %v615_v20 = vpop.f32.mrf.mxu2  ;;  %1402 = vmatmul.msk.bf16.gmra.mxu1 %vm276_vm3, %v1898_v45  ;;  %v2055_v16 = vadd.f32 %v789_v10, %v721_v18 }
  0xf3   :  { %v645_v32 = vadd.f32 %v615_v20, %v448_v12  ;;  %v994_v12 = vshll.u32 %v2082_v63, 16 }
  0xf5   :  { %v996_v18 = vrot.slane %v994_v12, 5 }
  0xf6   :  { %v791_v55 = vpop.f32.mrf.mxu0 }
  0xf7   :  { %v692_v41 = vpop.f32.mrf.mxu3  ;;  %1414 = vmatmul.msk.bf16.gmra.mxu2 %vm276_vm3, %v1906_v0  ;;  %v452_v22 = vpop.f32.mrf.mxu1 }
  0xf8   :  { %v722_v31 = vadd.f32 %v692_v41, %v645_v32  ;;  %v453_v0 = vadd.f32 %v452_v22, %v1968_v15  ;;  %v54_v41 = vld [vmem:[%s2292_s0 + $0x74] sm:$0x1] }
  0xfa   :  { %v618_v33 = vpop.f32.mrf.mxu2  ;;  %v2060_v35 = vadd.f32 %v791_v55, %v722_v31 }
  0xfb   :  { %v646_v40 = vadd.f32 %v618_v33, %v451_v61 }
  0xfc   :  { %1422 = vmatmul.msk.bf16.gmra.mxu3 %vm276_vm3, %v1670_v47 }
  0xfe   :  { %v794_v45 = vpop.f32.mrf.mxu0 }
  0xff   :  { %v695_v43 = vpop.f32.mrf.mxu3  ;;  %v455_v44 = vpop.f32.mrf.mxu1 }
 0x100   :  { %v723_v50 = vadd.f32 %v695_v43, %v646_v40  ;;  %v456_v57 = vadd.f32 %v455_v44, %v1991_v26  ;;  %v836_v26 = vrot.slane %v1957_v46, 5  ;;  %v1010_v44 = vshll.u32 %v54_v41, 16 }
 0x101   :  { %1431 = vmatmul.msk.bf16.gmra.mxu0 %vm276_vm3, %v1922_v21 }
 0x102   :  { %v620_v49 = vpop.f32.mrf.mxu2  ;;  %1403 = vmatmul.msk.bf16.gmra.mxu1 %vm276_vm3, %v1922_v21  ;;  %v2069_v6 = vadd.f32 %v794_v45, %v723_v50  ;;  %v833_v21 = vrot.slane %v1932_v1, 5  ;;  %v991_v1 = vshrl.u32 %v2082_v63, 16 }
 0x103   :  { %v647_v59 = vadd.f32 %v620_v49, %v453_v0 }
 0x104   :  { %v835_v17 = vrot.slane %v833_v21, 4 }
 0x106   :  { %v796_v37 = vpop.f32.mrf.mxu0  ;;  %v837_v14 = vsel %vm1768_vm7, %v835_v17, %v836_v26  ;;  %v1426_v26 = vrot.slane %v2082_v63, 9 }
 0x107   :  { %v697_v56 = vpop.f32.mrf.mxu3  ;;  %1415 = vmatmul.msk.bf16.gmra.mxu2 %vm276_vm3, %v1948_v42  ;;  %v457_v47 = vpop.f32.mrf.mxu1  ;;  %v2087_v42 = vld [vmem:[%s2292_s0 + $0x70] sm:$0xf]  ;;  %v840_v33 = vunpack.c.l.b16 %v837_v14 }
 0x108   :  { %v724_v30 = vadd.f32 %v697_v56, %v647_v59  ;;  %v458_v9 = vadd.f32 %v457_v47, %v2001_v48  ;;  %v1000_v11 = vshll.u32 %v2087_v42, 16  ;;  %v1004_v60 = vshrl.u32 %v2087_v42, 16 }
 0x109   :  { %v993_v48 = vrot.slane %v991_v1, 4 }
 0x10a   :  { %v623_v53 = vpop.f32.mrf.mxu2  ;;  %v2074_v62 = vadd.f32 %v796_v37, %v724_v30  ;;  %v1002_v20 = vrot.slane %v1000_v11, 5  ;;  %v1006_v32 = vrot.slane %v1004_v60, 4  ;;  %v1092_v30 = vrot.slane %v2087_v42, 5 }
 0x10b   :  { %v648_v15 = vadd.f32 %v623_v53, %v456_v57  ;;  %v997_v45 = vor.u32 %v996_v18, %v993_v48  ;;  %v1095_v42 = vrot.slane %v54_v41, 5 }
 0x10c   :  { %1423 = vmatmul.msk.bf16.gmra.mxu3 %vm276_vm3, %v1776_v3  ;;  %v1397_v3 = vrot.slane %v1927_v38, 9  ;;  %v1007_v43 = vor.u32 %v1006_v32, %v1002_v20  ;;  %v1093_v27 = vsel %vm1768_vm7, %v1426_v26, %v1092_v30 }
 0x10d   :  { %v998_v37 = vrot.slane %v997_v45, 4 }
 0x10e   :  { %v799_v8 = vpop.f32.mrf.mxu0  ;;  %v834_v13 = vsel %vm1768_vm7, %v1397_v3, %v833_v21  ;;  %v1008_v56 = vrot.slane %v1007_v43, 4 }
 0x10f   :  { %v700_v7 = vpop.f32.mrf.mxu3  ;;  %v460_v34 = vpop.f32.mrf.mxu1  ;;  %v839_v61 = vunpack.c.l.b16 %v834_v13  ;;  %v1003_v21 = vsel %vm1575_vm4, %v998_v37, %v1002_v20 }
 0x110   :  { %v725_v52 = vadd.f32 %v700_v7, %v648_v15  ;;  %v461_v40 = vadd.f32 %v460_v34, %v1952_v5  ;;  %v1094_v7 = vrot.slane %v1092_v30, 4  ;;  %v1015_v3 = vunpack.c.l.b16 %v1003_v21 }
 0x111   :  { %1432 = vmatmul.msk.bf16.gmra.mxu0 %vm276_vm3, %v1974_v24  ;;  %v841_v59 = vpack.c.b16 %v840_v33, %v839_v61 }
 0x112   :  { %v625_v46 = vpop.f32.mrf.mxu2  ;;  %1404 = vmatmul.msk.bf16.gmra.mxu1 %vm276_vm3, %v1974_v24  ;;  %v2100_v10 = vadd.f32 %v799_v8, %v725_v52 }
 0x113   :  { %v649_v38 = vadd.f32 %v625_v46, %v458_v9  ;;  %v1096_v9 = vsel %vm1768_vm7, %v1094_v7, %v1095_v42 }
 0x114   :  { %v1099_v13 = vunpack.c.l.b16 %v1096_v9 }
 0x116   :  { %v801_v55 = vpop.f32.mrf.mxu0 }
 0x117   :  { %v702_v22 = vpop.f32.mrf.mxu3  ;;  %1416 = vmatmul.msk.bf16.gmra.mxu2 %vm276_vm3, %v1989_v29  ;;  %v462_v24 = vpop.f32.mrf.mxu1  ;;  %v1012_v29 = vrot.slane %v1010_v44, 5 }
 0x118   :  { %v726_v31 = vadd.f32 %v702_v22, %v649_v38  ;;  %v463_v15 = vadd.f32 %v462_v24, %v1976_v28  ;;  %v1444_v28 = vld [vmem:[%s2292_s0 + $0x6c] sm:$0xff]  ;;  %v1098_v38 = vunpack.c.l.b16 %v1093_v27 }
 0x11a   :  { %v628_v50 = vpop.f32.mrf.mxu2  ;;  %v2112_v0 = vadd.f32 %v801_v55, %v726_v31  ;;  %v1100_v20 = vpack.c.b16 %v1099_v13, %v1098_v38 }
 0x11b   :  { %v650_v49 = vadd.f32 %v628_v50, %v461_v40 }
 0x11c   :  { %1424 = vmatmul.msk.bf16.gmra.mxu3 %vm276_vm3, %v1995_v39  ;;  %v1013_v39 = vsel %vm1575_vm4, %v1008_v56, %v1012_v29 }
 0x11d   :  { %v1016_v17 = vunpack.c.l.b16 %v1013_v39 }
 0x11e   :  { %v804_v47 = vpop.f32.mrf.mxu0 }
 0x11f   :  { %v705_v57 = vpop.f32.mrf.mxu3  ;;  %v465_v53 = vpop.f32.mrf.mxu1  ;;  %v1017_v60 = vpack.c.b16 %v1016_v17, %v1015_v3 }
 0x120   :  { %v727_v5 = vadd.f32 %v705_v57, %v650_v49  ;;  %v466_v46 = vadd.f32 %v465_v53, %v1997_v2 }
 0x121   :  { %1433 = vmatmul.msk.bf16.gmra.mxu0 %vm276_vm3, %v841_v59 }
 0x122   :  { %v630_v8 = vpop.f32.mrf.mxu2  ;;  %1405 = vmatmul.msk.bf16.gmra.mxu1 %vm276_vm3, %v841_v59  ;;  %v2125_v34 = vadd.f32 %v804_v47, %v727_v5  ;;  %v1446_v47 = vld [vmem:[%s2295_s4] sm:$0xff]  }
 0x123   :  { %v651_v52 = vadd.f32 %v630_v8, %v463_v15  ;;  %v1447_v15 = vunpack.c.l.bf16 %v1446_v47  ;;  %v1448_v9 = vunpack.c.h.bf16 %v1446_v47 }
 0x126   :  { %v806_v1 = vpop.f32.mrf.mxu0 }
 0x127   :  { %v707_v12 = vpop.f32.mrf.mxu3  ;;  %1417 = vmatmul.msk.bf16.gmra.mxu2 %vm276_vm3, %v1444_v28  ;;  %v467_v63 = vpop.f32.mrf.mxu1 }
 0x128   :  { %v728_v11 = vadd.f32 %v707_v12, %v651_v52  ;;  %v468_v22 = vadd.f32 %v467_v63, %v2005_v25  ;;  %v2149_v25 = vld [vmem:[%s2293_s2] ss:$0 sm:$0xff] }
 0x12a   :  { %v633_v14 = vpop.f32.mrf.mxu2  ;;  %v2136_v48 = vadd.f32 %v806_v1, %v728_v11 }
 0x12b   :  { %v652_v18 = vadd.f32 %v633_v14, %v466_v46 }
 0x12c   :  { %1425 = vmatmul.msk.bf16.gmra.mxu3 %vm276_vm3, %v1017_v60 }
 0x12e   :  { %v809_v32 = vpop.f32.mrf.mxu0 }
 0x12f   :  { %v710_v54 = vpop.f32.mrf.mxu3  ;;  %v857_v55 = vpop.f32.mrf.mxu1 }
 0x130   :  { %v729_v41 = vadd.f32 %v710_v54, %v652_v18  ;;  %v897_v43 = vadd.f32 %v857_v55, %v2015_v23  ;;  %v2157_v23 = vld [vmem:[%s2294_s3] ss:$0 sm:$0xff] }
 0x131   :  { %1434 = vmatmul.msk.bf16.gmra.mxu0 %vm276_vm3, %v1100_v20 }
 0x132   :  { %v635_v24 = vpop.f32.mrf.mxu2  ;;  %v2141_v31 = vadd.f32 %v809_v32, %v729_v41 }
 0x133   :  { %v653_v2 = vadd.f32 %v635_v24, %v468_v22 }
 0x136   :  { %v811_v61 = vpop.f32.mrf.mxu0 }
 0x137   :  { %v712_v33 = vpop.f32.mrf.mxu3  ;;  %v859_v40 = vpop.f32.mrf.mxu1 }
 0x138   :  { %v730_v45 = vadd.f32 %v712_v33, %v653_v2  ;;  %v898_v57 = vadd.f32 %v859_v40, %v2019_v19 }
 0x13a   :  { %v934_v44 = vpop.f32.mrf.mxu2  ;;  %v2144_v50 = vadd.f32 %v811_v61, %v730_v45 }
 0x13b   :  { %v974_v49 = vadd.f32 %v934_v44, %v897_v43 }
 0x13e   :  { %v1116_v59 = vpop.f32.mrf.mxu0 }
 0x13f   :  { %v1033_v37 = vpop.f32.mrf.mxu3  ;;  %v862_v56 = vpop.f32.mrf.mxu1 }
 0x140   :  { %v1073_v29 = vadd.f32 %v1033_v37, %v974_v49  ;;  %v899_v17 = vadd.f32 %v862_v56, %v2028_v36  ;;  %v1477_v36 = vld [vmem:[%s2295_s4 + $0x8] sm:$0xff]  }
 0x141   :  { %v1451_v41 = vunpack.c.l.bf16 %v1477_v36  ;;  %v1452_v56 = vunpack.c.h.bf16 %v1477_v36 }
 0x142   :  { %v1156_v30 = vadd.f32 %v1116_v59, %v1073_v29  ;;  %v936_v53 = vpop.f32.mrf.mxu2 }
 0x143   :  { %v975_v21 = vadd.f32 %v936_v53, %v898_v57 }
 0x144   :  { %v1176_v5 = vmul.f32 %v2149_v25, %v1156_v30 }
 0x146   :  { %v1196_v39 = vadd.f32 %v2157_v23, %v1176_v5  ;;  %v1118_v8 = vpop.f32.mrf.mxu0 }
 0x147   :  { %v1035_v26 = vpop.f32.mrf.mxu3  ;;  %v864_v7 = vpop.f32.mrf.mxu1 }
 0x148   :  { %v1244_v42 = vadd.f32 %v1447_v15, %v1196_v39  ;;  %v1074_v52 = vadd.f32 %v1035_v26, %v975_v21  ;;  %v900_v20 = vadd.f32 %v864_v7, %v2033_v51 }
 0x14a   :  { %v1260_v28 = vmax.f32 %v1244_v42, 0.0  ;;  %v1157_v3 = vadd.f32 %v1118_v8, %v1074_v52  ;;  %v939_v1 = vpop.f32.mrf.mxu2 }
 0x14b   :  { %v976_v12 = vadd.f32 %v939_v1, %v899_v17 }
 0x14c   :  { %v1276_v27 = vpack.c.bf16 %v1260_v28, %v1260_v28  ;;  %v1177_v19 = vmul.f32 %v2149_v25, %v1157_v3 }
 0x14e   :  { %1293 = vst.msk [vmem:[%s2296_s5] sm:$0xf] %vm1292_vm8, %v1276_v27  ;;  %v1197_v63 = vadd.f32 %v2157_v23, %v1177_v19  ;;  %v1121_v11 = vpop.f32.mrf.mxu0 }
 0x14f   :  { %v1038_v60 = vpop.f32.mrf.mxu3  ;;  %v867_v46 = vpop.f32.mrf.mxu1 }
 0x150   :  { %v1245_v38 = vadd.f32 %v1448_v9, %v1197_v63  ;;  %v1075_v13 = vadd.f32 %v1038_v60, %v976_v12  ;;  %v901_v44 = vadd.f32 %v867_v46, %v2042_v4  ;;  %v1478_v4 = vld [vmem:[%s2295_s4 + $0x10] sm:$0xff]  }
 0x151   :  { %v1455_v52 = vunpack.c.l.bf16 %v1478_v4 }
 0x152   :  { %v1261_v14 = vmax.f32 %v1245_v38, 0.0  ;;  %v1158_v18 = vadd.f32 %v1121_v11, %v1075_v13  ;;  %v941_v32 = vpop.f32.mrf.mxu2  ;;  %v1456_v38 = vunpack.c.h.bf16 %v1478_v4 }
 0x153   :  { %v977_v22 = vadd.f32 %v941_v32, %v900_v20 }
 0x154   :  { %v1277_v54 = vpack.c.bf16 %v1261_v14, %v1261_v14  ;;  %v1178_v55 = vmul.f32 %v2149_v25, %v1158_v18 }
 0x156   :  { %1294 = vst.msk [vmem:[%s2296_s5 + $0x4] sm:$0xf] %vm1292_vm8, %v1277_v54  ;;  %v1198_v24 = vadd.f32 %v2157_v23, %v1178_v55  ;;  %v1123_v2 = vpop.f32.mrf.mxu0 }
 0x157   :  { %v1040_v61 = vpop.f32.mrf.mxu3  ;;  %v869_v33 = vpop.f32.mrf.mxu1 }
 0x158   :  { %v1246_v40 = vadd.f32 %v1451_v41, %v1198_v24  ;;  %v1076_v45 = vadd.f32 %v1040_v61, %v977_v22  ;;  %v902_v8 = vadd.f32 %v869_v33, %v2047_v58 }
 0x15a   :  { %v1262_v43 = vmax.f32 %v1246_v40, 0.0  ;;  %v1159_v51 = vadd.f32 %v1123_v2, %v1076_v45  ;;  %v944_v49 = vpop.f32.mrf.mxu2 }
 0x15b   :  { %v978_v29 = vadd.f32 %v944_v49, %v901_v44 }
 0x15c   :  { %v1278_v59 = vpack.c.bf16 %v1262_v43, %v1262_v43  ;;  %v1179_v37 = vmul.f32 %v2149_v25, %v1159_v51 }
 0x15e   :  { %1295 = vst.msk [vmem:[%s2296_s5 + $0x8] sm:$0xf] %vm1292_vm8, %v1278_v59  ;;  %v1199_v47 = vadd.f32 %v2157_v23, %v1179_v37  ;;  %v1126_v30 = vpop.f32.mrf.mxu0 }
 0x15f   :  { %v1043_v57 = vpop.f32.mrf.mxu3  ;;  %v872_v53 = vpop.f32.mrf.mxu1 }
 0x160   :  { %v1247_v5 = vadd.f32 %v1452_v56, %v1199_v47  ;;  %v1077_v15 = vadd.f32 %v1043_v57, %v978_v29  ;;  %v903_v63 = vadd.f32 %v872_v53, %v2055_v16  ;;  %v1479_v16 = vld [vmem:[%s2295_s4 + $0x18] sm:$0xff]  }
 0x161   :  { %v1459_v33 = vunpack.c.l.bf16 %v1479_v16  ;;  %v1460_v57 = vunpack.c.h.bf16 %v1479_v16 }
 0x162   :  { %v1263_v21 = vmax.f32 %v1247_v5, 0.0  ;;  %v1160_v39 = vadd.f32 %v1126_v30, %v1077_v15  ;;  %v946_v26 = vpop.f32.mrf.mxu2 }
 0x163   :  { %v979_v28 = vadd.f32 %v946_v26, %v902_v8 }
 0x164   :  { %v1279_v7 = vpack.c.bf16 %v1263_v21, %v1263_v21  ;;  %v1180_v42 = vmul.f32 %v2149_v25, %v1160_v39 }
 0x166   :  { %1296 = vst.msk [vmem:[%s2296_s5 + $0xc] sm:$0xf] %vm1292_vm8, %v1279_v7  ;;  %v1200_v3 = vadd.f32 %v2157_v23, %v1180_v42  ;;  %v1128_v17 = vpop.f32.mrf.mxu0 }
 0x167   :  { %v1045_v1 = vpop.f32.mrf.mxu3  ;;  %v874_v27 = vpop.f32.mrf.mxu1 }
 0x168   :  { %v1248_v19 = vadd.f32 %v1455_v52, %v1200_v3  ;;  %v1078_v9 = vadd.f32 %v1045_v1, %v979_v28  ;;  %v904_v22 = vadd.f32 %v874_v27, %v2060_v35 }
 0x16a   :  { %v1264_v12 = vmax.f32 %v1248_v19, 0.0  ;;  %v1161_v58 = vadd.f32 %v1128_v17, %v1078_v9  ;;  %v949_v11 = vpop.f32.mrf.mxu2 }
 0x16b   :  { %v980_v13 = vadd.f32 %v949_v11, %v903_v63 }
 0x16c   :  { %v1280_v60 = vpack.c.bf16 %v1264_v12, %v1264_v12  ;;  %v1181_v46 = vmul.f32 %v2149_v25, %v1161_v58 }
 0x16e   :  { %1297 = vst.msk [vmem:[%s2296_s5 + $0x10] sm:$0xf] %vm1292_vm8, %v1280_v60  ;;  %v1201_v36 = vadd.f32 %v2157_v23, %v1181_v46  ;;  %v1131_v14 = vpop.f32.mrf.mxu0 }
 0x16f   :  { %v1048_v18 = vpop.f32.mrf.mxu3  ;;  %v877_v20 = vpop.f32.mrf.mxu1 }
 0x170   :  { %v1249_v32 = vadd.f32 %v1456_v38, %v1201_v36  ;;  %v1079_v54 = vadd.f32 %v1048_v18, %v980_v13  ;;  %v905_v56 = vadd.f32 %v877_v20, %v2069_v6  ;;  %v1480_v6 = vld [vmem:[%s2295_s4 + $0x20] sm:$0xff]  }
 0x171   :  { %v1463_v17 = vunpack.c.l.bf16 %v1480_v6  ;;  %v1464_v36 = vunpack.c.h.bf16 %v1480_v6 }
 0x172   :  { %v1265_v55 = vmax.f32 %v1249_v32, 0.0  ;;  %v1162_v41 = vadd.f32 %v1131_v14, %v1079_v54  ;;  %v951_v24 = vpop.f32.mrf.mxu2 }
 0x173   :  { %v981_v40 = vadd.f32 %v951_v24, %v904_v22 }
 0x174   :  { %v1281_v2 = vpack.c.bf16 %v1265_v55, %v1265_v55  ;;  %v1182_v61 = vmul.f32 %v2149_v25, %v1162_v41 }
 0x176   :  { %1298 = vst.msk [vmem:[%s2296_s5 + $0x14] sm:$0xf] %vm1292_vm8, %v1281_v2  ;;  %v1202_v45 = vadd.f32 %v2157_v23, %v1182_v61  ;;  %v1133_v43 = vpop.f32.mrf.mxu0 }
 0x177   :  { %v1050_v51 = vpop.f32.mrf.mxu3  ;;  %v879_v44 = vpop.f32.mrf.mxu1 }
 0x178   :  { %v1250_v49 = vadd.f32 %v1459_v33, %v1202_v45  ;;  %v1080_v59 = vadd.f32 %v1050_v51, %v981_v40  ;;  %v906_v42 = vadd.f32 %v879_v44, %v2074_v62 }
 0x17a   :  { %v1266_v37 = vmax.f32 %v1250_v49, 0.0  ;;  %v1163_v35 = vadd.f32 %v1133_v43, %v1080_v59  ;;  %v954_v29 = vpop.f32.mrf.mxu2 }
 0x17b   :  { %v982_v53 = vadd.f32 %v954_v29, %v905_v56 }
 0x17c   :  { %v1282_v47 = vpack.c.bf16 %v1266_v37, %v1266_v37  ;;  %v1183_v30 = vmul.f32 %v2149_v25, %v1163_v35 }
 0x17e   :  { %1299 = vst.msk [vmem:[%s2296_s5 + $0x18] sm:$0xf] %vm1292_vm8, %v1282_v47  ;;  %v1203_v5 = vadd.f32 %v2157_v23, %v1183_v30  ;;  %v1136_v15 = vpop.f32.mrf.mxu0 }
 0x17f   :  { %v1053_v4 = vpop.f32.mrf.mxu3  ;;  %v882_v21 = vpop.f32.mrf.mxu1 }
 0x180   :  { %v1251_v39 = vadd.f32 %v1460_v57, %v1203_v5  ;;  %v1081_v8 = vadd.f32 %v1053_v4, %v982_v53  ;;  %v907_v60 = vadd.f32 %v882_v21, %v2100_v10  ;;  %v1481_v10 = vld [vmem:[%s2295_s4 + $0x28] sm:$0xff]  }
 0x181   :  { %v1467_v40 = vunpack.c.l.bf16 %v1481_v10  ;;  %v1468_v57 = vunpack.c.h.bf16 %v1481_v10 }
 0x182   :  { %v1267_v26 = vmax.f32 %v1251_v39, 0.0  ;;  %v1164_v7 = vadd.f32 %v1136_v15, %v1081_v8  ;;  %v956_v52 = vpop.f32.mrf.mxu2 }
 0x183   :  { %v983_v1 = vadd.f32 %v956_v52, %v906_v42 }
 0x184   :  { %v1283_v28 = vpack.c.bf16 %v1267_v26, %v1267_v26  ;;  %v1184_v3 = vmul.f32 %v2149_v25, %v1164_v7 }
 0x186   :  { %1300 = vst.msk [vmem:[%s2296_s5 + $0x1c] sm:$0xf] %vm1292_vm8, %v1283_v28  ;;  %v1204_v27 = vadd.f32 %v2157_v23, %v1184_v3  ;;  %v1138_v19 = vpop.f32.mrf.mxu0 }
 0x187   :  { %v1055_v9 = vpop.f32.mrf.mxu3  ;;  %v884_v12 = vpop.f32.mrf.mxu1 }
 0x188   :  { %v1252_v58 = vadd.f32 %v1463_v17, %v1204_v27  ;;  %v1082_v63 = vadd.f32 %v1055_v9, %v983_v1  ;;  %v908_v24 = vadd.f32 %v884_v12, %v2112_v0 }
 0x18a   :  { %v1268_v11 = vmax.f32 %v1252_v58, 0.0  ;;  %v1165_v62 = vadd.f32 %v1138_v19, %v1082_v63  ;;  %v959_v46 = vpop.f32.mrf.mxu2 }
 0x18b   :  { %v984_v14 = vadd.f32 %v959_v46, %v907_v60 }
 0x18c   :  { %v1284_v38 = vpack.c.bf16 %v1268_v11, %v1268_v11  ;;  %v1185_v13 = vmul.f32 %v2149_v25, %v1165_v62 }
 0x18e   :  { %1301 = vst.msk [vmem:[%s2296_s5 + $0x20] sm:$0xf] %vm1292_vm8, %v1284_v38  ;;  %v1205_v18 = vadd.f32 %v2157_v23, %v1185_v13  ;;  %v1141_v20 = vpop.f32.mrf.mxu0 }
 0x18f   :  { %v1058_v32 = vpop.f32.mrf.mxu3  ;;  %v887_v55 = vpop.f32.mrf.mxu1 }
 0x190   :  { %v1253_v54 = vadd.f32 %v1464_v36, %v1205_v18  ;;  %v1083_v16 = vadd.f32 %v1058_v32, %v984_v14  ;;  %v909_v0 = vadd.f32 %v887_v55, %v2125_v34  ;;  %v1482_v34 = vld [vmem:[%s2295_s4 + $0x30] sm:$0xff]  }
 0x191   :  { %v1471_v28 = vunpack.c.l.bf16 %v1482_v34  ;;  %v1472_v46 = vunpack.c.h.bf16 %v1482_v34 }
 0x192   :  { %v1269_v41 = vmax.f32 %v1253_v54, 0.0  ;;  %v1166_v22 = vadd.f32 %v1141_v20, %v1083_v16  ;;  %v961_v2 = vpop.f32.mrf.mxu2 }
 0x193   :  { %v985_v45 = vadd.f32 %v961_v2, %v908_v24 }
 0x194   :  { %v1285_v61 = vpack.c.bf16 %v1269_v41, %v1269_v41  ;;  %v1186_v33 = vmul.f32 %v2149_v25, %v1166_v22 }
 0x196   :  { %1302 = vst.msk [vmem:[%s2296_s5 + $0x24] sm:$0xf] %vm1292_vm8, %v1285_v61  ;;  %v1206_v43 = vadd.f32 %v2157_v23, %v1186_v33  ;;  %v1143_v51 = vpop.f32.mrf.mxu0 }
 0x197   :  { %v1060_v44 = vpop.f32.mrf.mxu3  ;;  %v889_v29 = vpop.f32.mrf.mxu1 }
 0x198   :  { %v1254_v49 = vadd.f32 %v1467_v40, %v1206_v43  ;;  %v1084_v59 = vadd.f32 %v1060_v44, %v985_v45  ;;  %v910_v26 = vadd.f32 %v889_v29, %v2136_v48 }
 0x19a   :  { %v1270_v37 = vmax.f32 %v1254_v49, 0.0  ;;  %v1167_v35 = vadd.f32 %v1143_v51, %v1084_v59  ;;  %v964_v56 = vpop.f32.mrf.mxu2 }
 0x19b   :  { %v986_v53 = vadd.f32 %v964_v56, %v909_v0 }
 0x19c   :  { %v1286_v47 = vpack.c.bf16 %v1270_v37, %v1270_v37  ;;  %v1187_v30 = vmul.f32 %v2149_v25, %v1167_v35 }
 0x19e   :  { %1303 = vst.msk [vmem:[%s2296_s5 + $0x28] sm:$0xf] %vm1292_vm8, %v1286_v47  ;;  %v1207_v5 = vadd.f32 %v2157_v23, %v1187_v30  ;;  %v1146_v15 = vpop.f32.mrf.mxu0 }
 0x19f   :  { %v1063_v4 = vpop.f32.mrf.mxu3  ;;  %v892_v17 = vpop.f32.mrf.mxu1 }
 0x1a0   :  { %v1255_v21 = vadd.f32 %v1468_v57, %v1207_v5  ;;  %v1085_v39 = vadd.f32 %v1063_v4, %v986_v53  ;;  %v911_v63 = vadd.f32 %v892_v17, %v2141_v31  ;;  %v1483_v31 = vld [vmem:[%s2295_s4 + $0x38] sm:$0xff]  }
 0x1a1   :  { %v1475_v24 = vunpack.c.l.bf16 %v1483_v31  ;;  %v1476_v59 = vunpack.c.h.bf16 %v1483_v31 }
 0x1a2   :  { %v1271_v8 = vmax.f32 %v1255_v21, 0.0  ;;  %v1168_v6 = vadd.f32 %v1146_v15, %v1085_v39  ;;  %v966_v7 = vpop.f32.mrf.mxu2 }
 0x1a3   :  { %v987_v3 = vadd.f32 %v966_v7, %v910_v26 }
 0x1a4   :  { %v1287_v42 = vpack.c.bf16 %v1271_v8, %v1271_v8  ;;  %v1188_v52 = vmul.f32 %v2149_v25, %v1168_v6 }
 0x1a6   :  { %1304 = vst.msk [vmem:[%s2296_s5 + $0x2c] sm:$0xf] %vm1292_vm8, %v1287_v42  ;;  %v1208_v1 = vadd.f32 %v2157_v23, %v1188_v52  ;;  %v1148_v27 = vpop.f32.mrf.mxu0 }
 0x1a7   :  { %v1065_v19 = vpop.f32.mrf.mxu3  ;;  %v894_v36 = vpop.f32.mrf.mxu1 }
 0x1a8   :  { %v1256_v9 = vadd.f32 %v1471_v28, %v1208_v1  ;;  %v1086_v12 = vadd.f32 %v1065_v19, %v987_v3  ;;  %v912_v55 = vadd.f32 %v894_v36, %v2144_v50 }
 0x1aa   :  { %v1272_v58 = vmax.f32 %v1256_v9, 0.0  ;;  %v1169_v48 = vadd.f32 %v1148_v27, %v1086_v12  ;;  %v969_v11 = vpop.f32.mrf.mxu2 }
 0x1ab   :  { %v988_v38 = vadd.f32 %v969_v11, %v911_v63 }
 0x1ac   :  { %v1288_v62 = vpack.c.bf16 %v1272_v58, %v1272_v58  ;;  %v1189_v60 = vmul.f32 %v2149_v25, %v1169_v48 }
 0x1ae   :  { %1305 = vst.msk [vmem:[%s2296_s5 + $0x30] sm:$0xf] %vm1292_vm8, %v1288_v62  ;;  %v1209_v13 = vadd.f32 %v2157_v23, %v1189_v60  ;;  %v1151_v14 = vpop.f32.mrf.mxu0 }
 0x1af   :  { %v1068_v18 = vpop.f32.mrf.mxu3 }
 0x1b0   :  { %v1257_v20 = vadd.f32 %v1472_v46, %v1209_v13  ;;  %v1087_v32 = vadd.f32 %v1068_v18, %v988_v38 }
 0x1b2   :  { %v1273_v54 = vmax.f32 %v1257_v20, 0.0  ;;  %v1170_v16 = vadd.f32 %v1151_v14, %v1087_v32  ;;  %v971_v10 = vpop.f32.mrf.mxu2 }
 0x1b3   :  { %v989_v2 = vadd.f32 %v971_v10, %v912_v55 }
 0x1b4   :  { %v1289_v41 = vpack.c.bf16 %v1273_v54, %v1273_v54  ;;  %v1190_v22 = vmul.f32 %v2149_v25, %v1170_v16 }
 0x1b6   :  { %1306 = vst.msk [vmem:[%s2296_s5 + $0x34] sm:$0xf] %vm1292_vm8, %v1289_v41  ;;  %v1210_v61 = vadd.f32 %v2157_v23, %v1190_v22  ;;  %v1153_v43 = vpop.f32.mrf.mxu0 }
 0x1b7   :  { %v1070_v33 = vpop.f32.mrf.mxu3 }
 0x1b8   :  { %v1258_v40 = vadd.f32 %v1475_v24, %v1210_v61  ;;  %v1088_v45 = vadd.f32 %v1070_v33, %v989_v2 }
 0x1ba   :  { %v1274_v51 = vmax.f32 %v1258_v40, 0.0  ;;  %v1171_v44 = vadd.f32 %v1153_v43, %v1088_v45 }
 0x1bc   :  { %v1290_v50 = vpack.c.bf16 %v1274_v51, %v1274_v51  ;;  %v1191_v49 = vmul.f32 %v2149_v25, %v1171_v44 }
 0x1be   :  { %1307 = vst.msk [vmem:[%s2296_s5 + $0x38] sm:$0xf] %vm1292_vm8, %v1290_v50  ;;  %v1211_v37 = vadd.f32 %v2157_v23, %v1191_v49 }
 0x1c0   :  { %v1259_v35 = vadd.f32 %v1476_v59, %v1211_v37 }
 0x1c2   :  { %v1275_v0 = vmax.f32 %v1259_v35, 0.0 }
 0x1c4   :  { %v1291_v56 = vpack.c.bf16 %v1275_v0, %v1275_v0 }
 0x1c6   :  { %1308 = vst.msk [vmem:[%s2296_s5 + $0x3c] sm:$0xf] %vm1292_vm8, %v1291_v56 }

// kernel: tpu_custom_call.1
= control target key start
LH: loop header
LB: loop body
LE: loop exit
PB: predicated region body
PF: predicated region fallthrough
CT: control target
= control target key end

     0   :  { %s2912_s15 = smov 0   ;;  %s2914_s16 = smov 0   ;;  %s4130_s0 = inlined_call_operand.vmem [shape: bf16[2,18,18,4], index: 0, kind: input, shape index: {}]   ;;  %s4131_s1 = inlined_call_operand.vmem [shape: bf16[36,4], index: 1, kind: input, shape index: {}]   ;;  %s4132_s2 = inlined_call_operand.vmem [shape: f32[1,4], index: 2, kind: input, shape index: {}]   ;;  %s4133_s3 = inlined_call_operand.vmem [shape: f32[1,4], index: 3, kind: input, shape index: {}]   ;;  %s4134_s4 = inlined_call_operand.vmem [shape: bf16[2,16,16,4], index: 4, kind: output, shape index: {}]  }
   0x1   :  { %s2916_s17 = smov 0  }
   0x2 LB: > { %s26_s18 = sadd.s32 1, %s2881_s16  ;;  %p2565_p0 = scmp.ge.s32.totalorder %s2885_s17, 1  ;;  %s2885_s17 = sphi %s2916_s17, %s14_s17   ;;  %s2881_s16 = sphi %s2914_s16, %s4274_s16   ;;  %s2877_s15 = sphi %s2912_s15, %s4273_s15  }
   0x3   : > { %p28_p1 = scmp.ge.s32.totalorder %s26_s18, 2  ;;  %p176_p2 = scmp.lt.s32.totalorder %s2885_s17, 3 }
   0x5   : > { %s4276_s18 = smov (%p28_p1, %s26_s18), 0  ;;  %p177_p3 = pnand %p2565_p0, %p176_p2 }
   0x7   : > { %180 = sbr.rel (%p177_p3) target bundleno = 764 (0x2fc), region = 36 }
   0xc   : > { %v670_v0 = vld [vmem:[%s4131_s1] sm:$0xc]  ;;  %p207_p4 = scmp.lt.s32.totalorder %s2877_s15, 1  ;;  %v1216_v3 = vld [vmem:[%s4131_s1 + $0x4] sm:$0x3]  ;;  %vm772_vm0 = vcmask 1041408  }
   0xd   : > { %v720_v1 = vunpack.c.l.b16 %v670_v0  ;;  %v282_v4 = vld [vmem:[%s4131_s1] sm:$0x3]  ;;  %v1598_v5 = vld [vmem:[%s4131_s1 + $0x8] sm:$0x3]  ;;  %vm283_vm1 = vsmask.f32 3328 }
   0xe   : > { %s4278_s15 = smov (!%p207_p4, %s2877_s15), 1  ;;  %vm284_vm2 = vsmask.f32 7440  ;;  %v1314_v7 = vsel %vm772_vm0, %v1216_v3, 0  ;;  %v1437_v8 = vld [vmem:[%s4131_s1 + $0x4] sm:$0xc] }
   0xf   : > { %v721_v2 = vpack.c.b16 %v720_v1, %v720_v1  ;;  %s2827_s25 = smul.u32 216, %s4278_s15  ;;  %v994_v9 = vsel %vm772_vm0, %v282_v4, 0  ;;  %v1606_v13 = vsel %vm772_vm0, %v1598_v5, 0  ;;  %v1444_v22 = vunpack.c.l.b16 %v1437_v8  ;;  %vm2978_vm4 = vmor %vm283_vm1, %vm284_vm2  ;;  %s2805_s23 = sshll.u32 %s4278_s15, 7 }
  0x10   : > { %vm723_vm3 = vcmask 31744   ;;  %vm1101_vm5 = vcmask 1042432   ;;  %vm1102_vm6 = vcmask 1046532   ;;  %s3887_s26 = scalar_lea.vmem %s4134_s4, %s2805_s23  ;;  %vm2439_vm8 = vcmask 27648  }
  0x11   : > { %v722_v6 = vrot.slane %v721_v2, 2  ;;  %s2948_s30 = scalar_lea.vmem %s4130_s0, %s2827_s25  ;;  %v1445_v42 = vpack.c.b16 %v1444_v22, %v1444_v22  ;;  %vm3281_vm7 = vmor %vm1101_vm5, %vm1102_vm6 }
  0x12   : > { %v2957_v11 = vld [vmem:[%s2948_s30 + $0x30] sm:$0xf]  ;;  %v2960_v12 = vld [vmem:[%s2948_s30 + $0x34] sm:$0xf]  ;;  %v2964_v14 = vld [vmem:[%s2948_s30 + $0x38] sm:$0x1] }
  0x13   : > { %v774_v10 = vsel %vm772_vm0, %v722_v6, 0  ;;  %v383_v15 = vshrl.u32 %v2957_v11, 16  ;;  %v386_v16 = vshll.u32 %v2957_v11, 16  ;;  %v392_v17 = vshll.u32 %v2960_v12, 16  ;;  %v252_v20 = vld [vmem:[%s2948_s30 + $0x60] sm:$0xf] }
  0x14   : > { %2824 = vmatpush.bf16.msra.mxu1 %v774_v10  ;;  %2825 = vmatpush.bf16.msra.mxu2 %v774_v10  ;;  %v396_v18 = vshrl.u32 %v2960_v12, 16  ;;  %v402_v19 = vshll.u32 %v2964_v14, 16  ;;  %v253_v21 = vld [vmem:[%s2948_s30 + $0x64] sm:$0xf]  ;;  %v254_v27 = vld [vmem:[%s2948_s30 + $0x68] sm:$0x1] }
  0x15   : > { %2826 = vmatpush.bf16.msra.mxu3 %v774_v10  ;;  %783 = vmatpush.bf16.msra.mxu0 %v774_v10  ;;  %v385_v23 = vrot.slane %v383_v15, 4  ;;  %v388_v24 = vrot.slane %v386_v16, 5  ;;  %v394_v25 = vrot.slane %v392_v17, 5  ;;  %v479_v29 = vshrl.u32 %v252_v20, 16  ;;  %v264_v36 = vld [vmem:[%s2948_s30 + $0x90] sm:$0xf] }
  0x16   : > { %v398_v26 = vrot.slane %v396_v18, 4  ;;  %v404_v28 = vrot.slane %v402_v19, 5  ;;  %v482_v30 = vshll.u32 %v252_v20, 16  ;;  %v488_v31 = vshll.u32 %v253_v21, 16  ;;  %v265_v37 = vld [vmem:[%s2948_s30 + $0x94] sm:$0xf] }
  0x17   : > { %v389_v32 = vor.u32 %v388_v24, %v385_v23  ;;  %v492_v34 = vshrl.u32 %v253_v21, 16  ;;  %v498_v35 = vshll.u32 %v254_v27, 16  ;;  %v481_v39 = vrot.slane %v479_v29, 4  ;;  %v266_v54 = vld [vmem:[%s2948_s30 + $0x98] sm:$0x1] }
  0x18   : > { %1323 = vmatpush.bf16.msrb.mxu2 %v1314_v7  ;;  %1003 = vmatpush.bf16.msrb.mxu1 %v994_v9  ;;  %v399_v33 = vor.u32 %v398_v26, %v394_v25  ;;  %v484_v40 = vrot.slane %v482_v30, 5  ;;  %v490_v41 = vrot.slane %v488_v31, 5  ;;  %v575_v48 = vshrl.u32 %v264_v36, 16  ;;  %v2988_v0 = vld [vmem:[%s2948_s30] sm:$0xf] }
  0x19   : > { %1615 = vmatpush.bf16.msrb.mxu0 %v1606_v13  ;;  %v390_v43 = vrot.slane %v389_v32, 4  ;;  %v494_v45 = vrot.slane %v492_v34, 4  ;;  %v500_v46 = vrot.slane %v498_v35, 5  ;;  %v578_v49 = vshll.u32 %v264_v36, 16  ;;  %v2995_v4 = vld [vmem:[%s2948_s30 + $0x4] sm:$0xf] }
  0x1a   : > { %v400_v44 = vrot.slane %v399_v33, 4  ;;  %v485_v47 = vor.u32 %v484_v40, %v481_v39  ;;  %v584_v50 = vshll.u32 %v265_v37, 16  ;;  %v588_v55 = vshrl.u32 %v265_v37, 16  ;;  %v3000_v10 = vld [vmem:[%s2948_s30 + $0x8] sm:$0x1] }
  0x1b   : > { %v395_v51 = vsel %vm2978_vm4, %v390_v43, %v394_v25  ;;  %v495_v53 = vor.u32 %v494_v45, %v490_v41  ;;  %v577_v59 = vrot.slane %v575_v48, 4  ;;  %v580_v61 = vrot.slane %v578_v49, 5  ;;  %v3012_v26 = vld [vmem:[%s2948_s30 + $0x3c] sm:$0xf]  ;;  %v3019_v31 = vld [vmem:[%s2948_s30 + $0x40] sm:$0xf] }
  0x1c   : > { %v405_v52 = vsel %vm2978_vm4, %v400_v44, %v404_v28  ;;  %v679_v56 = vunpack.c.l.b16 %v395_v51  ;;  %v486_v58 = vrot.slane %v485_v47, 4  ;;  %v586_v62 = vrot.slane %v584_v50, 5  ;;  %v3024_v35 = vld [vmem:[%s2948_s30 + $0x44] sm:$0x1]  ;;  %v3038_v50 = vld [vmem:[%s2948_s30 + $0x70] sm:$0xf] }
  0x1d   : > { %v680_v57 = vunpack.c.l.b16 %v405_v52  ;;  %v496_v60 = vrot.slane %v495_v53, 4  ;;  %v590_v63 = vrot.slane %v588_v55, 4  ;;  %v594_v3 = vshll.u32 %v266_v54, 16  ;;  %v3045_v54 = vld [vmem:[%s2948_s30 + $0x74] sm:$0x1] }
  0x1e   : > { %v491_v2 = vsel %vm2978_vm4, %v486_v58, %v490_v41  ;;  %v1446_v5 = vrot.slane %v1445_v42, 2  ;;  %v581_v8 = vor.u32 %v580_v61, %v577_v59  ;;  %v287_v16 = vshrl.u32 %v2988_v0, 16  ;;  %v3029_v41 = vld [vmem:[%s2948_s30 + $0x6c] sm:$0xf] }
  0x1f   : > { %v2990_v1 = vpack.c.b16 %v680_v57, %v679_v56  ;;  %v501_v6 = vsel %vm2978_vm4, %v496_v60, %v500_v46  ;;  %v687_v7 = vunpack.c.l.b16 %v491_v2  ;;  %v591_v9 = vor.u32 %v590_v63, %v586_v62 }
  0x20   : > { %v688_v13 = vunpack.c.l.b16 %v501_v6  ;;  %v596_v15 = vrot.slane %v594_v3, 5  ;;  %v290_v17 = vshll.u32 %v2988_v0, 16  ;;  %v582_v18 = vrot.slane %v581_v8, 4 }
  0x21   : > { %2573 = vmatmul.msk.bf16.vlgmr.msra.gmra.mxu1 %vm723_vm3, %v2990_v1  ;;  %v592_v19 = vrot.slane %v591_v9, 4  ;;  %v296_v20 = vshll.u32 %v2995_v4, 16  ;;  %v300_v21 = vshrl.u32 %v2995_v4, 16  ;;  %v289_v23 = vrot.slane %v287_v16, 4 }
  0x22   : > { %v3008_v22 = vpack.c.b16 %v688_v13, %v687_v7  ;;  %v292_v24 = vrot.slane %v290_v17, 5  ;;  %v306_v25 = vshll.u32 %v3000_v10, 16  ;;  %v587_v27 = vsel %vm2978_vm4, %v582_v18, %v586_v62  ;;  %v267_v7 = vld [vmem:[%s2948_s30 + $0x9c] sm:$0xf] }
  0x23   : > { %v597_v28 = vsel %vm2978_vm4, %v592_v19, %v596_v15  ;;  %v298_v29 = vrot.slane %v296_v20, 5  ;;  %v302_v30 = vrot.slane %v300_v21, 4  ;;  %v695_v32 = vunpack.c.l.b16 %v587_v27  ;;  %v268_v15 = vld [vmem:[%s2948_s30 + $0xa0] sm:$0xf] }
  0x24   : > { %4177 = vst [vmem:[#allocation2_spill] sm:$0xff] %v3008_v22  ;;  %2577 = vmatmul.msk.bf16.vlgmr.msra.gmra.mxu2 %vm723_vm3, %v3008_v22  ;;  %v696_v33 = vunpack.c.l.b16 %v597_v28  ;;  %v293_v34 = vor.u32 %v292_v24, %v289_v23  ;;  %v308_v37 = vrot.slane %v306_v25, 5  ;;  %v1451_v39 = vsel %vm772_vm0, %v1446_v5, 0  ;;  %v269_v23 = vld [vmem:[%s2948_s30 + $0xa4] sm:$0x1] }
  0x25   : > { %v303_v36 = vor.u32 %v302_v30, %v298_v29  ;;  %v407_v40 = vshrl.u32 %v3012_v26, 16  ;;  %1460 = vmatpush.bf16.msrb.mxu3 %v1451_v39  ;;  %v410_v44 = vshll.u32 %v3012_v26, 16  ;;  %v416_v45 = vshll.u32 %v3019_v31, 16 }
  0x26   : > { %v3031_v42 = vpack.c.b16 %v696_v33, %v695_v32  ;;  %v294_v43 = vrot.slane %v293_v34, 4  ;;  %v420_v48 = vshrl.u32 %v3019_v31, 16  ;;  %v426_v49 = vshll.u32 %v3024_v35, 16 }
  0x27   : > { %v304_v46 = vrot.slane %v303_v36, 4  ;;  %v409_v47 = vrot.slane %v407_v40, 4  ;;  %v412_v52 = vrot.slane %v410_v44, 5  ;;  %v418_v53 = vrot.slane %v416_v45, 5  ;;  %v3063_v44 = vld [vmem:[%s2948_s30 + $0xc] sm:$0xf] }
  0x28   : > { %4178 = vst [vmem:[#allocation3_spill] sm:$0xff] %v3031_v42  ;;  %2581 = vmatmul.msk.bf16.vlgmr.msra.gmra.mxu3 %vm723_vm3, %v3031_v42  ;;  %v299_v51 = vsel %vm2978_vm4, %v294_v43, %v298_v29  ;;  %v503_v55 = vshrl.u32 %v3029_v41, 16  ;;  %v422_v58 = vrot.slane %v420_v48, 4  ;;  %v428_v59 = vrot.slane %v426_v49, 5  ;;  %v3070_v48 = vld [vmem:[%s2948_s30 + $0x10] sm:$0xf] }
  0x29   : > { %v309_v56 = vsel %vm2978_vm4, %v304_v46, %v308_v37  ;;  %v671_v57 = vunpack.c.l.b16 %v299_v51  ;;  %v413_v61 = vor.u32 %v412_v52, %v409_v47  ;;  %v506_v63 = vshll.u32 %v3029_v41, 16  ;;  %v3073_v49 = vld [vmem:[%s2948_s30 + $0x14] sm:$0x1] }
  0x2a   : > { %v672_v60 = vunpack.c.l.b16 %v309_v56  ;;  %v505_v62 = vrot.slane %v503_v55, 4  ;;  %v423_v2 = vor.u32 %v422_v58, %v418_v53  ;;  %v512_v3 = vshll.u32 %v3038_v50, 16 }
  0x2b   : > { %v516_v5 = vshrl.u32 %v3038_v50, 16  ;;  %v522_v6 = vshll.u32 %v3045_v54, 16  ;;  %v414_v9 = vrot.slane %v413_v61, 4  ;;  %v508_v13 = vrot.slane %v506_v63, 5 }
  0x2c   : > { %v703_v8 = vpack.c.b16 %v672_v60, %v671_v57  ;;  %v424_v16 = vrot.slane %v423_v2, 4  ;;  %v514_v17 = vrot.slane %v512_v3, 5  ;;  %v599_v24 = vshrl.u32 %v267_v7, 16  ;;  %v3085_v2 = vld [vmem:[%s2948_s30 + $0x48] sm:$0xf] }
  0x2d   : > { %v518_v18 = vrot.slane %v516_v5, 4  ;;  %v524_v19 = vrot.slane %v522_v6, 5  ;;  %v419_v20 = vsel %vm2978_vm4, %v414_v9, %v418_v53  ;;  %v509_v21 = vor.u32 %v508_v13, %v505_v62 }
  0x2e   : > { %2569 = vmatmul.msk.bf16.vlgmr.msra.gmra.mxu0 %vm723_vm3, %v703_v8  ;;  %v602_v25 = vshll.u32 %v267_v7, 16  ;;  %v429_v27 = vsel %vm2978_vm4, %v424_v16, %v428_v59  ;;  %v681_v28 = vunpack.c.l.b16 %v419_v20  ;;  %v608_v30 = vshll.u32 %v268_v15, 16  ;;  %v3092_v8 = vld [vmem:[%s2948_s30 + $0x4c] sm:$0xf] }
  0x2f   : > { %v519_v29 = vor.u32 %v518_v18, %v514_v17  ;;  %v682_v32 = vunpack.c.l.b16 %v429_v27  ;;  %v510_v33 = vrot.slane %v509_v21, 4  ;;  %v601_v34 = vrot.slane %v599_v24, 4 }
  0x30   : > { %v604_v36 = vrot.slane %v602_v25, 5  ;;  %v610_v39 = vrot.slane %v608_v30, 5  ;;  %v612_v40 = vshrl.u32 %v268_v15, 16  ;;  %v618_v43 = vshll.u32 %v269_v23, 16 }
  0x31   : > { %v520_v37 = vrot.slane %v519_v29, 4  ;;  %v3065_v45 = vpack.c.b16 %v682_v32, %v681_v28  ;;  %v515_v46 = vsel %vm2978_vm4, %v510_v33, %v514_v17  ;;  %v311_v58 = vshrl.u32 %v3063_v44, 16  ;;  %v3106_v28 = vld [vmem:[%s2948_s30 + $0x78] sm:$0xf] }
  0x32   : > { %v605_v47 = vor.u32 %v604_v36, %v601_v34  ;;  %v689_v52 = vunpack.c.l.b16 %v515_v46  ;;  %v614_v53 = vrot.slane %v612_v40, 4  ;;  %v620_v55 = vrot.slane %v618_v43, 5 }
  0x33   : > { %v525_v51 = vsel %vm2978_vm4, %v520_v37, %v524_v19  ;;  %2574 = vmatmul.msk.bf16.gmra.mxu1 %vm723_vm3, %v3065_v45  ;;  %v314_v59 = vshll.u32 %v3063_v44, 16  ;;  %v320_v61 = vshll.u32 %v3070_v48, 16  ;;  %v324_v62 = vshrl.u32 %v3070_v48, 16  ;;  %v3097_v19 = vld [vmem:[%s2948_s30 + $0x50] sm:$0x1] }
  0x34   : > { %v690_v56 = vunpack.c.l.b16 %v525_v51  ;;  %v606_v57 = vrot.slane %v605_v47, 4  ;;  %v615_v60 = vor.u32 %v614_v53, %v610_v39  ;;  %v330_v63 = vshll.u32 %v3073_v49, 16  ;;  %v3114_v47 = vld [vmem:[%s2948_s30 + $0x7c] sm:$0xf]  ;;  %v3117_v51 = vld [vmem:[%s2948_s30 + $0x80] sm:$0x1] }
  0x35   : > { %v313_v6 = vrot.slane %v311_v58, 4  ;;  %v316_v7 = vrot.slane %v314_v59, 5  ;;  %v322_v15 = vrot.slane %v320_v61, 5  ;;  %v326_v16 = vrot.slane %v324_v62, 4 }
  0x36   : > { %v3087_v3 = vpack.c.b16 %v690_v56, %v689_v52  ;;  %v611_v5 = vsel %vm2978_vm4, %v606_v57, %v610_v39  ;;  %v616_v9 = vrot.slane %v615_v60, 4  ;;  %v332_v18 = vrot.slane %v330_v63, 5 }
  0x37   : > { %v697_v13 = vunpack.c.l.b16 %v611_v5  ;;  %v317_v17 = vor.u32 %v316_v7, %v313_v6  ;;  %v431_v20 = vshrl.u32 %v3085_v2, 16  ;;  %v434_v21 = vshll.u32 %v3085_v2, 16  ;;  %v3129_v7 = vld [vmem:[%s2948_s30 + $0xa8] sm:$0xf] }
  0x38   : > { %2578 = vmatmul.msk.bf16.gmra.mxu2 %vm723_vm3, %v3087_v3  ;;  %v621_v23 = vsel %vm2978_vm4, %v616_v9, %v620_v55  ;;  %v327_v24 = vor.u32 %v326_v16, %v322_v15  ;;  %v440_v25 = vshll.u32 %v3092_v8, 16  ;;  %v444_v27 = vshrl.u32 %v3092_v8, 16  ;;  %4180 = vst [vmem:[#allocation5_spill] sm:$0xff] %v3129_v7  ;;  %v3136_v16 = vld [vmem:[%s2948_s30 + $0xac] sm:$0xf] }
  0x39   : > { %v698_v29 = vunpack.c.l.b16 %v621_v23  ;;  %v318_v30 = vrot.slane %v317_v17, 4  ;;  %v433_v32 = vrot.slane %v431_v20, 4  ;;  %v436_v33 = vrot.slane %v434_v21, 5  ;;  %4181 = vst [vmem:[#allocation6_spill] sm:$0xff] %v3136_v16  ;;  %v3141_v23 = vld [vmem:[%s2948_s30 + $0xb0] sm:$0x1] }
  0x3a   : > { %v328_v34 = vrot.slane %v327_v24, 4  ;;  %v442_v36 = vrot.slane %v440_v25, 5  ;;  %v446_v37 = vrot.slane %v444_v27, 4  ;;  %v450_v39 = vshll.u32 %v3097_v19, 16  ;;  %4182 = vst [vmem:[#allocation7_spill] sm:$0xff] %v3141_v23 }
  0x3b   : > { %v3109_v40 = vpack.c.b16 %v698_v29, %v697_v13  ;;  %v323_v43 = vsel %vm2978_vm4, %v318_v30, %v322_v15  ;;  %v437_v46 = vor.u32 %v436_v33, %v433_v32  ;;  %v527_v52 = vshrl.u32 %v3106_v28, 16 }
  0x3c   : > { %v333_v53 = vsel %vm2978_vm4, %v328_v34, %v332_v18  ;;  %v673_v55 = vunpack.c.l.b16 %v323_v43  ;;  %v447_v56 = vor.u32 %v446_v37, %v442_v36  ;;  %v452_v57 = vrot.slane %v450_v39, 5 }
  0x3d   : > { %4179 = vst [vmem:[#allocation4_spill] sm:$0xff] %v3109_v40  ;;  %2582 = vmatmul.msk.bf16.gmra.mxu3 %vm723_vm3, %v3109_v40  ;;  %v674_v58 = vunpack.c.l.b16 %v333_v53  ;;  %v438_v59 = vrot.slane %v437_v46, 4  ;;  %v529_v60 = vrot.slane %v527_v52, 4  ;;  %v530_v61 = vshll.u32 %v3106_v28, 16 }
  0x3e   : > { %v448_v62 = vrot.slane %v447_v56, 4  ;;  %v536_v63 = vshll.u32 %v3114_v47, 16  ;;  %v540_v5 = vshrl.u32 %v3114_v47, 16  ;;  %v546_v6 = vshll.u32 %v3117_v51, 16 }
  0x3f   : > { %v3131_v9 = vpack.c.b16 %v674_v58, %v673_v55  ;;  %v443_v13 = vsel %vm2978_vm4, %v438_v59, %v442_v36  ;;  %v532_v15 = vrot.slane %v530_v61, 5  ;;  %v623_v29 = vshrl.u32 %v3129_v7, 16  ;;  %v3150_v36 = vld [vmem:[%s2948_s30 + $0x18] sm:$0xf] }
  0x40   : > { %v453_v17 = vsel %vm2978_vm4, %v448_v62, %v452_v57  ;;  %v683_v18 = vunpack.c.l.b16 %v443_v13  ;;  %v538_v20 = vrot.slane %v536_v63, 5  ;;  %v542_v21 = vrot.slane %v540_v5, 4  ;;  %v3156_v57 = vld [vmem:[%s2948_s30 + $0x1c] sm:$0xf]  ;;  %v3169_v13 = vld [vmem:[%s2948_s30 + $0x54] sm:$0xf] }
  0x41   : > { %2570 = vmatmul.msk.bf16.gmra.mxu0 %vm723_vm3, %v3131_v9  ;;  %v684_v24 = vunpack.c.l.b16 %v453_v17  ;;  %v533_v25 = vor.u32 %v532_v15, %v529_v60  ;;  %v548_v27 = vrot.slane %v546_v6, 5  ;;  %v626_v32 = vshll.u32 %v3129_v7, 16  ;;  %v3163_v60 = vld [vmem:[%s2948_s30 + $0x20] sm:$0x1] }
  0x42   : > { %v543_v30 = vor.u32 %v542_v21, %v538_v20  ;;  %v632_v33 = vshll.u32 %v3136_v16, 16  ;;  %v636_v34 = vshrl.u32 %v3136_v16, 16  ;;  %v625_v43 = vrot.slane %v623_v29, 4  ;;  %v3249_v16 = vld [vmem:[%s2948_s30 + $0x2c] sm:$0x1] }
  0x43   : > { %v3152_v37 = vpack.c.b16 %v684_v24, %v683_v18  ;;  %v534_v39 = vrot.slane %v533_v25, 4  ;;  %v642_v46 = vshll.u32 %v3141_v23, 16  ;;  %v628_v53 = vrot.slane %v626_v32, 5 }
  0x44   : > { %v544_v52 = vrot.slane %v543_v30, 4  ;;  %v634_v55 = vrot.slane %v632_v33, 5  ;;  %v638_v56 = vrot.slane %v636_v34, 4  ;;  %v335_v61 = vshrl.u32 %v3150_v36, 16  ;;  %v3178_v33 = vld [vmem:[%s2948_s30 + $0x58] sm:$0xf] }
  0x45   : > { %4183 = vst [vmem:[#allocation8_spill] sm:$0xff] %v3152_v37  ;;  %2575 = vmatmul.msk.bf16.gmra.mxu1 %vm723_vm3, %v3152_v37  ;;  %v539_v58 = vsel %vm2978_vm4, %v534_v39, %v538_v20  ;;  %v644_v59 = vrot.slane %v642_v46, 5  ;;  %v629_v5 = vor.u32 %v628_v53, %v625_v43  ;;  %v338_v18 = vshll.u32 %v3150_v36, 16  ;;  %v3186_v53 = vld [vmem:[%s2948_s30 + $0x5c] sm:$0x1] }
  0x46   : > { %v549_v62 = vsel %vm2978_vm4, %v544_v52, %v548_v27  ;;  %v691_v63 = vunpack.c.l.b16 %v539_v58  ;;  %v639_v6 = vor.u32 %v638_v56, %v634_v55  ;;  %v337_v17 = vrot.slane %v335_v61, 4  ;;  %v3189_v56 = vld [vmem:[%s2948_s30 + $0x84] sm:$0xf] }
  0x47   : > { %v692_v15 = vunpack.c.l.b16 %v549_v62  ;;  %v344_v20 = vshll.u32 %v3156_v57, 16  ;;  %v630_v21 = vrot.slane %v629_v5, 4  ;;  %v348_v25 = vshrl.u32 %v3156_v57, 16  ;;  %4184 = vst [vmem:[#allocation9_spill] sm:$0xff] %v3189_v56 }
  0x48   : > { %v640_v24 = vrot.slane %v639_v6, 4  ;;  %v354_v27 = vshll.u32 %v3163_v60, 16  ;;  %v340_v30 = vrot.slane %v338_v18, 5  ;;  %v455_v34 = vshrl.u32 %v3169_v13, 16 }
  0x49   : > { %v3175_v29 = vpack.c.b16 %v692_v15, %v691_v63  ;;  %v346_v32 = vrot.slane %v344_v20, 5  ;;  %v635_v39 = vsel %vm2978_vm4, %v630_v21, %v634_v55  ;;  %v350_v46 = vrot.slane %v348_v25, 4 }
  0x4a   : > { %v645_v43 = vsel %vm2978_vm4, %v640_v24, %v644_v59  ;;  %v356_v52 = vrot.slane %v354_v27, 5  ;;  %v699_v58 = vunpack.c.l.b16 %v635_v39  ;;  %v341_v62 = vor.u32 %v340_v30, %v337_v17  ;;  %v3201_v30 = vld [vmem:[%s2948_s30 + $0x88] sm:$0xf] }
  0x4b   : > { %2579 = vmatmul.msk.bf16.gmra.mxu2 %vm723_vm3, %v3175_v29  ;;  %v700_v61 = vunpack.c.l.b16 %v645_v43  ;;  %v457_v63 = vrot.slane %v455_v34, 4  ;;  %v351_v5 = vor.u32 %v350_v46, %v346_v32  ;;  %v458_v55 = vshll.u32 %v3169_v13, 16  ;;  %v3208_v43 = vld [vmem:[%s2948_s30 + $0x8c] sm:$0x1] }
  0x4c   : > { %v464_v59 = vshll.u32 %v3178_v33, 16  ;;  %v468_v6 = vshrl.u32 %v3178_v33, 16  ;;  %v342_v18 = vrot.slane %v341_v62, 4  ;;  %v474_v20 = vshll.u32 %v3186_v53, 16 }
  0x4d   : > { %v3196_v15 = vpack.c.b16 %v700_v61, %v699_v58  ;;  %v551_v21 = vshrl.u32 %v3189_v56, 16  ;;  %v352_v24 = vrot.slane %v351_v5, 4  ;;  %v460_v25 = vrot.slane %v458_v55, 5 }
  0x4e   : > { %v466_v27 = vrot.slane %v464_v59, 5  ;;  %v470_v17 = vrot.slane %v468_v6, 4  ;;  %v347_v34 = vsel %vm2978_vm4, %v342_v18, %v346_v32  ;;  %v476_v39 = vrot.slane %v474_v20, 5  ;;  %v3216_v18 = vld [vmem:[%s2948_s30 + $0xb4] sm:$0xf] }
  0x4f   : > { %4185 = vst [vmem:[#allocation10_spill] sm:$0xff] %v3196_v15  ;;  %2583 = vmatmul.msk.bf16.gmra.mxu3 %vm723_vm3, %v3196_v15  ;;  %v553_v46 = vrot.slane %v551_v21, 4  ;;  %v554_v58 = vshll.u32 %v3189_v56, 16  ;;  %v357_v61 = vsel %vm2978_vm4, %v352_v24, %v356_v52  ;;  %v675_v62 = vunpack.c.l.b16 %v347_v34 }
  0x50   : > { %v461_v5 = vor.u32 %v460_v25, %v457_v63  ;;  %v471_v55 = vor.u32 %v470_v17, %v466_v27  ;;  %v676_v59 = vunpack.c.l.b16 %v357_v61  ;;  %v560_v15 = vshll.u32 %v3201_v30, 16  ;;  %4186 = vst [vmem:[#allocation11_spill] sm:$0xff] %v3216_v18  ;;  %v3222_v63 = vld [vmem:[%s2948_s30 + $0xb8] sm:$0xf]  ;;  %v3229_v61 = vld [vmem:[%s2948_s30 + $0xbc] sm:$0x1] }
  0x51   : > { %v556_v6 = vrot.slane %v554_v58, 5  ;;  %v564_v32 = vshrl.u32 %v3201_v30, 16  ;;  %v570_v7 = vshll.u32 %v3208_v43, 16  ;;  %4187 = vst [vmem:[#allocation12_spill] sm:$0xff] %v3222_v63 }
  0x52   : > { %v462_v20 = vrot.slane %v461_v5, 4  ;;  %v472_v21 = vrot.slane %v471_v55, 4  ;;  %v3219_v23 = vpack.c.b16 %v676_v59, %v675_v62  ;;  %v562_v24 = vrot.slane %v560_v15, 5  ;;  %4188 = vst [vmem:[#allocation13_spill] sm:$0xff] %v3229_v61 }
  0x53   : > { %v557_v52 = vor.u32 %v556_v6, %v553_v46  ;;  %v566_v34 = vrot.slane %v564_v32, 4  ;;  %v572_v58 = vrot.slane %v570_v7, 5  ;;  %v647_v5 = vshrl.u32 %v3216_v18, 16 }
  0x54   : > { %v467_v25 = vsel %vm2978_vm4, %v462_v20, %v466_v27  ;;  %v477_v17 = vsel %vm2978_vm4, %v472_v21, %v476_v39  ;;  %2571 = vmatmul.msk.bf16.gmra.mxu0 %vm723_vm3, %v3219_v23  ;;  %v650_v27 = vshll.u32 %v3216_v18, 16  ;;  %v656_v6 = vshll.u32 %v3222_v63, 16  ;;  %v3238_v39 = vld [vmem:[%s2948_s30 + $0x24] sm:$0xf] }
  0x55   : > { %v685_v15 = vunpack.c.l.b16 %v467_v25  ;;  %v686_v46 = vunpack.c.l.b16 %v477_v17  ;;  %v558_v62 = vrot.slane %v557_v52, 4  ;;  %v567_v55 = vor.u32 %v566_v34, %v562_v24  ;;  %v3246_v52 = vld [vmem:[%s2948_s30 + $0x28] sm:$0xf] }
  0x56   : > { %v649_v59 = vrot.slane %v647_v5, 4  ;;  %v660_v7 = vshrl.u32 %v3222_v63, 16  ;;  %v666_v25 = vshll.u32 %v3229_v61, 16  ;;  %v652_v17 = vrot.slane %v650_v27, 5 }
  0x57   : > { %v3240_v32 = vpack.c.b16 %v686_v46, %v685_v15  ;;  %v563_v20 = vsel %vm2978_vm4, %v558_v62, %v562_v24  ;;  %v568_v21 = vrot.slane %v567_v55, 4  ;;  %v658_v5 = vrot.slane %v656_v6, 5 }
  0x58   : > { %v693_v34 = vunpack.c.l.b16 %v563_v20  ;;  %v662_v18 = vrot.slane %v660_v7, 4  ;;  %v1109_v63 = vrot.slane %v3000_v10, 5  ;;  %v668_v24 = vrot.slane %v666_v25, 5 }
  0x59   : > { %4189 = vst [vmem:[#allocation14_spill] sm:$0xff] %v3240_v32  ;;  %2576 = vmatmul.msk.bf16.gmra.mxu1 %vm723_vm3, %v3240_v32  ;;  %v573_v15 = vsel %vm2978_vm4, %v568_v21, %v572_v58  ;;  %v359_v46 = vshrl.u32 %v3238_v39, 16  ;;  %v653_v55 = vor.u32 %v652_v17, %v649_v59  ;;  %v362_v27 = vshll.u32 %v3238_v39, 16  ;;  %v1872_v21 = vld [vmem:[%s4131_s1 + $0xc] sm:$0x3] }
  0x5a   : > { %v694_v62 = vunpack.c.l.b16 %v573_v15  ;;  %v663_v61 = vor.u32 %v662_v18, %v658_v5  ;;  %v368_v7 = vshll.u32 %v3246_v52, 16  ;;  %v372_v20 = vshrl.u32 %v3246_v52, 16  ;;  %v2029_v17 = vld [vmem:[%s4131_s1 + $0xc] sm:$0xc] }
  0x5b   : > { %v361_v6 = vrot.slane %v359_v46, 4  ;;  %v378_v10 = vshll.u32 %v3249_v16, 16  ;;  %v654_v42 = vrot.slane %v653_v55, 4  ;;  %v364_v58 = vrot.slane %v362_v27, 5  ;;  %v1737_v46 = vld [vmem:[%s4131_s1 + $0x8] sm:$0xc] }
  0x5c   : > { %v3261_v40 = vpack.c.b16 %v694_v62, %v693_v34  ;;  %v664_v56 = vrot.slane %v663_v61, 4  ;;  %v370_v59 = vrot.slane %v368_v7, 5  ;;  %v374_v18 = vrot.slane %v372_v20, 4  ;;  %v2172_v62 = vld [vmem:[%s4131_s1 + $0x10] sm:$0x3] }
  0x5d   : > { %v380_v25 = vrot.slane %v378_v10, 5  ;;  %v659_v34 = vsel %vm2978_vm4, %v654_v42, %v658_v5  ;;  %v365_v15 = vor.u32 %v364_v58, %v361_v6  ;;  %v2665_v42 = vrot.slane %v2988_v0, 9 }
  0x5e   : > { %4190 = vst [vmem:[#allocation15_spill] sm:$0xff] %v3261_v40  ;;  %2580 = vmatmul.msk.bf16.gmra.mxu2 %vm723_vm3, %v3261_v40  ;;  %v669_v61 = vsel %vm2978_vm4, %v664_v56, %v668_v24  ;;  %v701_v55 = vunpack.c.l.b16 %v659_v34  ;;  %v375_v7 = vor.u32 %v374_v18, %v370_v59  ;;  %v1106_v5 = vrot.slane %v2995_v4, 5 }
  0x5f   : > { %v702_v27 = vunpack.c.l.b16 %v669_v61  ;;  %v366_v56 = vrot.slane %v365_v15, 4  ;;  %v1882_v24 = vsel %vm772_vm0, %v1872_v21, 0  ;;  %v2034_v6 = vunpack.c.l.b16 %v2029_v17 }
  0x60   : > { %v376_v58 = vrot.slane %v375_v7, 4  ;;  %1891 = vmatpush.bf16.msra.mxu2 %v1882_v24  ;;  %v1742_v40 = vunpack.c.l.b16 %v1737_v46  ;;  %v2180_v18 = vsel %vm772_vm0, %v2172_v62, 0  ;;  %v1107_v0 = vsel %vm3281_vm7, %v2665_v42, %v1106_v5  ;;  %v2806_v7 = vld [vmem:[%s2948_s30] sm:$0xff] }
  0x61   : > { %v3288_v10 = vpack.c.b16 %v702_v27, %v701_v55  ;;  %v371_v34 = vsel %vm2978_vm4, %v366_v56, %v370_v59  ;;  %v1108_v61 = vrot.slane %v1106_v5, 4  ;;  %v2035_v15 = vpack.c.b16 %v2034_v6, %v2034_v6  ;;  %2189 = vmatpush.bf16.msra.mxu0 %v2180_v18 }
  0x62   : > { %v381_v4 = vsel %vm2978_vm4, %v376_v58, %v380_v25  ;;  %v677_v21 = vunpack.c.l.b16 %v371_v34  ;;  %v1217_v17 = vunpack.c.l.b16 %v1107_v0  ;;  %v1743_v46 = vpack.c.b16 %v1742_v40, %v1742_v40  ;;  %v2807_v0 = vld [vmem:[%s2948_s30 + $0xc] sm:$0xff] }
  0x63   : > { %2584 = vmatmul.msk.bf16.gmra.mxu3 %vm723_vm3, %v3288_v10  ;;  %v678_v55 = vunpack.c.l.b16 %v381_v4  ;;  %v1110_v62 = vsel %vm3281_vm7, %v1108_v61, %v1109_v63  ;;  %v2036_v59 = vrot.slane %v2035_v15, 2  ;;  %v2666_v27 = vrot.slane %v3063_v44, 9  ;;  %v3328_v15 = vld [vmem:[%s2948_s30 + $0x18] sm:$0xff] }
  0x64   : > { %v1218_v42 = vunpack.c.l.b16 %v1110_v62  ;;  %v1744_v56 = vrot.slane %v1743_v46, 2  ;;  %v1113_v5 = vrot.slane %v3070_v48, 5  ;;  %v1116_v24 = vrot.slane %v3073_v49, 5  ;;  %v3348_v62 = vld [vmem:[%s2948_s30 + $0x24] sm:$0xff] }
  0x65   : > { %v3305_v6 = vpack.c.b16 %v678_v55, %v677_v21  ;;  %v2041_v25 = vsel %vm772_vm0, %v2036_v59, 0  ;;  %v1120_v61 = vrot.slane %v3156_v57, 5  ;;  %v2667_v4 = vrot.slane %v3150_v36, 9 }
  0x66   : > { %v1249_v40 = vpack.c.b16 %v1218_v42, %v1217_v17  ;;  %2050 = vmatpush.bf16.msra.mxu3 %v2041_v25  ;;  %v1749_v58 = vsel %vm772_vm0, %v1744_v56, 0  ;;  %v1114_v63 = vsel %vm3281_vm7, %v2666_v27, %v1113_v5  ;;  %v1115_v44 = vrot.slane %v1113_v5, 4  ;;  %v3370_v25 = vld [vmem:[%s2948_s30 + $0x30] sm:$0xff] }
  0x67   : > { %2572 = vmatmul.msk.bf16.gmra.mxu0 %vm723_vm3, %v3305_v6  ;;  %1758 = vmatpush.bf16.msra.mxu1 %v1749_v58  ;;  %v1219_v48 = vunpack.c.l.b16 %v1114_v63  ;;  %v1122_v21 = vrot.slane %v1120_v61, 4  ;;  %v1123_v17 = vrot.slane %v3163_v60, 5  ;;  %v1127_v60 = vrot.slane %v3246_v52, 5 }
  0x68   : > { %v1117_v49 = vsel %vm3281_vm7, %v1115_v44, %v1116_v24  ;;  %v2668_v59 = vrot.slane %v3238_v39, 9  ;;  %v1137_v63 = vrot.slane %v2964_v14, 5 }
  0x69   : > { %2649 = vmatmul.msk.bf16.vlgmr.msrb.gmra.mxu1 %vm723_vm3, %v2806_v7  ;;  %v1220_v18 = vunpack.c.l.b16 %v1117_v49  ;;  %v1124_v57 = vsel %vm3281_vm7, %v1122_v21, %v1123_v17  ;;  %v1129_v27 = vrot.slane %v1127_v60, 4  ;;  %v1130_v7 = vrot.slane %v3249_v16, 5  ;;  %v3398_v21 = vld [vmem:[%s2948_s30 + $0x3c] sm:$0xff] }
  0x6a   : > { %v1222_v55 = vunpack.c.l.b16 %v1124_v57  ;;  %v1128_v42 = vsel %vm3281_vm7, %v2668_v59, %v1127_v60  ;;  %v1134_v16 = vrot.slane %v2960_v12, 5  ;;  %v2670_v17 = vrot.slane %v3012_v26, 9 }
  0x6b   : > { %v3316_v34 = vpack.c.b16 %v1220_v18, %v1219_v48  ;;  %v1131_v52 = vsel %vm3281_vm7, %v1129_v27, %v1130_v7  ;;  %v1223_v56 = vunpack.c.l.b16 %v1128_v42  ;;  %v1144_v57 = vrot.slane %v3024_v35, 5 }
  0x6c   : > { %v1224_v5 = vunpack.c.l.b16 %v1131_v52  ;;  %v1136_v58 = vrot.slane %v1134_v16, 4 }
  0x6e   : > { %2681 = vmatmul.msk.bf16.vlgmr.msrb.gmra.mxu2 %vm723_vm3, %v1249_v40  ;;  %v3362_v39 = vpack.c.b16 %v1224_v5, %v1223_v56  ;;  %v2669_v40 = vrot.slane %v2957_v11, 9  ;;  %v1138_v12 = vsel %vm3281_vm7, %v1136_v58, %v1137_v63  ;;  %v1148_v56 = vrot.slane %v3092_v8, 5 }
  0x6f   : > { %v1226_v49 = vunpack.c.l.b16 %v1138_v12  ;;  %v1151_v63 = vrot.slane %v3097_v19, 5 }
  0x70   : > { %v1135_v44 = vsel %vm3281_vm7, %v2669_v40, %v1134_v16  ;;  %v3432_v16 = vld [vmem:[%s2948_s30 + $0x48] sm:$0xff]  ;;  %v2671_v40 = vrot.slane %v3085_v2, 9  ;;  %v1150_v58 = vrot.slane %v1148_v56, 4 }
  0x71   : > { %v1225_v48 = vunpack.c.l.b16 %v1135_v44  ;;  %4195 = vst [vmem:[#allocation18_spill] sm:$0xff] %v3432_v16 }
  0x72   : > { %v1149_v8 = vsel %vm3281_vm7, %v2671_v40, %v1148_v56  ;;  %v1158_v40 = vrot.slane %v3186_v53, 5 }
  0x73   : > { %2701 = vmatmul.msk.bf16.vlgmr.msrb.gmra.mxu3 %vm723_vm3, %v2807_v0  ;;  %v3390_v14 = vpack.c.b16 %v1226_v49, %v1225_v48  ;;  %v1152_v48 = vsel %vm3281_vm7, %v1150_v58, %v1151_v63  ;;  %v1229_v2 = vunpack.c.l.b16 %v1149_v8 }
  0x77   : > { %2717 = vmatmul.msk.bf16.vlgmr.msrb.gmra.mxu0 %vm723_vm3, %v3131_v9  ;;  %v1121_v9 = vsel %vm3281_vm7, %v2667_v4, %v1120_v61  ;;  %v1141_v61 = vrot.slane %v3019_v31, 5 }
  0x78   : > { %v1221_v46 = vunpack.c.l.b16 %v1121_v9 }
  0x79   : > { %2650 = vmatmul.msk.bf16.gmra.mxu1 %vm723_vm3, %v2807_v0  ;;  %v1143_v9 = vrot.slane %v1141_v61, 4  ;;  %v1142_v31 = vsel %vm3281_vm7, %v2670_v17, %v1141_v61  ;;  %v1230_v61 = vunpack.c.l.b16 %v1152_v48 }
  0x7a   : > { %v3342_v36 = vpack.c.b16 %v1222_v55, %v1221_v46  ;;  %v1227_v27 = vunpack.c.l.b16 %v1142_v31 }
  0x7b   : > { %v1145_v60 = vsel %vm3281_vm7, %v1143_v9, %v1144_v57  ;;  %v3456_v9 = vpack.c.b16 %v1230_v61, %v1229_v2  ;;  %v1155_v57 = vrot.slane %v3178_v33, 5 }
  0x7c   : > { %v1228_v35 = vunpack.c.l.b16 %v1145_v60 }
  0x7d   : > { %4198 = vst [vmem:[#allocation21_spill] sm:$0xff] %v3456_v9  ;;  %v1157_v56 = vrot.slane %v1155_v57, 4 }
  0x7e   : > { %2682 = vmatmul.msk.bf16.gmra.mxu2 %vm723_vm3, %v3316_v34  ;;  %v3422_v42 = vpack.c.b16 %v1228_v35, %v1227_v27  ;;  %v3466_v27 = vld [vmem:[%s2948_s30 + $0x54] sm:$0xff]  ;;  %v2672_v35 = vrot.slane %v3169_v13, 9 }
  0x7f   : > { %4199 = vst [vmem:[#allocation22_spill] sm:$0xff] %v3466_v27  ;;  %v1159_v8 = vsel %vm3281_vm7, %v1157_v56, %v1158_v40 }
  0x80   : > { %v1156_v33 = vsel %vm3281_vm7, %v2672_v35, %v1155_v57  ;;  %v1232_v53 = vunpack.c.l.b16 %v1159_v8  ;;  %v2854_v35 = vld [vmem:[%s2948_s30 + $0x64] sm:$0xf]  ;;  %v2855_v8 = vld [vmem:[%s2948_s30 + $0x68] sm:$0x1] }
  0x81   : > { %v1231_v48 = vunpack.c.l.b16 %v1156_v33  ;;  %v1162_v56 = vrot.slane %v2854_v35, 5 }
  0x83   : > { %2702 = vmatmul.msk.bf16.gmra.mxu3 %vm723_vm3, %v3328_v15  ;;  %v3488_v61 = vpack.c.b16 %v1232_v53, %v1231_v48 }
  0x85   : > { %4201 = vst [vmem:[#allocation24_spill] sm:$0xff] %v3488_v61 }
  0x87   : > { %2718 = vmatmul.msk.bf16.gmra.mxu0 %vm723_vm3, %v3219_v23 }
  0x89   : > { %2651 = vmatmul.msk.bf16.gmra.mxu1 %vm723_vm3, %v3328_v15 }
  0x8e   : > { %2683 = vmatmul.msk.bf16.gmra.mxu2 %vm723_vm3, %v3342_v36 }
  0x93   : > { %2703 = vmatmul.msk.bf16.gmra.mxu3 %vm723_vm3, %v3348_v62 }
  0x97   : > { %2719 = vmatmul.msk.bf16.gmra.mxu0 %vm723_vm3, %v3305_v6 }
  0x99   : > { %2652 = vmatmul.msk.bf16.gmra.mxu1 %vm723_vm3, %v3348_v62 }
  0x9e   : > { %v3365_v24 = vpop.f32.mrf.mxu1  ;;  %2684 = vmatmul.msk.bf16.gmra.mxu2 %vm723_vm3, %v3362_v39 }
  0xa3   : > { %2704 = vmatmul.msk.bf16.gmra.mxu3 %vm723_vm3, %v3370_v25 }
  0xa6   : > { %v3382_v0 = vpop.f32.mrf.mxu1 }
  0xa7   : > { %v3380_v18 = vpop.f32.mrf.mxu2  ;;  %2720 = vmatmul.msk.bf16.gmra.mxu0 %vm723_vm3, %v2990_v1 }
  0xa9   : > { %2653 = vmatmul.msk.bf16.gmra.mxu1 %vm723_vm3, %v3370_v25 }
  0xab   : > { %v3388_v11 = vpop.f32.mrf.mxu0  ;;  %v3393_v4 = vpop.f32.mrf.mxu3 }
  0xac   : > { %4193 = vst [vmem:[#allocation16_spill] sm:$0xff] %v3393_v4 }
  0xae   : > { %2685 = vmatmul.msk.bf16.gmra.mxu2 %vm723_vm3, %v3390_v14 }
  0xaf   : > { %v3402_v46 = vpop.f32.mrf.mxu2 }
  0xb0   : > { %v3404_v55 = vpop.f32.mrf.mxu1 }
  0xb3   : > { %2705 = vmatmul.msk.bf16.gmra.mxu3 %vm723_vm3, %v3398_v21  ;;  %v3412_v59 = vpop.f32.mrf.mxu0  ;;  %v3414_v26 = vpop.f32.mrf.mxu3 }
  0xb4   : > { %4194 = vst [vmem:[#allocation17_spill] sm:$0xff] %v3414_v26 }
  0xb7   : > { %2721 = vmatmul.msk.bf16.gmra.mxu0 %vm723_vm3, %v3065_v45 }
  0xb8   : > { %v3418_v7 = vpop.f32.mrf.mxu1 }
  0xb9   : > { %2654 = vmatmul.msk.bf16.gmra.mxu1 %vm723_vm3, %v3398_v21 }
  0xbb   : > { %v3424_v52 = vpop.f32.mrf.mxu2 }
  0xbe   : > { %v3427_v5 = vpop.f32.mrf.mxu0  ;;  %2686 = vmatmul.msk.bf16.gmra.mxu2 %vm723_vm3, %v3422_v42 }
  0xc0   : > { %v3436_v44 = vpop.f32.mrf.mxu3 }
  0xc1   : > { %4196 = vst [vmem:[#allocation19_spill] sm:$0xff] %v3436_v44 }
  0xc2   : > { %v3438_v12 = vpop.f32.mrf.mxu1 }
  0xc3   : > { %2706 = vmatmul.msk.bf16.gmra.mxu3 %vm723_vm3, %v3432_v16  ;;  %v3446_v49 = vpop.f32.mrf.mxu2 }
  0xc6   : > { %v3450_v19 = vpop.f32.mrf.mxu0 }
  0xc7   : > { %2722 = vmatmul.msk.bf16.gmra.mxu0 %vm723_vm3, %v3152_v37 }
  0xc8   : > { %v3452_v17 = vpop.f32.mrf.mxu3 }
  0xc9   : > { %4197 = vst [vmem:[#allocation20_spill] sm:$0xff] %v3452_v17  ;;  %2655 = vmatmul.msk.bf16.gmra.mxu1 %vm723_vm3, %v3432_v16  ;;  %v3501_v17 = vld [vmem:[%s2948_s30 + $0x60] sm:$0xff] }
  0xca   : > { %v3459_v31 = vpop.f32.mrf.mxu1  ;;  %4203 = vst [vmem:[#allocation26_spill] sm:$0xff] %v3501_v17 }
  0xce   : > { %2687 = vmatmul.msk.bf16.gmra.mxu2 %vm723_vm3, %v3456_v9  ;;  %v3463_v60 = vpop.f32.mrf.mxu2 }
  0xd1   : > { %v3470_v58 = vpop.f32.mrf.mxu0 }
  0xd2   : > { %v3472_v63 = vpop.f32.mrf.mxu3 }
  0xd3   : > { %4200 = vst [vmem:[#allocation23_spill] sm:$0xff] %v3472_v63  ;;  %2707 = vmatmul.msk.bf16.gmra.mxu3 %vm723_vm3, %v3466_v27  ;;  %v1165_v63 = vrot.slane %v2855_v8, 5 }
  0xd6   : > { %v3480_v13 = vpop.f32.mrf.mxu1  ;;  %v3482_v2 = vpop.f32.mrf.mxu2 }
  0xd7   : > { %2723 = vmatmul.msk.bf16.gmra.mxu0 %vm723_vm3, %v3240_v32  ;;  %v2856_v32 = vld [vmem:[%s2948_s30 + $0x60] sm:$0xf] }
  0xd8   : > { %v2673_v44 = vrot.slane %v2856_v32, 9 }
  0xd9   : > { %2656 = vmatmul.msk.bf16.gmra.mxu1 %vm723_vm3, %v3466_v27  ;;  %v3490_v57 = vpop.f32.mrf.mxu0  ;;  %v1164_v27 = vrot.slane %v1162_v56, 4 }
  0xda   : > { %v3493_v40 = vpop.f32.mrf.mxu3  ;;  %v1163_v53 = vsel %vm3281_vm7, %v2673_v44, %v1162_v56 }
  0xdb   : > { %4202 = vst [vmem:[#allocation25_spill] sm:$0xff] %v3493_v40  ;;  %v1166_v35 = vsel %vm3281_vm7, %v1164_v27, %v1165_v63  ;;  %v1233_v26 = vunpack.c.l.b16 %v1163_v53  ;;  %v1169_v27 = vrot.slane %v3038_v50, 5  ;;  %v3534_v53 = vld [vmem:[%s2948_s30 + $0x6c] sm:$0xff] }
  0xdc   : > { %v1234_v32 = vunpack.c.l.b16 %v1166_v35 }
  0xde   : > { %2688 = vmatmul.msk.bf16.gmra.mxu2 %vm723_vm3, %v3488_v61  ;;  %v3497_v33 = vpop.f32.mrf.mxu1  ;;  %v3523_v44 = vpack.c.b16 %v1234_v32, %v1233_v26  ;;  %v1171_v26 = vrot.slane %v1169_v27, 4 }
  0xe0   : > { %4205 = vst [vmem:[#allocation28_spill] sm:$0xff] %v3523_v44 }
  0xe1   : > { %v3504_v48 = vpop.f32.mrf.mxu2 }
  0xe3   : > { %2708 = vmatmul.msk.bf16.gmra.mxu3 %vm723_vm3, %v3501_v17 }
  0xe4   : > { %v3512_v40 = vpop.f32.mrf.mxu0 }
  0xe6   : > { %v3514_v8 = vpop.f32.mrf.mxu3  ;;  %v1005_v61 = vpop.f32.mrf.mxu1 }
  0xe7   : > { %4204 = vst [vmem:[#allocation27_spill] sm:$0xff] %v3514_v8  ;;  %v1006_v9 = vadd.f32 %v1005_v61, %v3388_v11  ;;  %2724 = vmatmul.msk.bf16.gmra.mxu0 %vm723_vm3, %v3008_v22  ;;  %v1172_v61 = vrot.slane %v3045_v54, 5  ;;  %v2674_v8 = vrot.slane %v3029_v41, 9 }
  0xe9   : > { %v3519_v37 = vpop.f32.mrf.mxu2  ;;  %2657 = vmatmul.msk.bf16.gmra.mxu1 %vm723_vm3, %v3501_v17  ;;  %v1170_v50 = vsel %vm3281_vm7, %v2674_v8, %v1169_v27 }
  0xea   : > { %v1235_v4 = vunpack.c.l.b16 %v1170_v50 }
  0xec   : > { %v3526_v63 = vpop.f32.mrf.mxu0 }
  0xee   : > { %v3528_v56 = vpop.f32.mrf.mxu3  ;;  %2689 = vmatmul.msk.bf16.gmra.mxu2 %vm723_vm3, %v3523_v44  ;;  %v1007_v11 = vpop.f32.mrf.mxu1 }
  0xef   : > { %4206 = vst [vmem:[#allocation29_spill] sm:$0xff] %v3528_v56  ;;  %v1008_v35 = vadd.f32 %v1007_v11, %v3412_v59  ;;  %v1173_v56 = vsel %vm3281_vm7, %v1171_v26, %v1172_v61  ;;  %v1176_v61 = vrot.slane %v3114_v47, 5 }
  0xf0   : > { %v1236_v16 = vunpack.c.l.b16 %v1173_v56  ;;  %v1179_v56 = vrot.slane %v3117_v51, 5 }
  0xf1   : > { %v1325_v32 = vpop.f32.mrf.mxu2 }
  0xf2   : > { %v1405_v22 = vadd.f32 %v1325_v32, %v1006_v9  ;;  %v3551_v11 = vpack.c.b16 %v1236_v16, %v1235_v4  ;;  %v3558_v32 = vld [vmem:[%s2948_s30 + $0x78] sm:$0xff] }
  0xf3   : > { %2709 = vmatmul.msk.bf16.gmra.mxu3 %vm723_vm3, %v3534_v53 }
  0xf4   : > { %v1617_v44 = vpop.f32.mrf.mxu0 }
  0xf6   : > { %v1462_v54 = vpop.f32.mrf.mxu3  ;;  %v1010_v17 = vpop.f32.mrf.mxu1 }
  0xf7   : > { %v1542_v59 = vadd.f32 %v1462_v54, %v1405_v22  ;;  %v1011_v41 = vadd.f32 %v1010_v17, %v3427_v5  ;;  %2725 = vmatmul.msk.bf16.gmra.mxu0 %vm723_vm3, %v3087_v3 }
  0xf9   : > { %v1327_v9 = vpop.f32.mrf.mxu2  ;;  %2658 = vmatmul.msk.bf16.gmra.mxu1 %vm723_vm3, %v3534_v53  ;;  %v3549_v8 = vadd.f32 %v1617_v44, %v1542_v59  ;;  %v2675_v44 = vrot.slane %v3106_v28, 9 }
  0xfa   : > { %v1406_v27 = vadd.f32 %v1327_v9, %v1008_v35  ;;  %v1178_v35 = vrot.slane %v1176_v61, 4 }
  0xfb   : > { %v1177_v51 = vsel %vm3281_vm7, %v2675_v44, %v1176_v61 }
  0xfc   : > { %v1619_v26 = vpop.f32.mrf.mxu0  ;;  %v1180_v54 = vsel %vm3281_vm7, %v1178_v35, %v1179_v56  ;;  %v1186_v35 = vrot.slane %v3208_v43, 5 }
  0xfe   : > { %v1464_v22 = vpop.f32.mrf.mxu3  ;;  %2690 = vmatmul.msk.bf16.gmra.mxu2 %vm723_vm3, %v3551_v11  ;;  %v1012_v5 = vpop.f32.mrf.mxu1 }
  0xff   : > { %v1543_v17 = vadd.f32 %v1464_v22, %v1406_v27  ;;  %v1013_v50 = vadd.f32 %v1012_v5, %v3450_v19  ;;  %v1237_v19 = vunpack.c.l.b16 %v1177_v51  ;;  %v1238_v22 = vunpack.c.l.b16 %v1180_v54  ;;  %v3584_v51 = vld [vmem:[%s2948_s30 + $0x84] sm:$0xff] }
 0x101   : > { %v1330_v4 = vpop.f32.mrf.mxu2  ;;  %v3562_v16 = vadd.f32 %v1619_v26, %v1543_v17  ;;  %v3577_v56 = vpack.c.b16 %v1238_v22, %v1237_v19  ;;  %v1183_v17 = vrot.slane %v3201_v30, 5 }
 0x102   : > { %v1407_v47 = vadd.f32 %v1330_v4, %v1011_v41 }
 0x103   : > { %2710 = vmatmul.msk.bf16.gmra.mxu3 %vm723_vm3, %v3558_v32 }
 0x104   : > { %v1622_v59 = vpop.f32.mrf.mxu0 }
 0x106   : > { %v1467_v9 = vpop.f32.mrf.mxu3  ;;  %v1015_v27 = vpop.f32.mrf.mxu1 }
 0x107   : > { %v1544_v28 = vadd.f32 %v1467_v9, %v1407_v47  ;;  %v1016_v26 = vadd.f32 %v1015_v27, %v3470_v58  ;;  %2726 = vmatmul.msk.bf16.gmra.mxu0 %vm723_vm3, %v3175_v29 }
 0x109   : > { %v1332_v41 = vpop.f32.mrf.mxu2  ;;  %2659 = vmatmul.msk.bf16.gmra.mxu1 %vm723_vm3, %v3558_v32  ;;  %v3575_v61 = vadd.f32 %v1622_v59, %v1544_v28  ;;  %v4207_v59 = vld [vmem:[#allocation9_spill] sm:$0xff] }
 0x10a   : > { %v1408_v5 = vadd.f32 %v1332_v41, %v1013_v50  ;;  %v2676_v9 = vrot.slane %v4207_v59, 9  ;;  %v1185_v50 = vrot.slane %v1183_v17, 4 }
 0x10c   : > { %v1624_v44 = vpop.f32.mrf.mxu0  ;;  %v1184_v43 = vsel %vm3281_vm7, %v2676_v9, %v1183_v17  ;;  %v1187_v22 = vsel %vm3281_vm7, %v1185_v50, %v1186_v35  ;;  %v2857_v9 = vld [vmem:[%s2948_s30 + $0x94] sm:$0xf] }
 0x10d   : > { %v1190_v50 = vrot.slane %v2857_v9, 5 }
 0x10e   : > { %v1469_v4 = vpop.f32.mrf.mxu3  ;;  %2691 = vmatmul.msk.bf16.gmra.mxu2 %vm723_vm3, %v3577_v56  ;;  %v1017_v58 = vpop.f32.mrf.mxu1 }
 0x10f   : > { %v1545_v47 = vadd.f32 %v1469_v4, %v1408_v5  ;;  %v1018_v54 = vadd.f32 %v1017_v58, %v3490_v57  ;;  %v1239_v5 = vunpack.c.l.b16 %v1184_v43  ;;  %v1240_v4 = vunpack.c.l.b16 %v1187_v22 }
 0x111   : > { %v1335_v27 = vpop.f32.mrf.mxu2  ;;  %v3588_v19 = vadd.f32 %v1624_v44, %v1545_v47  ;;  %v3603_v59 = vpack.c.b16 %v1240_v4, %v1239_v5 }
 0x112   : > { %v1409_v30 = vadd.f32 %v1335_v27, %v1016_v26  ;;  %v4209_v26 = vld [vmem:[#allocation15_spill] sm:$0xff] }
 0x113   : > { %4208 = vst [vmem:[#allocation9_spill] sm:$0xff] %v3588_v19  ;;  %2711 = vmatmul.msk.bf16.gmra.mxu3 %vm723_vm3, %v3584_v51 }
 0x114   : > { %v1627_v28 = vpop.f32.mrf.mxu0  ;;  %4211 = vst [vmem:[#allocation31_spill] sm:$0xff] %v3603_v59 }
 0x116   : > { %v1472_v57 = vpop.f32.mrf.mxu3  ;;  %v1020_v41 = vpop.f32.mrf.mxu1 }
 0x117   : > { %v1546_v58 = vadd.f32 %v1472_v57, %v1409_v30  ;;  %v1021_v44 = vadd.f32 %v1020_v41, %v3512_v40  ;;  %2727 = vmatmul.msk.bf16.gmra.mxu0 %vm723_vm3, %v4209_v26  ;;  %v2858_v30 = vld [vmem:[%s2948_s30 + $0x98] sm:$0x1]  ;;  %v3610_v41 = vld [vmem:[%s2948_s30 + $0x90] sm:$0xff] }
 0x118   : > { %v1193_v43 = vrot.slane %v2858_v30, 5  ;;  %4212 = vst [vmem:[#allocation32_spill] sm:$0xff] %v3610_v41 }
 0x119   : > { %v1337_v47 = vpop.f32.mrf.mxu2  ;;  %2660 = vmatmul.msk.bf16.gmra.mxu1 %vm723_vm3, %v3584_v51  ;;  %v3601_v17 = vadd.f32 %v1627_v28, %v1546_v58  ;;  %v2859_v28 = vld [vmem:[%s2948_s30 + $0x90] sm:$0xf] }
 0x11a   : > { %v1410_v35 = vadd.f32 %v1337_v47, %v1018_v54  ;;  %v2677_v58 = vrot.slane %v2859_v28, 9  ;;  %v1192_v54 = vrot.slane %v1190_v50, 4 }
 0x11b   : > { %4210 = vst [vmem:[#allocation30_spill] sm:$0xff] %v3601_v17 }
 0x11c   : > { %v1629_v27 = vpop.f32.mrf.mxu0  ;;  %v1191_v9 = vsel %vm3281_vm7, %v2677_v58, %v1190_v50  ;;  %v2860_v58 = vld [vmem:[%s2948_s30 + $0xa0] sm:$0xf] }
 0x11e   : > { %v1474_v40 = vpop.f32.mrf.mxu3  ;;  %2692 = vmatmul.msk.bf16.gmra.mxu2 %vm723_vm3, %v3603_v59  ;;  %v1022_v22 = vpop.f32.mrf.mxu1  ;;  %v2862_v59 = vld [vmem:[%s2948_s30 + $0x9c] sm:$0xf] }
 0x11f   : > { %v1547_v57 = vadd.f32 %v1474_v40, %v1410_v35  ;;  %v1023_v19 = vadd.f32 %v1022_v22, %v3526_v63  ;;  %v1194_v35 = vsel %vm3281_vm7, %v1192_v54, %v1193_v43  ;;  %v1241_v22 = vunpack.c.l.b16 %v1191_v9 }
 0x120   : > { %v1242_v28 = vunpack.c.l.b16 %v1194_v35  ;;  %v1197_v54 = vrot.slane %v2860_v58, 5  ;;  %v2861_v35 = vld [vmem:[%s2948_s30 + $0xa4] sm:$0x1] }
 0x121   : > { %v1340_v5 = vpop.f32.mrf.mxu2  ;;  %v3614_v4 = vadd.f32 %v1629_v27, %v1547_v57  ;;  %v4214_v27 = vld [vmem:[#allocation3_spill] sm:$0xff] }
 0x122   : > { %v1411_v47 = vadd.f32 %v1340_v5, %v1021_v44  ;;  %v3628_v43 = vpack.c.b16 %v1242_v28, %v1241_v22 }
 0x123   : > { %4213 = vst [vmem:[#allocation33_spill] sm:$0xff] %v3614_v4  ;;  %2712 = vmatmul.msk.bf16.gmra.mxu3 %vm723_vm3, %v3610_v41 }
 0x124   : > { %v1632_v30 = vpop.f32.mrf.mxu0  ;;  %4216 = vst [vmem:[#allocation35_spill] sm:$0xff] %v3628_v43 }
 0x126   : > { %v1477_v40 = vpop.f32.mrf.mxu3  ;;  %v1025_v63 = vpop.f32.mrf.mxu1 }
 0x127   : > { %v1548_v17 = vadd.f32 %v1477_v40, %v1411_v47  ;;  %2728 = vmatmul.msk.bf16.gmra.mxu0 %vm723_vm3, %v4214_v27  ;;  %v1200_v40 = vrot.slane %v2861_v35, 5  ;;  %v3635_v27 = vld [vmem:[%s2948_s30 + $0x9c] sm:$0xff] }
 0x128   : > { %4217 = vst [vmem:[#allocation36_spill] sm:$0xff] %v3635_v27 }
 0x129   : > { %v1342_v44 = vpop.f32.mrf.mxu2  ;;  %2661 = vmatmul.msk.bf16.gmra.mxu1 %vm723_vm3, %v3610_v41  ;;  %v3626_v50 = vadd.f32 %v1632_v30, %v1548_v17  ;;  %v2678_v41 = vrot.slane %v2862_v59, 9  ;;  %v1199_v17 = vrot.slane %v1197_v54, 4 }
 0x12a   : > { %v1412_v57 = vadd.f32 %v1342_v44, %v1023_v19  ;;  %v1026_v19 = vadd.f32 %v1025_v63, %v3365_v24  ;;  %v4219_v63 = vld [vmem:[#allocation4_spill] sm:$0xff] }
 0x12b   : > { %4215 = vst [vmem:[#allocation34_spill] sm:$0xff] %v3626_v50  ;;  %v1198_v44 = vsel %vm3281_vm7, %v2678_v41, %v1197_v54 }
 0x12c   : > { %v1634_v5 = vpop.f32.mrf.mxu0  ;;  %v1243_v59 = vunpack.c.l.b16 %v1198_v44 }
 0x12e   : > { %v1479_v9 = vpop.f32.mrf.mxu3  ;;  %2693 = vmatmul.msk.bf16.gmra.mxu2 %vm723_vm3, %v3628_v43  ;;  %v1027_v47 = vpop.f32.mrf.mxu1 }
 0x12f   : > { %v1549_v4 = vadd.f32 %v1479_v9, %v1412_v57  ;;  %v1201_v57 = vsel %vm3281_vm7, %v1199_v17, %v1200_v40  ;;  %v4222_v17 = vld [vmem:[#allocation6_spill] sm:$0xff] }
 0x130   : > { %v1244_v50 = vunpack.c.l.b16 %v1201_v57  ;;  %v4223_v57 = vld [vmem:[#allocation7_spill] sm:$0xff] }
 0x131   : > { %v1345_v30 = vpop.f32.mrf.mxu2  ;;  %v3639_v22 = vadd.f32 %v1634_v5, %v1549_v4  ;;  %v1028_v4 = vadd.f32 %v1027_v47, %v3382_v0  ;;  %v3661_v47 = vld [vmem:[%s2948_s30 + $0xa8] sm:$0xff] }
 0x132   : > { %v1413_v28 = vadd.f32 %v1345_v30, %v1026_v19  ;;  %v3654_v40 = vpack.c.b16 %v1244_v50, %v1243_v59  ;;  %v1204_v19 = vrot.slane %v4222_v17, 5  ;;  %4224 = vst [vmem:[#allocation6_spill] sm:$0xff] %v3661_v47 }
 0x133   : > { %4218 = vst [vmem:[#allocation37_spill] sm:$0xff] %v3639_v22  ;;  %2713 = vmatmul.msk.bf16.gmra.mxu3 %vm723_vm3, %v3635_v27  ;;  %v4225_v22 = vld [vmem:[#allocation5_spill] sm:$0xff] }
 0x134   : > { %v1637_v58 = vpop.f32.mrf.mxu0  ;;  %4221 = vst [vmem:[#allocation39_spill] sm:$0xff] %v3654_v40 }
 0x136   : > { %v1482_v9 = vpop.f32.mrf.mxu3  ;;  %v1030_v35 = vpop.f32.mrf.mxu1 }
 0x137   : > { %v1550_v24 = vadd.f32 %v1482_v9, %v1413_v28  ;;  %2729 = vmatmul.msk.bf16.gmra.mxu0 %vm723_vm3, %v4219_v63  ;;  %v1207_v9 = vrot.slane %v4223_v57, 5  ;;  %v2679_v63 = vrot.slane %v4225_v22, 9 }
 0x139   : > { %v1347_v5 = vpop.f32.mrf.mxu2  ;;  %2662 = vmatmul.msk.bf16.gmra.mxu1 %vm723_vm3, %v3635_v27  ;;  %v3652_v41 = vadd.f32 %v1637_v58, %v1550_v24  ;;  %v1206_v58 = vrot.slane %v1204_v19, 4  ;;  %v1031_v24 = vadd.f32 %v1030_v35, %v3404_v55 }
 0x13a   : > { %v1414_v54 = vadd.f32 %v1347_v5, %v1028_v4  ;;  %v1205_v5 = vsel %vm3281_vm7, %v2679_v63, %v1204_v19  ;;  %v3679_v63 = vld [vmem:[%s2948_s30 + $0xc0] sm:$0xf] }
 0x13b   : > { %4220 = vst [vmem:[#allocation38_spill] sm:$0xff] %v3652_v41  ;;  %v1245_v57 = vunpack.c.l.b16 %v1205_v5  ;;  %v4227_v41 = vld [vmem:[#allocation10_spill] sm:$0xff]  ;;  %v1575_v5 = vshrl.u32 %v3679_v63, 16 }
 0x13c   : > { %v1639_v30 = vpop.f32.mrf.mxu0  ;;  %4228 = vst [vmem:[#allocation5_spill] sm:$0xff] %v3679_v63 }
 0x13e   : > { %v1484_v44 = vpop.f32.mrf.mxu3  ;;  %2694 = vmatmul.msk.bf16.gmra.mxu2 %vm723_vm3, %v3654_v40  ;;  %v1032_v28 = vpop.f32.mrf.mxu1 }
 0x13f   : > { %v1551_v0 = vadd.f32 %v1484_v44, %v1414_v54  ;;  %v1208_v54 = vsel %vm3281_vm7, %v1206_v58, %v1207_v9 }
 0x140   : > { %v1246_v55 = vunpack.c.l.b16 %v1208_v54 }
 0x141   : > { %v1350_v50 = vpop.f32.mrf.mxu2  ;;  %v3665_v59 = vadd.f32 %v1639_v30, %v1551_v0  ;;  %v1033_v30 = vadd.f32 %v1032_v28, %v3418_v7  ;;  %v1578_v7 = vshll.u32 %v3679_v63, 16 }
 0x142   : > { %v1415_v4 = vadd.f32 %v1350_v50, %v1031_v24  ;;  %v3683_v58 = vpack.c.b16 %v1246_v55, %v1245_v57  ;;  %v3686_v24 = vld [vmem:[%s2948_s30 + $0xc4] sm:$0xf]  ;;  %v4232_v50 = vld [vmem:[#allocation12_spill] sm:$0xff]  ;;  %v4233_v57 = vld [vmem:[#allocation13_spill] sm:$0xff] }
 0x143   : > { %4226 = vst [vmem:[#allocation7_spill] sm:$0xff] %v3665_v59  ;;  %2714 = vmatmul.msk.bf16.gmra.mxu3 %vm723_vm3, %v3661_v47  ;;  %v1584_v28 = vshll.u32 %v3686_v24, 16  ;;  %v1214_v55 = vrot.slane %v4233_v57, 5  ;;  %v1580_v40 = vrot.slane %v1578_v7, 5 }
 0x144   : > { %v1642_v17 = vpop.f32.mrf.mxu0  ;;  %4230 = vst [vmem:[#allocation41_spill] sm:$0xff] %v3683_v58 }
 0x145   : > { %4231 = vst [vmem:[#allocation42_spill] sm:$0xff] %v3686_v24 }
 0x146   : > { %v1487_v22 = vpop.f32.mrf.mxu3  ;;  %v1035_v44 = vpop.f32.mrf.mxu1 }
 0x147   : > { %v1552_v35 = vadd.f32 %v1487_v22, %v1415_v4  ;;  %2730 = vmatmul.msk.bf16.gmra.mxu0 %vm723_vm3, %v4227_v41  ;;  %v1211_v4 = vrot.slane %v4232_v50, 5  ;;  %v1588_v22 = vshrl.u32 %v3686_v24, 16  ;;  %v1036_v63 = vadd.f32 %v1035_v44, %v3438_v12 }
 0x148   : > { %v1577_v41 = vrot.slane %v1575_v5, 4  ;;  %v1586_v24 = vrot.slane %v1584_v28, 5 }
 0x149   : > { %v1352_v0 = vpop.f32.mrf.mxu2  ;;  %2663 = vmatmul.msk.bf16.gmra.mxu1 %vm723_vm3, %v3661_v47  ;;  %v3681_v19 = vadd.f32 %v1642_v17, %v1552_v35  ;;  %v1590_v27 = vrot.slane %v1588_v22, 4 }
 0x14a   : > { %v1416_v9 = vadd.f32 %v1352_v0, %v1033_v30  ;;  %v3697_v30 = vld [vmem:[%s2948_s30 + $0xb4] sm:$0xff]  ;;  %v4234_v0 = vld [vmem:[#allocation11_spill] sm:$0xff]  ;;  %v1581_v44 = vor.u32 %v1580_v40, %v1577_v41 }
 0x14b   : > { %4229 = vst [vmem:[#allocation40_spill] sm:$0xff] %v3681_v19  ;;  %v2680_v50 = vrot.slane %v4234_v0, 9  ;;  %v1213_v19 = vrot.slane %v1211_v4, 4  ;;  %v1591_v5 = vor.u32 %v1590_v27, %v1586_v24 }
 0x14c   : > { %v1644_v54 = vpop.f32.mrf.mxu0 }
 0x14d   : > { %v1592_v41 = vrot.slane %v1591_v5, 4 }
 0x14e   : > { %v1489_v59 = vpop.f32.mrf.mxu3  ;;  %2695 = vmatmul.msk.bf16.gmra.mxu2 %vm723_vm3, %v3683_v58  ;;  %v1037_v17 = vpop.f32.mrf.mxu1  ;;  %v3704_v58 = vld [vmem:[%s2948_s30 + $0xc8] sm:$0x1] }
 0x14f   : > { %v1553_v35 = vadd.f32 %v1489_v59, %v1416_v9  ;;  %v1212_v59 = vsel %vm3281_vm7, %v2680_v50, %v1211_v4  ;;  %v1215_v9 = vsel %vm3281_vm7, %v1213_v19, %v1214_v55  ;;  %v1594_v7 = vshll.u32 %v3704_v58, 16 }
 0x150   : > { %v1247_v22 = vunpack.c.l.b16 %v1212_v59  ;;  %v1038_v57 = vadd.f32 %v1037_v17, %v3459_v31  ;;  %v1582_v19 = vrot.slane %v1581_v44, 4 }
 0x151   : > { %v1355_v47 = vpop.f32.mrf.mxu2  ;;  %v3701_v43 = vadd.f32 %v1644_v54, %v1553_v35  ;;  %v1596_v27 = vrot.slane %v1594_v7, 5 }
 0x152   : > { %v1417_v26 = vadd.f32 %v1355_v47, %v1036_v63  ;;  %v1248_v47 = vunpack.c.l.b16 %v1215_v9  ;;  %v3729_v9 = vld [vmem:[%s2948_s30 + $0xc0] sm:$0xff] }
 0x153   : > { %2715 = vmatmul.msk.bf16.gmra.mxu3 %vm723_vm3, %v3697_v30  ;;  %v1597_v31 = vsel %vm2978_vm4, %v1592_v41, %v1596_v27 }
 0x154   : > { %v1647_v12 = vpop.f32.mrf.mxu0  ;;  %v3720_v35 = vpack.c.b16 %v1248_v47, %v1247_v22  ;;  %v1600_v5 = vunpack.c.l.b16 %v1597_v31 }
 0x156   : > { %v1492_v28 = vpop.f32.mrf.mxu3  ;;  %v1040_v54 = vpop.f32.mrf.mxu1 }
 0x157   : > { %v1554_v63 = vadd.f32 %v1492_v28, %v1417_v26  ;;  %2731 = vmatmul.msk.bf16.gmra.mxu0 %vm723_vm3, %v3288_v10  ;;  %v1587_v26 = vsel %vm2978_vm4, %v1582_v19, %v1586_v24 }
 0x158   : > { %v1599_v44 = vunpack.c.l.b16 %v1587_v26 }
 0x159   : > { %v1357_v4 = vpop.f32.mrf.mxu2  ;;  %2664 = vmatmul.msk.bf16.gmra.mxu1 %vm723_vm3, %v3697_v30  ;;  %v3718_v40 = vadd.f32 %v1647_v12, %v1554_v63  ;;  %v1041_v12 = vadd.f32 %v1040_v54, %v3480_v13 }
 0x15a   : > { %v1418_v55 = vadd.f32 %v1357_v4, %v1038_v57  ;;  %v3736_v24 = vpack.c.b16 %v1600_v5, %v1599_v44 }
 0x15c   : > { %v1649_v0 = vpop.f32.mrf.mxu0 }
 0x15e   : > { %v1494_v17 = vpop.f32.mrf.mxu3  ;;  %2696 = vmatmul.msk.bf16.gmra.mxu2 %vm723_vm3, %v3720_v35  ;;  %v1042_v50 = vpop.f32.mrf.mxu1 }
 0x15f   : > { %v1555_v59 = vadd.f32 %v1494_v17, %v1418_v55  ;;  %v1043_v13 = vadd.f32 %v1042_v50, %v3497_v33 }
 0x161   : > { %v1360_v7 = vpop.f32.mrf.mxu2  ;;  %v3732_v28 = vadd.f32 %v1649_v0, %v1555_v59 }
 0x162   : > { %v1419_v22 = vadd.f32 %v1360_v7, %v1041_v12 }
 0x163   : > { %2716 = vmatmul.msk.bf16.gmra.mxu3 %vm723_vm3, %v3729_v9 }
 0x164   : > { %v1652_v47 = vpop.f32.mrf.mxu0 }
 0x166   : > { %v1497_v63 = vpop.f32.mrf.mxu3  ;;  %v1045_v57 = vpop.f32.mrf.mxu1 }
 0x167   : > { %v1556_v4 = vadd.f32 %v1497_v63, %v1419_v22  ;;  %2732 = vmatmul.msk.bf16.gmra.mxu0 %vm723_vm3, %v3736_v24  ;;  %v1046_v31 = vadd.f32 %v1045_v57, %v3380_v18 }
 0x169   : > { %v1362_v54 = vpop.f32.mrf.mxu2  ;;  %2734 = vmatmul.msk.bf16.vlgmr.msra.gmra.mxu1 %vm723_vm3, %v3316_v34  ;;  %v3743_v19 = vadd.f32 %v1652_v47, %v1556_v4 }
 0x16a   : > { %v1420_v41 = vadd.f32 %v1362_v54, %v1043_v13 }
 0x16c   : > { %v1654_v27 = vpop.f32.mrf.mxu0 }
 0x16e   : > { %v1499_v55 = vpop.f32.mrf.mxu3  ;;  %2754 = vmatmul.msk.bf16.vlgmr.msra.gmra.mxu2 %vm723_vm3, %v3328_v15  ;;  %v1047_v0 = vpop.f32.mrf.mxu1 }
 0x16f   : > { %v1557_v26 = vadd.f32 %v1499_v55, %v1420_v41  ;;  %v1048_v15 = vadd.f32 %v1047_v0, %v3402_v46 }
 0x171   : > { %v1365_v17 = vpop.f32.mrf.mxu2  ;;  %v3748_v59 = vadd.f32 %v1654_v27, %v1557_v26 }
 0x172   : > { %v1421_v33 = vadd.f32 %v1365_v17, %v1046_v31 }
 0x173   : > { %2770 = vmatmul.msk.bf16.vlgmr.msra.gmra.mxu3 %vm723_vm3, %v3219_v23 }
 0x174   : > { %v1657_v34 = vpop.f32.mrf.mxu0 }
 0x176   : > { %v1502_v50 = vpop.f32.mrf.mxu3  ;;  %v1050_v12 = vpop.f32.mrf.mxu1 }
 0x177   : > { %v1558_v44 = vadd.f32 %v1502_v50, %v1421_v33  ;;  %2787 = vmatmul.msk.bf16.vlgmr.msra.gmra.mxu0 %vm723_vm3, %v3342_v36  ;;  %v1051_v57 = vadd.f32 %v1050_v12, %v3424_v52 }
 0x179   : > { %v1367_v5 = vpop.f32.mrf.mxu2  ;;  %2735 = vmatmul.msk.bf16.gmra.mxu1 %vm723_vm3, %v3342_v36  ;;  %v3757_v18 = vadd.f32 %v1657_v34, %v1558_v44 }
 0x17a   : > { %v1422_v7 = vadd.f32 %v1367_v5, %v1048_v15 }
 0x17c   : > { %v1659_v22 = vpop.f32.mrf.mxu0 }
 0x17e   : > { %v1504_v47 = vpop.f32.mrf.mxu3  ;;  %2755 = vmatmul.msk.bf16.gmra.mxu2 %vm723_vm3, %v3348_v62  ;;  %v1052_v23 = vpop.f32.mrf.mxu1 }
 0x17f   : > { %v1559_v63 = vadd.f32 %v1504_v47, %v1422_v7  ;;  %v1053_v62 = vadd.f32 %v1052_v23, %v3446_v49 }
 0x181   : > { %v1370_v4 = vpop.f32.mrf.mxu2  ;;  %v3762_v13 = vadd.f32 %v1659_v22, %v1559_v63 }
 0x182   : > { %v1423_v46 = vadd.f32 %v1370_v4, %v1051_v57 }
 0x183   : > { %2771 = vmatmul.msk.bf16.gmra.mxu3 %vm723_vm3, %v3305_v6 }
 0x184   : > { %v1662_v36 = vpop.f32.mrf.mxu0 }
 0x186   : > { %v1507_v54 = vpop.f32.mrf.mxu3  ;;  %v1055_v41 = vpop.f32.mrf.mxu1 }
 0x187   : > { %v1560_v27 = vadd.f32 %v1507_v54, %v1423_v46  ;;  %2788 = vmatmul.msk.bf16.gmra.mxu0 %vm723_vm3, %v3362_v39  ;;  %v1056_v33 = vadd.f32 %v1055_v41, %v3463_v60 }
 0x189   : > { %v1372_v55 = vpop.f32.mrf.mxu2  ;;  %2736 = vmatmul.msk.bf16.gmra.mxu1 %vm723_vm3, %v3362_v39  ;;  %v3771_v52 = vadd.f32 %v1662_v36, %v1560_v27 }
 0x18a   : > { %v1424_v0 = vadd.f32 %v1372_v55, %v1053_v62 }
 0x18c   : > { %v1664_v26 = vpop.f32.mrf.mxu0 }
 0x18e   : > { %v1509_v31 = vpop.f32.mrf.mxu3  ;;  %2756 = vmatmul.msk.bf16.gmra.mxu2 %vm723_vm3, %v3370_v25  ;;  %v1057_v6 = vpop.f32.mrf.mxu1 }
 0x18f   : > { %v1561_v17 = vadd.f32 %v1509_v31, %v1424_v0  ;;  %v1058_v25 = vadd.f32 %v1057_v6, %v3482_v2  ;;  %v4235_v0 = vld [vmem:[#allocation18_spill] sm:$0xff]  ;;  %v4236_v31 = vld [vmem:[#allocation16_spill] sm:$0xff] }
 0x191   : > { %v1375_v34 = vpop.f32.mrf.mxu2  ;;  %v3776_v50 = vadd.f32 %v1664_v26, %v1561_v17 }
 0x192   : > { %v1425_v49 = vadd.f32 %v1375_v34, %v1056_v33  ;;  %v4237_v34 = vld [vmem:[#allocation8_spill] sm:$0xff] }
 0x193   : > { %2772 = vmatmul.msk.bf16.gmra.mxu3 %vm723_vm3, %v2990_v1 }
 0x194   : > { %v1667_v39 = vpop.f32.mrf.mxu0 }
 0x196   : > { %v1512_v12 = vpop.f32.mrf.mxu3  ;;  %v1060_v44 = vpop.f32.mrf.mxu1 }
 0x197   : > { %v1562_v15 = vadd.f32 %v1512_v12, %v1425_v49  ;;  %2789 = vmatmul.msk.bf16.gmra.mxu0 %vm723_vm3, %v3390_v14  ;;  %v1061_v63 = vadd.f32 %v1060_v44, %v3504_v48  ;;  %v4238_v44 = vld [vmem:[#allocation21_spill] sm:$0xff] }
 0x199   : > { %v1377_v5 = vpop.f32.mrf.mxu2  ;;  %2737 = vmatmul.msk.bf16.gmra.mxu1 %vm723_vm3, %v3390_v14  ;;  %v3785_v60 = vadd.f32 %v1667_v39, %v1562_v15  ;;  %v4239_v15 = vld [vmem:[#allocation17_spill] sm:$0xff] }
 0x19a   : > { %v1426_v7 = vadd.f32 %v1377_v5, %v1058_v25 }
 0x19c   : > { %v1669_v22 = vpop.f32.mrf.mxu0 }
 0x19e   : > { %v1514_v47 = vpop.f32.mrf.mxu3  ;;  %2757 = vmatmul.msk.bf16.gmra.mxu2 %vm723_vm3, %v3398_v21  ;;  %v1062_v1 = vpop.f32.mrf.mxu1 }
 0x19f   : > { %v1563_v23 = vadd.f32 %v1514_v47, %v1426_v7  ;;  %v1063_v21 = vadd.f32 %v1062_v1, %v3519_v37 }
 0x1a1   : > { %v1380_v57 = vpop.f32.mrf.mxu2  ;;  %v3790_v4 = vadd.f32 %v1669_v22, %v1563_v23  ;;  %v4240_v23 = vld [vmem:[#allocation22_spill] sm:$0xff] }
 0x1a2   : > { %v1427_v2 = vadd.f32 %v1380_v57, %v1061_v63 }
 0x1a3   : > { %2773 = vmatmul.msk.bf16.gmra.mxu3 %vm723_vm3, %v3065_v45 }
 0x1a4   : > { %v1672_v14 = vpop.f32.mrf.mxu0 }
 0x1a6   : > { %v1517_v46 = vpop.f32.mrf.mxu3  ;;  %v1065_v36 = vpop.f32.mrf.mxu1 }
 0x1a7   : > { %v1564_v54 = vadd.f32 %v1517_v46, %v1427_v2  ;;  %2790 = vmatmul.msk.bf16.gmra.mxu0 %vm723_vm3, %v3422_v42  ;;  %v1066_v6 = vadd.f32 %v1065_v36, %v4236_v31  ;;  %v4241_v2 = vld [vmem:[#allocation19_spill] sm:$0xff] }
 0x1a9   : > { %v1382_v41 = vpop.f32.mrf.mxu2  ;;  %2738 = vmatmul.msk.bf16.gmra.mxu1 %vm723_vm3, %v3422_v42  ;;  %v3799_v48 = vadd.f32 %v1672_v14, %v1564_v54 }
 0x1aa   : > { %v1428_v27 = vadd.f32 %v1382_v41, %v1063_v21  ;;  %v4242_v21 = vld [vmem:[#allocation14_spill] sm:$0xff] }
 0x1ac   : > { %v1674_v62 = vpop.f32.mrf.mxu0 }
 0x1ae   : > { %v1519_v55 = vpop.f32.mrf.mxu3  ;;  %2758 = vmatmul.msk.bf16.gmra.mxu2 %vm723_vm3, %v4235_v0  ;;  %v1067_v45 = vpop.f32.mrf.mxu1  ;;  %v4243_v0 = vld [vmem:[#allocation24_spill] sm:$0xff] }
 0x1af   : > { %v1565_v26 = vadd.f32 %v1519_v55, %v1428_v27  ;;  %v1068_v25 = vadd.f32 %v1067_v45, %v4239_v15  ;;  %v4244_v45 = vld [vmem:[#allocation20_spill] sm:$0xff] }
 0x1b1   : > { %v1385_v17 = vpop.f32.mrf.mxu2  ;;  %v3804_v33 = vadd.f32 %v1674_v62, %v1565_v26 }
 0x1b2   : > { %v1429_v37 = vadd.f32 %v1385_v17, %v1066_v6 }
 0x1b3   : > { %2774 = vmatmul.msk.bf16.gmra.mxu3 %vm723_vm3, %v4237_v34 }
 0x1b4   : > { %v1677_v42 = vpop.f32.mrf.mxu0 }
 0x1b6   : > { %v1522_v49 = vpop.f32.mrf.mxu3  ;;  %v1070_v39 = vpop.f32.mrf.mxu1 }
 0x1b7   : > { %v1566_v12 = vadd.f32 %v1522_v49, %v1429_v37  ;;  %2791 = vmatmul.msk.bf16.gmra.mxu0 %vm723_vm3, %v4238_v44  ;;  %v1071_v14 = vadd.f32 %v1070_v39, %v4241_v2  ;;  %v4249_v2 = vld [vmem:[#allocation25_spill] sm:$0xff] }
 0x1b9   : > { %v1387_v5 = vpop.f32.mrf.mxu2  ;;  %2739 = vmatmul.msk.bf16.gmra.mxu1 %vm723_vm3, %v4238_v44  ;;  %v3813_v7 = vadd.f32 %v1677_v42, %v1566_v12  ;;  %v4245_v42 = vld [vmem:[#allocation26_spill] sm:$0xff]  ;;  %v4246_v12 = vld [vmem:[#allocation23_spill] sm:$0xff] }
 0x1ba   : > { %v1430_v22 = vadd.f32 %v1387_v5, %v1068_v25 }
 0x1bc   : > { %v1679_v47 = vpop.f32.mrf.mxu0 }
 0x1be   : > { %v1524_v1 = vpop.f32.mrf.mxu3  ;;  %2759 = vmatmul.msk.bf16.gmra.mxu2 %vm723_vm3, %v4240_v23  ;;  %v1072_v63 = vpop.f32.mrf.mxu1 }
 0x1bf   : > { %v1567_v57 = vadd.f32 %v1524_v1, %v1430_v22  ;;  %v1073_v26 = vadd.f32 %v1072_v63, %v4244_v45  ;;  %v4247_v22 = vld [vmem:[#allocation2_spill] sm:$0xff] }
 0x1c1   : > { %v1390_v46 = vpop.f32.mrf.mxu2  ;;  %v3818_v36 = vadd.f32 %v1679_v47, %v1567_v57  ;;  %v4248_v57 = vld [vmem:[#allocation28_spill] sm:$0xff] }
 0x1c2   : > { %v1431_v54 = vadd.f32 %v1390_v46, %v1071_v14 }
 0x1c3   : > { %2775 = vmatmul.msk.bf16.gmra.mxu3 %vm723_vm3, %v4242_v21 }
 0x1c4   : > { %v1682_v41 = vpop.f32.mrf.mxu0 }
 0x1c6   : > { %v1527_v27 = vpop.f32.mrf.mxu3  ;;  %v1075_v62 = vpop.f32.mrf.mxu1 }
 0x1c7   : > { %v1568_v55 = vadd.f32 %v1527_v27, %v1431_v54  ;;  %2792 = vmatmul.msk.bf16.gmra.mxu0 %vm723_vm3, %v4243_v0  ;;  %v1076_v44 = vadd.f32 %v1075_v62, %v4246_v12 }
 0x1c9   : > { %v1392_v31 = vpop.f32.mrf.mxu2  ;;  %2740 = vmatmul.msk.bf16.gmra.mxu1 %vm723_vm3, %v4243_v0  ;;  %v3827_v6 = vadd.f32 %v1682_v41, %v1568_v55  ;;  %v4250_v0 = vld [vmem:[#allocation27_spill] sm:$0xff] }
 0x1ca   : > { %v1432_v17 = vadd.f32 %v1392_v31, %v1073_v26 }
 0x1cc   : > { %v1684_v37 = vpop.f32.mrf.mxu0 }
 0x1ce   : > { %v1529_v34 = vpop.f32.mrf.mxu3  ;;  %2760 = vmatmul.msk.bf16.gmra.mxu2 %vm723_vm3, %v4245_v42  ;;  %v1077_v49 = vpop.f32.mrf.mxu1 }
 0x1cf   : > { %v1569_v39 = vadd.f32 %v1529_v34, %v1432_v17  ;;  %v1078_v14 = vadd.f32 %v1077_v49, %v4249_v2 }
 0x1d1   : > { %v1395_v15 = vpop.f32.mrf.mxu2  ;;  %v3832_v25 = vadd.f32 %v1684_v37, %v1569_v39  ;;  %v4251_v39 = vld [vmem:[#allocation29_spill] sm:$0xff] }
 0x1d2   : > { %v1433_v5 = vadd.f32 %v1395_v15, %v1076_v44 }
 0x1d3   : > { %2776 = vmatmul.msk.bf16.gmra.mxu3 %vm723_vm3, %v4247_v22 }
 0x1d4   : > { %v1687_v47 = vpop.f32.mrf.mxu0 }
 0x1d6   : > { %v1532_v1 = vpop.f32.mrf.mxu3  ;;  %v1080_v23 = vpop.f32.mrf.mxu1 }
 0x1d7   : > { %v1570_v63 = vadd.f32 %v1532_v1, %v1433_v5  ;;  %2793 = vmatmul.msk.bf16.gmra.mxu0 %vm723_vm3, %v4248_v57  ;;  %v1081_v45 = vadd.f32 %v1080_v23, %v4250_v0 }
 0x1d9   : > { %v1397_v46 = vpop.f32.mrf.mxu2  ;;  %2741 = vmatmul.msk.bf16.gmra.mxu1 %vm723_vm3, %v4248_v57  ;;  %v3841_v54 = vadd.f32 %v1687_v47, %v1570_v63 }
 0x1da   : > { %v1434_v21 = vadd.f32 %v1397_v46, %v1078_v14 }
 0x1dc   : > { %v1689_v41 = vpop.f32.mrf.mxu0 }
 0x1de   : > { %v1534_v27 = vpop.f32.mrf.mxu3  ;;  %2761 = vmatmul.msk.bf16.gmra.mxu2 %vm723_vm3, %v3534_v53  ;;  %v1082_v62 = vpop.f32.mrf.mxu1 }
 0x1df   : > { %v1571_v55 = vadd.f32 %v1534_v27, %v1434_v21  ;;  %v1083_v53 = vadd.f32 %v1082_v62, %v4251_v39  ;;  %v3874_v21 = vld [vmem:[%s4133_s3] ss:$0 sm:$0xff] }
 0x1e1   : > { %v1400_v26 = vpop.f32.mrf.mxu2  ;;  %v3846_v31 = vadd.f32 %v1689_v41, %v1571_v55 }
 0x1e2   : > { %v1435_v17 = vadd.f32 %v1400_v26, %v1081_v45 }
 0x1e3   : > { %2777 = vmatmul.msk.bf16.gmra.mxu3 %vm723_vm3, %v3087_v3 }
 0x1e4   : > { %v1692_v37 = vpop.f32.mrf.mxu0 }
 0x1e6   : > { %v1537_v34 = vpop.f32.mrf.mxu3  ;;  %v1760_v42 = vpop.f32.mrf.mxu1 }
 0x1e7   : > { %v1572_v49 = vadd.f32 %v1537_v34, %v1435_v17  ;;  %2794 = vmatmul.msk.bf16.gmra.mxu0 %vm723_vm3, %v3551_v11  ;;  %v1840_v1 = vadd.f32 %v1760_v42, %v3549_v8 }
 0x1e9   : > { %v1402_v12 = vpop.f32.mrf.mxu2  ;;  %2742 = vmatmul.msk.bf16.gmra.mxu1 %vm723_vm3, %v3551_v11  ;;  %v3855_v44 = vadd.f32 %v1692_v37, %v1572_v49  ;;  %v4252_v49 = vld [vmem:[#allocation15_spill] sm:$0xff] }
 0x1ea   : > { %v1436_v15 = vadd.f32 %v1402_v12, %v1083_v53 }
 0x1ec   : > { %v1694_v5 = vpop.f32.mrf.mxu0 }
 0x1ee   : > { %v1539_v22 = vpop.f32.mrf.mxu3  ;;  %2762 = vmatmul.msk.bf16.gmra.mxu2 %vm723_vm3, %v3558_v32  ;;  %v1762_v3 = vpop.f32.mrf.mxu1  ;;  %v3867_v32 = vld [vmem:[%s4132_s2] ss:$0 sm:$0xff] }
 0x1ef   : > { %v1573_v47 = vadd.f32 %v1539_v22, %v1436_v15 }
 0x1f1   : > { %v1893_v23 = vpop.f32.mrf.mxu2  ;;  %v3860_v63 = vadd.f32 %v1694_v5, %v1573_v47  ;;  %v4253_v47 = vld [vmem:[#allocation31_spill] sm:$0xff] }
 0x1f2   : > { %v1973_v11 = vadd.f32 %v1893_v23, %v1840_v1  ;;  %v4254_v23 = vld [vmem:[#allocation9_spill] sm:$0xff] }
 0x1f3   : > { %2778 = vmatmul.msk.bf16.gmra.mxu3 %vm723_vm3, %v3175_v29  ;;  %v1841_v29 = vadd.f32 %v1762_v3, %v3562_v16 }
 0x1f4   : > { %v2191_v57 = vpop.f32.mrf.mxu0 }
 0x1f6   : > { %v2052_v2 = vpop.f32.mrf.mxu3  ;;  %v1765_v14 = vpop.f32.mrf.mxu1 }
 0x1f7   : > { %v2132_v46 = vadd.f32 %v2052_v2, %v1973_v11  ;;  %2795 = vmatmul.msk.bf16.gmra.mxu0 %vm723_vm3, %v3577_v56  ;;  %v1842_v34 = vadd.f32 %v1765_v14, %v3575_v61 }
 0x1f9   : > { %v2271_v8 = vadd.f32 %v2191_v57, %v2132_v46  ;;  %v1895_v41 = vpop.f32.mrf.mxu2  ;;  %2743 = vmatmul.msk.bf16.gmra.mxu1 %vm723_vm3, %v3577_v56 }
 0x1fa   : > { %v1974_v62 = vadd.f32 %v1895_v41, %v1841_v29  ;;  %v4255_v41 = vld [vmem:[#allocation32_spill] sm:$0xff] }
 0x1fb   : > { %v2307_v27 = vmul.f32 %v3867_v32, %v2271_v8 }
 0x1fc   : > { %v2193_v0 = vpop.f32.mrf.mxu0 }
 0x1fd   : > { %v2343_v55 = vadd.f32 %v3874_v21, %v2307_v27 }
 0x1fe   : > { %v2054_v45 = vpop.f32.mrf.mxu3  ;;  %2763 = vmatmul.msk.bf16.gmra.mxu2 %vm723_vm3, %v3584_v51  ;;  %v1767_v26 = vpop.f32.mrf.mxu1 }
 0x1ff   : > { %v2375_v17 = vmax.f32 %v2343_v55, 0.0  ;;  %v2133_v37 = vadd.f32 %v2054_v45, %v1974_v62  ;;  %v1843_v11 = vadd.f32 %v1767_v26, %v4254_v23  ;;  %v4256_v26 = vld [vmem:[#allocation30_spill] sm:$0xff] }
 0x201   : > { %v2407_v16 = vpack.c.bf16 %v2375_v17, %v2375_v17  ;;  %v2272_v56 = vadd.f32 %v2193_v0, %v2133_v37  ;;  %v1898_v42 = vpop.f32.mrf.mxu2 }
 0x202   : > { %v1975_v39 = vadd.f32 %v1898_v42, %v1842_v34 }
 0x203   : > { %2440 = vst.msk [vmem:[%s3887_s26] sm:$0xf] %vm2439_vm8, %v2407_v16  ;;  %v2308_v51 = vmul.f32 %v3867_v32, %v2272_v56  ;;  %2779 = vmatmul.msk.bf16.gmra.mxu3 %vm723_vm3, %v4252_v49  ;;  %v4257_v56 = vld [vmem:[#allocation3_spill] sm:$0xff] }
 0x204   : > { %v2196_v12 = vpop.f32.mrf.mxu0 }
 0x205   : > { %v2344_v53 = vadd.f32 %v3874_v21, %v2308_v51 }
 0x206   : > { %v2057_v15 = vpop.f32.mrf.mxu3  ;;  %v1770_v5 = vpop.f32.mrf.mxu1 }
 0x207   : > { %v2376_v22 = vmax.f32 %v2344_v53, 0.0  ;;  %v2134_v3 = vadd.f32 %v2057_v15, %v1975_v39  ;;  %2796 = vmatmul.msk.bf16.gmra.mxu0 %vm723_vm3, %v4253_v47  ;;  %v1844_v17 = vadd.f32 %v1770_v5, %v4256_v26  ;;  %v4258_v15 = vld [vmem:[#allocation35_spill] sm:$0xff]  ;;  %v4262_v26 = vld [vmem:[#allocation4_spill] sm:$0xff] }
 0x209   : > { %v2408_v61 = vpack.c.bf16 %v2376_v22, %v2376_v22  ;;  %v2273_v1 = vadd.f32 %v2196_v12, %v2134_v3  ;;  %v1900_v57 = vpop.f32.mrf.mxu2  ;;  %2744 = vmatmul.msk.bf16.gmra.mxu1 %vm723_vm3, %v4253_v47  ;;  %v4259_v3 = vld [vmem:[#allocation33_spill] sm:$0xff] }
 0x20a   : > { %v1976_v14 = vadd.f32 %v1900_v57, %v1843_v11 }
 0x20b   : > { %2441 = vst.msk [vmem:[%s3887_s26 + $0x4] sm:$0xf] %vm2439_vm8, %v2408_v61  ;;  %v2309_v2 = vmul.f32 %v3867_v32, %v2273_v1 }
 0x20c   : > { %v2198_v8 = vpop.f32.mrf.mxu0 }
 0x20d   : > { %v2345_v46 = vadd.f32 %v3874_v21, %v2309_v2 }
 0x20e   : > { %v2059_v29 = vpop.f32.mrf.mxu3  ;;  %2764 = vmatmul.msk.bf16.gmra.mxu2 %vm723_vm3, %v4255_v41  ;;  %v1772_v27 = vpop.f32.mrf.mxu1 }
 0x20f   : > { %v2377_v62 = vmax.f32 %v2345_v46, 0.0  ;;  %v2135_v55 = vadd.f32 %v2059_v29, %v1976_v14  ;;  %v1845_v47 = vadd.f32 %v1772_v27, %v4259_v3  ;;  %v4260_v14 = vld [vmem:[#allocation36_spill] sm:$0xff] }
 0x211   : > { %v2409_v0 = vpack.c.bf16 %v2377_v62, %v2377_v62  ;;  %v2274_v45 = vadd.f32 %v2198_v8, %v2135_v55  ;;  %v1903_v37 = vpop.f32.mrf.mxu2  ;;  %v4261_v62 = vld [vmem:[#allocation34_spill] sm:$0xff] }
 0x212   : > { %v1977_v34 = vadd.f32 %v1903_v37, %v1844_v17 }
 0x213   : > { %2442 = vst.msk [vmem:[%s3887_s26 + $0x8] sm:$0xf] %vm2439_vm8, %v2409_v0  ;;  %v2310_v16 = vmul.f32 %v3867_v32, %v2274_v45  ;;  %2780 = vmatmul.msk.bf16.gmra.mxu3 %vm723_vm3, %v4257_v56 }
 0x214   : > { %v2201_v51 = vpop.f32.mrf.mxu0 }
 0x215   : > { %v2346_v42 = vadd.f32 %v3874_v21, %v2310_v16 }
 0x216   : > { %v2062_v49 = vpop.f32.mrf.mxu3  ;;  %v1775_v39 = vpop.f32.mrf.mxu1 }
 0x217   : > { %v2378_v53 = vmax.f32 %v2346_v42, 0.0  ;;  %v2136_v12 = vadd.f32 %v2062_v49, %v1977_v34  ;;  %2797 = vmatmul.msk.bf16.gmra.mxu0 %vm723_vm3, %v4258_v15  ;;  %v1846_v55 = vadd.f32 %v1775_v39, %v4261_v62  ;;  %v4263_v49 = vld [vmem:[#allocation39_spill] sm:$0xff]  ;;  %v4267_v62 = vld [vmem:[#allocation10_spill] sm:$0xff] }
 0x219   : > { %v2410_v5 = vpack.c.bf16 %v2378_v53, %v2378_v53  ;;  %v2275_v22 = vadd.f32 %v2201_v51, %v2136_v12  ;;  %v1905_v61 = vpop.f32.mrf.mxu2  ;;  %2745 = vmatmul.msk.bf16.gmra.mxu1 %vm723_vm3, %v4258_v15  ;;  %v4264_v12 = vld [vmem:[#allocation37_spill] sm:$0xff] }
 0x21a   : > { %v1978_v23 = vadd.f32 %v1905_v61, %v1845_v47 }
 0x21b   : > { %2443 = vst.msk [vmem:[%s3887_s26 + $0xc] sm:$0xf] %vm2439_vm8, %v2410_v5  ;;  %v2311_v1 = vmul.f32 %v3867_v32, %v2275_v22 }
 0x21c   : > { %v2203_v57 = vpop.f32.mrf.mxu0 }
 0x21d   : > { %v2347_v11 = vadd.f32 %v3874_v21, %v2311_v1 }
 0x21e   : > { %v2064_v2 = vpop.f32.mrf.mxu3  ;;  %2765 = vmatmul.msk.bf16.gmra.mxu2 %vm723_vm3, %v4260_v14  ;;  %v1777_v46 = vpop.f32.mrf.mxu1 }
 0x21f   : > { %v2379_v8 = vmax.f32 %v2347_v11, 0.0  ;;  %v2137_v29 = vadd.f32 %v2064_v2, %v1978_v23  ;;  %v1847_v15 = vadd.f32 %v1777_v46, %v4264_v12  ;;  %v4265_v23 = vld [vmem:[#allocation6_spill] sm:$0xff] }
 0x221   : > { %v2411_v41 = vpack.c.bf16 %v2379_v8, %v2379_v8  ;;  %v2276_v27 = vadd.f32 %v2203_v57, %v2137_v29  ;;  %v1908_v0 = vpop.f32.mrf.mxu2  ;;  %v4266_v8 = vld [vmem:[#allocation38_spill] sm:$0xff] }
 0x222   : > { %v1979_v17 = vadd.f32 %v1908_v0, %v1846_v55 }
 0x223   : > { %2444 = vst.msk [vmem:[%s3887_s26 + $0x10] sm:$0xf] %vm2439_vm8, %v2411_v41  ;;  %v2312_v45 = vmul.f32 %v3867_v32, %v2276_v27  ;;  %2781 = vmatmul.msk.bf16.gmra.mxu3 %vm723_vm3, %v4262_v26 }
 0x224   : > { %v2206_v16 = vpop.f32.mrf.mxu0 }
 0x225   : > { %v2348_v37 = vadd.f32 %v3874_v21, %v2312_v45 }
 0x226   : > { %v2067_v56 = vpop.f32.mrf.mxu3  ;;  %v1780_v34 = vpop.f32.mrf.mxu1 }
 0x227   : > { %v2380_v42 = vmax.f32 %v2348_v37, 0.0  ;;  %v2138_v51 = vadd.f32 %v2067_v56, %v1979_v17  ;;  %2798 = vmatmul.msk.bf16.gmra.mxu0 %vm723_vm3, %v4263_v49  ;;  %v1848_v29 = vadd.f32 %v1780_v34, %v4266_v8  ;;  %v4268_v56 = vld [vmem:[#allocation41_spill] sm:$0xff]  ;;  %v4271_v8 = vld [vmem:[#allocation42_spill] sm:$0xff] }
 0x229   : > { %v2412_v39 = vpack.c.bf16 %v2380_v42, %v2380_v42  ;;  %v2277_v53 = vadd.f32 %v2206_v16, %v2138_v51  ;;  %v1910_v5 = vpop.f32.mrf.mxu2  ;;  %2746 = vmatmul.msk.bf16.gmra.mxu1 %vm723_vm3, %v4263_v49  ;;  %v4269_v51 = vld [vmem:[#allocation7_spill] sm:$0xff] }
 0x22a   : > { %v1980_v3 = vadd.f32 %v1910_v5, %v1847_v15 }
 0x22b   : > { %2445 = vst.msk [vmem:[%s3887_s26 + $0x14] sm:$0xf] %vm2439_vm8, %v2412_v39  ;;  %v2313_v22 = vmul.f32 %v3867_v32, %v2277_v53 }
 0x22c   : > { %v2208_v61 = vpop.f32.mrf.mxu0 }
 0x22d   : > { %v2349_v47 = vadd.f32 %v3874_v21, %v2313_v22 }
 0x22e   : > { %v2069_v1 = vpop.f32.mrf.mxu3  ;;  %2766 = vmatmul.msk.bf16.gmra.mxu2 %vm723_vm3, %v4265_v23  ;;  %v1782_v11 = vpop.f32.mrf.mxu1 }
 0x22f   : > { %v2381_v57 = vmax.f32 %v2349_v47, 0.0  ;;  %v2139_v2 = vadd.f32 %v2069_v1, %v1980_v3  ;;  %v1849_v49 = vadd.f32 %v1782_v11, %v4269_v51  ;;  %v4270_v11 = vld [vmem:[#allocation40_spill] sm:$0xff] }
 0x231   : > { %v2413_v14 = vpack.c.bf16 %v2381_v57, %v2381_v57  ;;  %v2278_v46 = vadd.f32 %v2208_v61, %v2139_v2  ;;  %v1913_v41 = vpop.f32.mrf.mxu2 }
 0x232   : > { %v1981_v55 = vadd.f32 %v1913_v41, %v1848_v29  ;;  %v1732_v29 = vrot.slane %v4271_v8, 5 }
 0x233   : > { %2446 = vst.msk [vmem:[%s3887_s26 + $0x18] sm:$0xf] %vm2439_vm8, %v2413_v14  ;;  %v2314_v27 = vmul.f32 %v3867_v32, %v2278_v46  ;;  %2782 = vmatmul.msk.bf16.gmra.mxu3 %vm723_vm3, %v4267_v62  ;;  %v3973_v62 = vld [vmem:[%s2948_s30 + $0xd0] sm:$0xf] }
 0x234   : > { %v2211_v45 = vpop.f32.mrf.mxu0  ;;  %v2019_v51 = vshrl.u32 %v3973_v62, 16 }
 0x235   : > { %v2350_v0 = vadd.f32 %v3874_v21, %v2314_v27  ;;  %v3970_v27 = vld [vmem:[%s2948_s30 + $0xcc] sm:$0xf] }
 0x236   : > { %v2072_v26 = vpop.f32.mrf.mxu3  ;;  %v1785_v17 = vpop.f32.mrf.mxu1 }
 0x237   : > { %v2382_v37 = vmax.f32 %v2350_v0, 0.0  ;;  %v2140_v16 = vadd.f32 %v2072_v26, %v1981_v55  ;;  %2799 = vmatmul.msk.bf16.gmra.mxu0 %vm723_vm3, %v4268_v56  ;;  %v1850_v57 = vadd.f32 %v1785_v17, %v4270_v11 }
 0x239   : > { %v2414_v34 = vpack.c.bf16 %v2382_v37, %v2382_v37  ;;  %v2279_v42 = vadd.f32 %v2211_v45, %v2140_v16  ;;  %v1915_v39 = vpop.f32.mrf.mxu2  ;;  %2747 = vmatmul.msk.bf16.gmra.mxu1 %vm723_vm3, %v4268_v56  ;;  %v4272_v45 = vld [vmem:[#allocation5_spill] sm:$0xff]  ;;  %v1734_v16 = vrot.slane %v1732_v29, 4  ;;  %v2006_v56 = vshrl.u32 %v3970_v27, 16 }
 0x23a   : > { %v1982_v12 = vadd.f32 %v1915_v39, %v1849_v49  ;;  %v2733_v26 = vrot.slane %v4272_v45, 9 }
 0x23b   : > { %2447 = vst.msk [vmem:[%s3887_s26 + $0x1c] sm:$0xf] %vm2439_vm8, %v2414_v34  ;;  %v2315_v53 = vmul.f32 %v3867_v32, %v2279_v42  ;;  %v2009_v34 = vshll.u32 %v3970_v27, 16  ;;  %v2015_v42 = vshll.u32 %v3973_v62, 16 }
 0x23c   : > { %v2213_v5 = vpop.f32.mrf.mxu0 }
 0x23d   : > { %v2351_v15 = vadd.f32 %v3874_v21, %v2315_v53 }
 0x23e   : > { %v2074_v22 = vpop.f32.mrf.mxu3  ;;  %2767 = vmatmul.msk.bf16.gmra.mxu2 %vm723_vm3, %v3697_v30  ;;  %v1787_v3 = vpop.f32.mrf.mxu1 }
 0x23f   : > { %v2383_v47 = vmax.f32 %v2351_v15, 0.0  ;;  %v2141_v61 = vadd.f32 %v2074_v22, %v1982_v12  ;;  %v1851_v53 = vadd.f32 %v1787_v3, %v3701_v43 }
 0x241   : > { %v2415_v1 = vpack.c.bf16 %v2383_v47, %v2383_v47  ;;  %v2280_v23 = vadd.f32 %v2213_v5, %v2141_v61  ;;  %v1918_v2 = vpop.f32.mrf.mxu2  ;;  %v1733_v5 = vsel %vm3281_vm7, %v2733_v26, %v1732_v29  ;;  %v2008_v47 = vrot.slane %v2006_v56, 4 }
 0x242   : > { %v1983_v46 = vadd.f32 %v1918_v2, %v1850_v57  ;;  %v2011_v61 = vrot.slane %v2009_v34, 5 }
 0x243   : > { %2448 = vst.msk [vmem:[%s3887_s26 + $0x20] sm:$0xf] %vm2439_vm8, %v2415_v1  ;;  %v2316_v14 = vmul.f32 %v3867_v32, %v2280_v23  ;;  %2783 = vmatmul.msk.bf16.gmra.mxu3 %vm723_vm3, %v3288_v10  ;;  %v1735_v10 = vrot.slane %v3704_v58, 5  ;;  %v2017_v1 = vrot.slane %v2015_v42, 5  ;;  %v2021_v23 = vrot.slane %v2019_v51, 4 }
 0x244   : > { %v2216_v41 = vpop.f32.mrf.mxu0  ;;  %v2012_v29 = vor.u32 %v2011_v61, %v2008_v47  ;;  %v2167_v42 = vrot.slane %v3973_v62, 5 }
 0x245   : > { %v2352_v30 = vadd.f32 %v3874_v21, %v2316_v14  ;;  %v1736_v22 = vsel %vm3281_vm7, %v1734_v16, %v1735_v10 }
 0x246   : > { %v2077_v55 = vpop.f32.mrf.mxu3  ;;  %v1790_v0 = vpop.f32.mrf.mxu1  ;;  %v1739_v8 = vunpack.c.l.b16 %v1736_v22  ;;  %v2013_v10 = vrot.slane %v2012_v29, 4  ;;  %v2169_v62 = vrot.slane %v2167_v42, 4 }
 0x247   : > { %v2384_v17 = vmax.f32 %v2352_v30, 0.0  ;;  %v2142_v37 = vadd.f32 %v2077_v55, %v1983_v46  ;;  %2800 = vmatmul.msk.bf16.gmra.mxu0 %vm723_vm3, %v3720_v35  ;;  %v1738_v46 = vunpack.c.l.b16 %v1733_v5  ;;  %v2022_v30 = vor.u32 %v2021_v23, %v2017_v1  ;;  %v2823_v23 = vld [vmem:[%s2948_s30 + $0xcc] sm:$0xff] }
 0x248   : > { %v1852_v26 = vadd.f32 %v1790_v0, %v3718_v40 }
 0x249   : > { %v2416_v49 = vpack.c.bf16 %v2384_v17, %v2384_v17  ;;  %v2281_v39 = vadd.f32 %v2216_v41, %v2142_v37  ;;  %v1920_v12 = vpop.f32.mrf.mxu2  ;;  %2748 = vmatmul.msk.bf16.gmra.mxu1 %vm723_vm3, %v3720_v35  ;;  %v281_v35 = vld [vmem:[%s2948_s30 + $0xd4] sm:$0x1]  ;;  %v2023_v56 = vrot.slane %v2022_v30, 4 }
 0x24a   : > { %v1984_v15 = vadd.f32 %v1920_v12, %v1851_v53  ;;  %v2025_v41 = vshll.u32 %v281_v35, 16  ;;  %v2170_v61 = vrot.slane %v281_v35, 5 }
 0x24b   : > { %2449 = vst.msk [vmem:[%s3887_s26 + $0x24] sm:$0xf] %vm2439_vm8, %v2416_v49  ;;  %v2317_v58 = vmul.f32 %v3867_v32, %v2281_v39 }
 0x24c   : > { %v2218_v3 = vpop.f32.mrf.mxu0  ;;  %v2027_v34 = vrot.slane %v2025_v41, 5 }
 0x24d   : > { %v2353_v43 = vadd.f32 %v3874_v21, %v2317_v58  ;;  %v2786_v58 = vrot.slane %v3970_v27, 9 }
 0x24e   : > { %v2079_v11 = vpop.f32.mrf.mxu3  ;;  %2768 = vmatmul.msk.bf16.gmra.mxu2 %vm723_vm3, %v3729_v9  ;;  %v1792_v57 = vpop.f32.mrf.mxu1  ;;  %v1740_v9 = vpack.c.b16 %v1739_v8, %v1738_v46  ;;  %v2028_v12 = vsel %vm2978_vm4, %v2023_v56, %v2027_v34 }
 0x24f   : > { %v2385_v2 = vmax.f32 %v2353_v43, 0.0  ;;  %v2143_v14 = vadd.f32 %v2079_v11, %v1984_v15  ;;  %v1853_v22 = vadd.f32 %v1792_v57, %v3732_v28  ;;  %v2031_v38 = vunpack.c.l.b16 %v2028_v12 }
 0x250   : > { %v2171_v28 = vsel %vm3281_vm7, %v2169_v62, %v2170_v61 }
 0x251   : > { %v2417_v55 = vpack.c.bf16 %v2385_v2, %v2385_v2  ;;  %v2282_v45 = vadd.f32 %v2218_v3, %v2143_v14  ;;  %v1923_v17 = vpop.f32.mrf.mxu2  ;;  %v2168_v2 = vsel %vm3281_vm7, %v2786_v58, %v2167_v42  ;;  %v2174_v30 = vunpack.c.l.b16 %v2171_v28 }
 0x252   : > { %v1985_v16 = vadd.f32 %v1923_v17, %v1852_v26  ;;  %v2173_v29 = vunpack.c.l.b16 %v2168_v2 }
 0x253   : > { %2450 = vst.msk [vmem:[%s3887_s26 + $0x28] sm:$0xf] %vm2439_vm8, %v2417_v55  ;;  %v2318_v37 = vmul.f32 %v3867_v32, %v2282_v45  ;;  %2784 = vmatmul.msk.bf16.gmra.mxu3 %vm723_vm3, %v3736_v24  ;;  %v2018_v24 = vsel %vm2978_vm4, %v2013_v10, %v2017_v1 }
 0x254   : > { %v2221_v49 = vpop.f32.mrf.mxu0  ;;  %v2030_v3 = vunpack.c.l.b16 %v2018_v24 }
 0x255   : > { %v2354_v51 = vadd.f32 %v3874_v21, %v2318_v37  ;;  %v2175_v37 = vpack.c.b16 %v2174_v30, %v2173_v29 }
 0x256   : > { %v2082_v40 = vpop.f32.mrf.mxu3  ;;  %v1795_v0 = vpop.f32.mrf.mxu1  ;;  %v2032_v8 = vpack.c.b16 %v2031_v38, %v2030_v3 }
 0x257   : > { %v2386_v39 = vmax.f32 %v2354_v51, 0.0  ;;  %v2144_v53 = vadd.f32 %v2082_v40, %v1985_v16  ;;  %2801 = vmatmul.msk.bf16.gmra.mxu0 %vm723_vm3, %v1740_v9  ;;  %v1854_v45 = vadd.f32 %v1795_v0, %v3743_v19 }
 0x259   : > { %v2418_v15 = vpack.c.bf16 %v2386_v39, %v2386_v39  ;;  %v2283_v5 = vadd.f32 %v2221_v49, %v2144_v53  ;;  %v1925_v47 = vpop.f32.mrf.mxu2  ;;  %2749 = vmatmul.msk.bf16.gmra.mxu1 %vm723_vm3, %v1740_v9 }
 0x25a   : > { %v1986_v1 = vadd.f32 %v1925_v47, %v1853_v22 }
 0x25b   : > { %2451 = vst.msk [vmem:[%s3887_s26 + $0x2c] sm:$0xf] %vm2439_vm8, %v2418_v15  ;;  %v2319_v43 = vmul.f32 %v3867_v32, %v2283_v5 }
 0x25c   : > { %v2223_v27 = vpop.f32.mrf.mxu0 }
 0x25d   : > { %v2355_v11 = vadd.f32 %v3874_v21, %v2319_v43 }
 0x25e   : > { %v2084_v57 = vpop.f32.mrf.mxu3  ;;  %2769 = vmatmul.msk.bf16.gmra.mxu2 %vm723_vm3, %v2823_v23  ;;  %v1797_v35 = vpop.f32.mrf.mxu1 }
 0x25f   : > { %v2387_v14 = vmax.f32 %v2355_v11, 0.0  ;;  %v2145_v46 = vadd.f32 %v2084_v57, %v1986_v1  ;;  %v1855_v49 = vadd.f32 %v1797_v35, %v3748_v59 }
 0x261   : > { %v2419_v41 = vpack.c.bf16 %v2387_v14, %v2387_v14  ;;  %v2284_v55 = vadd.f32 %v2223_v27, %v2145_v46  ;;  %v1928_v26 = vpop.f32.mrf.mxu2 }
 0x262   : > { %v1987_v17 = vadd.f32 %v1928_v26, %v1854_v45 }
 0x263   : > { %2452 = vst.msk [vmem:[%s3887_s26 + $0x30] sm:$0xf] %vm2439_vm8, %v2419_v41  ;;  %v2320_v20 = vmul.f32 %v3867_v32, %v2284_v55  ;;  %2785 = vmatmul.msk.bf16.gmra.mxu3 %vm723_vm3, %v2032_v8 }
 0x264   : > { %v2226_v16 = vpop.f32.mrf.mxu0 }
 0x265   : > { %v2356_v9 = vadd.f32 %v3874_v21, %v2320_v20 }
 0x266   : > { %v2087_v10 = vpop.f32.mrf.mxu3  ;;  %v1800_v56 = vpop.f32.mrf.mxu1 }
 0x267   : > { %v2388_v34 = vmax.f32 %v2356_v9, 0.0  ;;  %v2146_v42 = vadd.f32 %v2087_v10, %v1987_v17  ;;  %2802 = vmatmul.msk.bf16.gmra.mxu0 %vm723_vm3, %v2175_v37  ;;  %v1856_v47 = vadd.f32 %v1800_v56, %v3757_v18 }
 0x269   : > { %v2420_v19 = vpack.c.bf16 %v2388_v34, %v2388_v34  ;;  %v2285_v51 = vadd.f32 %v2226_v16, %v2146_v42  ;;  %v1930_v40 = vpop.f32.mrf.mxu2 }
 0x26a   : > { %v1988_v39 = vadd.f32 %v1930_v40, %v1855_v49 }
 0x26b   : > { %2453 = vst.msk [vmem:[%s3887_s26 + $0x34] sm:$0xf] %vm2439_vm8, %v2420_v19  ;;  %v2321_v0 = vmul.f32 %v3867_v32, %v2285_v51 }
 0x26c   : > { %v2228_v24 = vpop.f32.mrf.mxu0 }
 0x26d   : > { %v2357_v53 = vadd.f32 %v3874_v21, %v2321_v0 }
 0x26e   : > { %v2089_v12 = vpop.f32.mrf.mxu3  ;;  %v1802_v58 = vpop.f32.mrf.mxu1 }
 0x26f   : > { %v2389_v62 = vmax.f32 %v2357_v53, 0.0  ;;  %v2147_v15 = vadd.f32 %v2089_v12, %v1988_v39  ;;  %v1857_v57 = vadd.f32 %v1802_v58, %v3762_v13 }
 0x271   : > { %v2421_v5 = vpack.c.bf16 %v2389_v62, %v2389_v62  ;;  %v2286_v22 = vadd.f32 %v2228_v24, %v2147_v15  ;;  %v1933_v61 = vpop.f32.mrf.mxu2 }
 0x272   : > { %v1989_v23 = vadd.f32 %v1933_v61, %v1856_v47 }
 0x273   : > { %2454 = vst.msk [vmem:[%s3887_s26 + $0x38] sm:$0xf] %vm2439_vm8, %v2421_v5  ;;  %v2322_v59 = vmul.f32 %v3867_v32, %v2286_v22 }
 0x274   : > { %v2231_v1 = vpop.f32.mrf.mxu0 }
 0x275   : > { %v2358_v43 = vadd.f32 %v3874_v21, %v2322_v59 }
 0x276   : > { %v2092_v3 = vpop.f32.mrf.mxu3  ;;  %v1805_v38 = vpop.f32.mrf.mxu1 }
 0x277   : > { %v2390_v11 = vmax.f32 %v2358_v43, 0.0  ;;  %v2148_v27 = vadd.f32 %v2092_v3, %v1989_v23  ;;  %v1858_v20 = vadd.f32 %v1805_v38, %v3771_v52 }
 0x279   : > { %v2422_v2 = vpack.c.bf16 %v2390_v11, %v2390_v11  ;;  %v2287_v28 = vadd.f32 %v2231_v1, %v2148_v27  ;;  %v1935_v35 = vpop.f32.mrf.mxu2 }
 0x27a   : > { %v1990_v14 = vadd.f32 %v1935_v35, %v1857_v57 }
 0x27b   : > { %2455 = vst.msk [vmem:[%s3887_s26 + $0x3c] sm:$0xf] %vm2439_vm8, %v2422_v2  ;;  %v2323_v18 = vmul.f32 %v3867_v32, %v2287_v28 }
 0x27c   : > { %v2233_v8 = vpop.f32.mrf.mxu0 }
 0x27d   : > { %v2359_v46 = vadd.f32 %v3874_v21, %v2323_v18 }
 0x27e   : > { %v2094_v29 = vpop.f32.mrf.mxu3  ;;  %v1807_v30 = vpop.f32.mrf.mxu1 }
 0x27f   : > { %v2391_v41 = vmax.f32 %v2359_v46, 0.0  ;;  %v2149_v55 = vadd.f32 %v2094_v29, %v1990_v14  ;;  %v1859_v49 = vadd.f32 %v1807_v30, %v3776_v50 }
 0x281   : > { %v2423_v45 = vpack.c.bf16 %v2391_v41, %v2391_v41  ;;  %v2288_v26 = vadd.f32 %v2233_v8, %v2149_v55  ;;  %v1938_v17 = vpop.f32.mrf.mxu2 }
 0x282   : > { %v1991_v37 = vadd.f32 %v1938_v17, %v1858_v20 }
 0x283   : > { %2456 = vst.msk [vmem:[%s3887_s26 + $0x40] sm:$0xf] %vm2439_vm8, %v2423_v45  ;;  %v2324_v13 = vmul.f32 %v3867_v32, %v2288_v26 }
 0x284   : > { %v2236_v16 = vpop.f32.mrf.mxu0 }
 0x285   : > { %v2360_v9 = vadd.f32 %v3874_v21, %v2324_v13 }
 0x286   : > { %v2097_v10 = vpop.f32.mrf.mxu3  ;;  %v1810_v56 = vpop.f32.mrf.mxu1 }
 0x287   : > { %v2392_v34 = vmax.f32 %v2360_v9, 0.0  ;;  %v2150_v42 = vadd.f32 %v2097_v10, %v1991_v37  ;;  %v1860_v22 = vadd.f32 %v1810_v56, %v3785_v60 }
 0x289   : > { %v2424_v19 = vpack.c.bf16 %v2392_v34, %v2392_v34  ;;  %v2289_v51 = vadd.f32 %v2236_v16, %v2150_v42  ;;  %v1940_v40 = vpop.f32.mrf.mxu2 }
 0x28a   : > { %v1992_v0 = vadd.f32 %v1940_v40, %v1859_v49 }
 0x28b   : > { %2457 = vst.msk [vmem:[%s3887_s26 + $0x44] sm:$0xf] %vm2439_vm8, %v2424_v19  ;;  %v2325_v52 = vmul.f32 %v3867_v32, %v2289_v51 }
 0x28c   : > { %v2238_v53 = vpop.f32.mrf.mxu0 }
 0x28d   : > { %v2361_v39 = vadd.f32 %v3874_v21, %v2325_v52 }
 0x28e   : > { %v2099_v24 = vpop.f32.mrf.mxu3  ;;  %v1812_v12 = vpop.f32.mrf.mxu1 }
 0x28f   : > { %v2393_v58 = vmax.f32 %v2361_v39, 0.0  ;;  %v2151_v62 = vadd.f32 %v2099_v24, %v1992_v0  ;;  %v1861_v2 = vadd.f32 %v1812_v12, %v3790_v4 }
 0x291   : > { %v2425_v15 = vpack.c.bf16 %v2393_v58, %v2393_v58  ;;  %v2290_v5 = vadd.f32 %v2238_v53, %v2151_v62  ;;  %v1943_v47 = vpop.f32.mrf.mxu2 }
 0x292   : > { %v1993_v61 = vadd.f32 %v1943_v47, %v1860_v22 }
 0x293   : > { %2458 = vst.msk [vmem:[%s3887_s26 + $0x48] sm:$0xf] %vm2439_vm8, %v2425_v15  ;;  %v2326_v50 = vmul.f32 %v3867_v32, %v2290_v5 }
 0x294   : > { %v2241_v23 = vpop.f32.mrf.mxu0 }
 0x295   : > { %v2362_v59 = vadd.f32 %v3874_v21, %v2326_v50 }
 0x296   : > { %v2102_v43 = vpop.f32.mrf.mxu3  ;;  %v1815_v1 = vpop.f32.mrf.mxu1 }
 0x297   : > { %v2394_v3 = vmax.f32 %v2362_v59, 0.0  ;;  %v2152_v38 = vadd.f32 %v2102_v43, %v1993_v61  ;;  %v1862_v55 = vadd.f32 %v1815_v1, %v3799_v48 }
 0x299   : > { %v2426_v11 = vpack.c.bf16 %v2394_v3, %v2394_v3  ;;  %v2291_v27 = vadd.f32 %v2241_v23, %v2152_v38  ;;  %v1945_v28 = vpop.f32.mrf.mxu2 }
 0x29a   : > { %v1994_v57 = vadd.f32 %v1945_v28, %v1861_v2 }
 0x29b   : > { %2459 = vst.msk [vmem:[%s3887_s26 + $0x4c] sm:$0xf] %vm2439_vm8, %v2426_v11  ;;  %v2327_v60 = vmul.f32 %v3867_v32, %v2291_v27 }
 0x29c   : > { %v2243_v18 = vpop.f32.mrf.mxu0 }
 0x29d   : > { %v2363_v35 = vadd.f32 %v3874_v21, %v2327_v60 }
 0x29e   : > { %v2104_v14 = vpop.f32.mrf.mxu3  ;;  %v1817_v46 = vpop.f32.mrf.mxu1 }
 0x29f   : > { %v2395_v8 = vmax.f32 %v2363_v35, 0.0  ;;  %v2153_v29 = vadd.f32 %v2104_v14, %v1994_v57  ;;  %v1863_v34 = vadd.f32 %v1817_v46, %v3804_v33 }
 0x2a1   : > { %v2427_v30 = vpack.c.bf16 %v2395_v8, %v2395_v8  ;;  %v2292_v41 = vadd.f32 %v2243_v18, %v2153_v29  ;;  %v1948_v45 = vpop.f32.mrf.mxu2 }
 0x2a2   : > { %v1995_v26 = vadd.f32 %v1948_v45, %v1862_v55 }
 0x2a3   : > { %2460 = vst.msk [vmem:[%s3887_s26 + $0x50] sm:$0xf] %vm2439_vm8, %v2427_v30  ;;  %v2328_v4 = vmul.f32 %v3867_v32, %v2292_v41 }
 0x2a4   : > { %v2246_v17 = vpop.f32.mrf.mxu0 }
 0x2a5   : > { %v2364_v20 = vadd.f32 %v3874_v21, %v2328_v4 }
 0x2a6   : > { %v2107_v13 = vpop.f32.mrf.mxu3  ;;  %v1820_v37 = vpop.f32.mrf.mxu1 }
 0x2a7   : > { %v2396_v9 = vmax.f32 %v2364_v20, 0.0  ;;  %v2154_v16 = vadd.f32 %v2107_v13, %v1995_v26  ;;  %v1864_v12 = vadd.f32 %v1820_v37, %v3813_v7 }
 0x2a9   : > { %v2428_v10 = vpack.c.bf16 %v2396_v9, %v2396_v9  ;;  %v2293_v56 = vadd.f32 %v2246_v17, %v2154_v16  ;;  %v1950_v42 = vpop.f32.mrf.mxu2 }
 0x2aa   : > { %v1996_v19 = vadd.f32 %v1950_v42, %v1863_v34 }
 0x2ab   : > { %2461 = vst.msk [vmem:[%s3887_s26 + $0x54] sm:$0xf] %vm2439_vm8, %v2428_v10  ;;  %v2329_v48 = vmul.f32 %v3867_v32, %v2293_v56 }
 0x2ac   : > { %v2248_v49 = vpop.f32.mrf.mxu0 }
 0x2ad   : > { %v2365_v51 = vadd.f32 %v3874_v21, %v2329_v48 }
 0x2ae   : > { %v2109_v40 = vpop.f32.mrf.mxu3  ;;  %v1822_v52 = vpop.f32.mrf.mxu1 }
 0x2af   : > { %v2397_v0 = vmax.f32 %v2365_v51, 0.0  ;;  %v2155_v39 = vadd.f32 %v2109_v40, %v1996_v19  ;;  %v1865_v43 = vadd.f32 %v1822_v52, %v3818_v36 }
 0x2b1   : > { %v2429_v53 = vpack.c.bf16 %v2397_v0, %v2397_v0  ;;  %v2294_v24 = vadd.f32 %v2248_v49, %v2155_v39  ;;  %v1953_v58 = vpop.f32.mrf.mxu2 }
 0x2b2   : > { %v1997_v62 = vadd.f32 %v1953_v58, %v1864_v12 }
 0x2b3   : > { %2462 = vst.msk [vmem:[%s3887_s26 + $0x58] sm:$0xf] %vm2439_vm8, %v2429_v53  ;;  %v2330_v33 = vmul.f32 %v3867_v32, %v2294_v24 }
 0x2b4   : > { %v2251_v5 = vpop.f32.mrf.mxu0 }
 0x2b5   : > { %v2366_v15 = vadd.f32 %v3874_v21, %v2330_v33 }
 0x2b6   : > { %v2112_v22 = vpop.f32.mrf.mxu3  ;;  %v1825_v47 = vpop.f32.mrf.mxu1 }
 0x2b7   : > { %v2398_v50 = vmax.f32 %v2366_v15, 0.0  ;;  %v2156_v61 = vadd.f32 %v2112_v22, %v1997_v62  ;;  %v1866_v18 = vadd.f32 %v1825_v47, %v3827_v6 }
 0x2b9   : > { %v2430_v59 = vpack.c.bf16 %v2398_v50, %v2398_v50  ;;  %v2295_v23 = vadd.f32 %v2251_v5, %v2156_v61  ;;  %v1955_v1 = vpop.f32.mrf.mxu2 }
 0x2ba   : > { %v1998_v3 = vadd.f32 %v1955_v1, %v1865_v43 }
 0x2bb   : > { %2463 = vst.msk [vmem:[%s3887_s26 + $0x5c] sm:$0xf] %vm2439_vm8, %v2430_v59  ;;  %v2331_v7 = vmul.f32 %v3867_v32, %v2295_v23 }
 0x2bc   : > { %v2253_v11 = vpop.f32.mrf.mxu0 }
 0x2bd   : > { %v2367_v38 = vadd.f32 %v3874_v21, %v2331_v7 }
 0x2be   : > { %v2114_v27 = vpop.f32.mrf.mxu3  ;;  %v1827_v2 = vpop.f32.mrf.mxu1 }
 0x2bf   : > { %v2399_v28 = vmax.f32 %v2367_v38, 0.0  ;;  %v2157_v60 = vadd.f32 %v2114_v27, %v1998_v3  ;;  %v1867_v20 = vadd.f32 %v1827_v2, %v3832_v25 }
 0x2c1   : > { %v2431_v57 = vpack.c.bf16 %v2399_v28, %v2399_v28  ;;  %v2296_v35 = vadd.f32 %v2253_v11, %v2157_v60  ;;  %v1958_v14 = vpop.f32.mrf.mxu2 }
 0x2c2   : > { %v1999_v46 = vadd.f32 %v1958_v14, %v1866_v18 }
 0x2c3   : > { %2464 = vst.msk [vmem:[%s3887_s26 + $0x60] sm:$0xf] %vm2439_vm8, %v2431_v57  ;;  %v2332_v36 = vmul.f32 %v3867_v32, %v2296_v35 }
 0x2c4   : > { %v2256_v29 = vpop.f32.mrf.mxu0 }
 0x2c5   : > { %v2368_v8 = vadd.f32 %v3874_v21, %v2332_v36 }
 0x2c6   : > { %v2117_v30 = vpop.f32.mrf.mxu3  ;;  %v1830_v45 = vpop.f32.mrf.mxu1 }
 0x2c7   : > { %v2400_v41 = vmax.f32 %v2368_v8, 0.0  ;;  %v2158_v55 = vadd.f32 %v2117_v30, %v1999_v46  ;;  %v1868_v48 = vadd.f32 %v1830_v45, %v3841_v54 }
 0x2c9   : > { %v2432_v4 = vpack.c.bf16 %v2400_v41, %v2400_v41  ;;  %v2297_v26 = vadd.f32 %v2256_v29, %v2158_v55  ;;  %v1960_v17 = vpop.f32.mrf.mxu2 }
 0x2ca   : > { %v2000_v13 = vadd.f32 %v1960_v17, %v1867_v20 }
 0x2cb   : > { %2465 = vst.msk [vmem:[%s3887_s26 + $0x64] sm:$0xf] %vm2439_vm8, %v2432_v4  ;;  %v2333_v6 = vmul.f32 %v3867_v32, %v2297_v26 }
 0x2cc   : > { %v2258_v9 = vpop.f32.mrf.mxu0 }
 0x2cd   : > { %v2369_v37 = vadd.f32 %v3874_v21, %v2333_v6 }
 0x2ce   : > { %v2119_v16 = vpop.f32.mrf.mxu3  ;;  %v1832_v51 = vpop.f32.mrf.mxu1 }
 0x2cf   : > { %v2401_v10 = vmax.f32 %v2369_v37, 0.0  ;;  %v2159_v56 = vadd.f32 %v2119_v16, %v2000_v13  ;;  %v1869_v58 = vadd.f32 %v1832_v51, %v3846_v31 }
 0x2d1   : > { %v2433_v34 = vpack.c.bf16 %v2401_v10, %v2401_v10  ;;  %v2298_v42 = vadd.f32 %v2258_v9, %v2159_v56  ;;  %v1963_v19 = vpop.f32.mrf.mxu2 }
 0x2d2   : > { %v2001_v49 = vadd.f32 %v1963_v19, %v1868_v48 }
 0x2d3   : > { %2466 = vst.msk [vmem:[%s3887_s26 + $0x68] sm:$0xf] %vm2439_vm8, %v2433_v34  ;;  %v2334_v25 = vmul.f32 %v3867_v32, %v2298_v42 }
 0x2d4   : > { %v2261_v52 = vpop.f32.mrf.mxu0 }
 0x2d5   : > { %v2370_v40 = vadd.f32 %v3874_v21, %v2334_v25 }
 0x2d6   : > { %v2122_v0 = vpop.f32.mrf.mxu3  ;;  %v1835_v15 = vpop.f32.mrf.mxu1 }
 0x2d7   : > { %v2402_v39 = vmax.f32 %v2370_v40, 0.0  ;;  %v2160_v53 = vadd.f32 %v2122_v0, %v2001_v49  ;;  %v1870_v43 = vadd.f32 %v1835_v15, %v3855_v44 }
 0x2d9   : > { %v2434_v24 = vpack.c.bf16 %v2402_v39, %v2402_v39  ;;  %v2299_v12 = vadd.f32 %v2261_v52, %v2160_v53  ;;  %v1965_v33 = vpop.f32.mrf.mxu2 }
 0x2da   : > { %v2002_v62 = vadd.f32 %v1965_v33, %v1869_v58 }
 0x2db   : > { %2467 = vst.msk [vmem:[%s3887_s26 + $0x6c] sm:$0xf] %vm2439_vm8, %v2434_v24  ;;  %v2335_v54 = vmul.f32 %v3867_v32, %v2299_v12 }
 0x2dc   : > { %v2263_v22 = vpop.f32.mrf.mxu0 }
 0x2dd   : > { %v2371_v5 = vadd.f32 %v3874_v21, %v2335_v54 }
 0x2de   : > { %v2124_v47 = vpop.f32.mrf.mxu3  ;;  %v1837_v38 = vpop.f32.mrf.mxu1 }
 0x2df   : > { %v2403_v50 = vmax.f32 %v2371_v5, 0.0  ;;  %v2161_v61 = vadd.f32 %v2124_v47, %v2002_v62  ;;  %v1871_v35 = vadd.f32 %v1837_v38, %v3860_v63 }
 0x2e1   : > { %v2435_v59 = vpack.c.bf16 %v2403_v50, %v2403_v50  ;;  %v2300_v23 = vadd.f32 %v2263_v22, %v2161_v61  ;;  %v1968_v1 = vpop.f32.mrf.mxu2 }
 0x2e2   : > { %v2003_v7 = vadd.f32 %v1968_v1, %v1870_v43 }
 0x2e3   : > { %2468 = vst.msk [vmem:[%s3887_s26 + $0x70] sm:$0xf] %vm2439_vm8, %v2435_v59  ;;  %v2336_v31 = vmul.f32 %v3867_v32, %v2300_v23 }
 0x2e4   : > { %v2266_v11 = vpop.f32.mrf.mxu0 }
 0x2e5   : > { %v2372_v3 = vadd.f32 %v3874_v21, %v2336_v31 }
 0x2e6   : > { %v2127_v27 = vpop.f32.mrf.mxu3 }
 0x2e7   : > { %v2404_v2 = vmax.f32 %v2372_v3, 0.0  ;;  %v2162_v28 = vadd.f32 %v2127_v27, %v2003_v7 }
 0x2e9   : > { %v2436_v60 = vpack.c.bf16 %v2404_v2, %v2404_v2  ;;  %v2301_v57 = vadd.f32 %v2266_v11, %v2162_v28  ;;  %v1970_v18 = vpop.f32.mrf.mxu2 }
 0x2ea   : > { %v2004_v14 = vadd.f32 %v1970_v18, %v1871_v35 }
 0x2eb   : > { %2469 = vst.msk [vmem:[%s3887_s26 + $0x74] sm:$0xf] %vm2439_vm8, %v2436_v60  ;;  %v2337_v44 = vmul.f32 %v3867_v32, %v2301_v57 }
 0x2ec   : > { %v2268_v30 = vpop.f32.mrf.mxu0 }
 0x2ed   : > { %v2373_v36 = vadd.f32 %v3874_v21, %v2337_v44 }
 0x2ee   : > { %v2129_v46 = vpop.f32.mrf.mxu3 }
 0x2ef   : > { %v2405_v8 = vmax.f32 %v2373_v36, 0.0  ;;  %v2163_v29 = vadd.f32 %v2129_v46, %v2004_v14 }
 0x2f1   : > { %v2437_v41 = vpack.c.bf16 %v2405_v8, %v2405_v8  ;;  %v2302_v55 = vadd.f32 %v2268_v30, %v2163_v29 }
 0x2f3   : > { %2470 = vst.msk [vmem:[%s3887_s26 + $0x78] sm:$0xf] %vm2439_vm8, %v2437_v41  ;;  %v2338_v45 = vmul.f32 %v3867_v32, %v2302_v55 }
 0x2f5   : > { %v2374_v63 = vadd.f32 %v3874_v21, %v2338_v45 }
 0x2f7   : > { %v2406_v4 = vmax.f32 %v2374_v63, 0.0 }
 0x2f9   : > { %v2438_v26 = vpack.c.bf16 %v2406_v4, %v2406_v4 }
 0x2fb   : > { %2471 = vst.msk [vmem:[%s3887_s26 + $0x7c] sm:$0xf] %vm2439_vm8, %v2438_v26 }
 0x2fc PF: > { %s14_s17 = sadd.s32 1, %s2885_s17   ;;  %s4273_s15 = smov %s2881_s16 }
 0x2fd   : > { %p11_p5 = scmp.ge.s32.totalorder %s14_s17, 4   ;;  %s4274_s16 = smov %s4276_s18 }
 0x2ff   :  { %13 = sbr.rel (!%p11_p5) target bundleno = 2 (0x2), region = 67 }

</bundles_post_ra>
